<compile_context>
chip_gen: v7x
topology: tpu7x:2x2x1
jax: 0.10.0
libtpu: 0.0.40
codegen_flags: <defaults>
</compile_context>

<pallas_src>
import functools

import jax
import jax.numpy as jnp
from jax import lax
from jax.experimental import pallas as pl
from jax.experimental.pallas import tpu as pltpu


def _gat_net_kernel(x_ref, adj_ref, w1_ref, a1d_ref, a1sT_ref, b1_ref,
                    w2_ref, a2d_ref, a2s_ref, b2_ref,
                    out_ref, h_scratch,
                    *, heads1, c1, out_valid, negative_slope):
    NEG = jnp.float32(-1e30)

    x = x_ref[...]                                   # [N, F_pad]
    w1 = w1_ref[...]                                 # [F_pad, H1*C1]
    adj = adj_ref[...].astype(jnp.float32)           # [N, N] 0/1 (int8 in HBM)
    N = x.shape[0]

    # Additive attention mask, built once and shared by both layers:
    # 0 where there is an edge, -1e30 otherwise (exp underflows to exactly 0).
    neg_bias = (adj - 1.0) * jnp.float32(1e30)       # [N, N]

    # ---------------- layer 1: GATConv(F_in -> C1, heads=H1, concat) + ELU ----
    xp = jnp.dot(x, w1, preferred_element_type=jnp.float32)          # [N, H1*C1]

    # All-head attention logits via two MXU matmuls (att vectors pre-folded
    # into block-structured matrices on the host side):
    #   alpha_dst[i, h] = sum_c xp[i, h*C1+c] * att_dst[h, c]
    alpha_dst = jnp.dot(xp, a1d_ref[...],
                        preferred_element_type=jnp.float32)          # [N, H1]
    #   alpha_src_t[h, j] = sum_c att_src[h, c] * xp[j, h*C1+c]  (row layout,
    #   produced directly — no transpose, no rank-1 matmuls)
    alpha_src_t = lax.dot_general(a1sT_ref[...], xp,
                                  (((1,), (1,)), ((), ())),
                                  preferred_element_type=jnp.float32)  # [H1, N]

    b1 = b1_ref[...]                                                  # [1, H1*C1]

    for h in range(heads1):                          # small & static -> unrolled
        sl = slice(h * c1, (h + 1) * c1)
        # e[i, j] = alpha_dst[i, h] + alpha_src[j, h]   (VPU broadcast add)
        e = alpha_dst[:, h:h + 1] + alpha_src_t[h:h + 1, :]           # [N, N]
        e = jnp.where(e > 0, e, negative_slope * e)                   # LeakyReLU
        e = e + neg_bias                                              # mask
        m = jnp.max(e, axis=1, keepdims=True)
        p = jnp.exp(e - m)                                            # masked -> 0
        att = p / jnp.sum(p, axis=1, keepdims=True)                   # [N, N]
        # aggregate, add bias slice, ELU, and write head slice in place
        hh = jnp.dot(att, xp[:, sl], preferred_element_type=jnp.float32)  # [N, C1]
        hh = hh + b1[:, sl]
        hh = jnp.where(hh > 0, hh, jnp.exp(hh) - 1.0)                 # ELU
        h_scratch[:, sl] = hh

    hmid = h_scratch[...]                                             # [N, H1*C1]

    # -------- layer 2: GATConv(H1*C1 -> 7, heads=1, concat=False) + log_softmax
    xp2 = jnp.dot(hmid, w2_ref[...],
                  preferred_element_type=jnp.float32)                 # [N, 128] lane-padded
    a2_dst = jnp.dot(xp2, a2d_ref[...],
                     preferred_element_type=jnp.float32)              # [N, 1]
    a2_src_t = lax.dot_general(a2s_ref[...], xp2,
                               (((1,), (1,)), ((), ())),
                               preferred_element_type=jnp.float32)    # [1, N]
    e2 = a2_dst + a2_src_t                                            # [N, N]
    e2 = jnp.where(e2 > 0, e2, negative_slope * e2)
    e2 = e2 + neg_bias
    m2 = jnp.max(e2, axis=1, keepdims=True)
    p2 = jnp.exp(e2 - m2)
    att2 = p2 / jnp.sum(p2, axis=1, keepdims=True)
    logits = jnp.dot(att2, xp2,
                     preferred_element_type=jnp.float32) + b2_ref[...]  # [N, 128]

    # log_softmax over the first `out_valid` (=7) lanes of the 128-lane slab
    col = lax.broadcasted_iota(jnp.int32, logits.shape, 1)
    z = jnp.where(col < out_valid, logits, NEG)
    mx = jnp.max(z, axis=1, keepdims=True)
    ez = jnp.exp(z - mx)
    lse = jnp.log(jnp.sum(ez, axis=1, keepdims=True))
    out_ref[...] = (z - mx - lse).astype(out_ref.dtype)


def net_forward(x, adj, params):
    """Fused 2-layer GAT forward. x: [N, F_in] f32, adj: [N, N] int8 mask."""
    N, F_in = x.shape
    H1, C1 = 8, 8
    C2 = 7
    LANE = 128
    F_pad = ((F_in + LANE - 1) // LANE) * LANE

    # K-pad the first matmul's contraction dim (1433 -> 1536).
    x_pad = jnp.pad(x, ((0, 0), (0, F_pad - F_in)))
    w1_pad = jnp.pad(params["w1"], ((0, F_pad - F_in), (0, 0)))        # [F_pad, 64]

    # Fold the per-head attention vectors into block-structured matmul operands.
    head_ind = (jnp.repeat(jnp.arange(H1), C1)[:, None]
                == jnp.arange(H1)[None, :]).astype(jnp.float32)        # [64, 8]
    a1_dst_mat = params["adst1"].reshape(-1, 1) * head_ind             # [64, 8]
    a1_src_matT = (params["asrc1"].reshape(-1, 1) * head_ind).T        # [8, 64]

    # Lane-pad the 7-wide layer-2 operands to 128 (lane-dense output stores).
    w2_pad = jnp.pad(params["w2"], ((0, 0), (0, LANE - C2)))           # [64, 128]
    b2_pad = jnp.pad(params["b2"], ((0, 0), (0, LANE - C2)))           # [1, 128]
    a2_dst_col = jnp.pad(params["adst2"].reshape(-1, 1),
                         ((0, LANE - C2), (0, 0)))                     # [128, 1]
    a2_src_row = jnp.pad(params["asrc2"], ((0, 0), (0, LANE - C2)))    # [1, 128]

    kernel = functools.partial(_gat_net_kernel, heads1=H1, c1=C1,
                               out_valid=C2, negative_slope=0.2)
    out_pad = pl.pallas_call(
        kernel,
        out_shape=jax.ShapeDtypeStruct((N, LANE), jnp.float32),
        in_specs=[pl.BlockSpec(memory_space=pltpu.MemorySpace.VMEM)] * 10,
        out_specs=pl.BlockSpec(memory_space=pltpu.MemorySpace.VMEM),
        scratch_shapes=[pltpu.VMEM((N, H1 * C1), jnp.float32)],
        compiler_params=pltpu.CompilerParams(
            vmem_limit_bytes=48 * 1024 * 1024),
    )(x_pad, adj, w1_pad, a1_dst_mat, a1_src_matT, params["b1"],
      w2_pad, a2_dst_col, a2_src_row, b2_pad)
    return out_pad[:, :C2]


def init_params(key):
    F_IN, H1, C1 = 1433, 8, 8
    F_MID, H2, C2 = H1 * C1, 1, 7
    ks = jax.random.split(key, 6)

    def glorot(k, shape):
        fan_in, fan_out = shape[-2], shape[-1]
        s = jnp.sqrt(6.0 / (fan_in + fan_out))
        return jax.random.uniform(k, shape, jnp.float32, -s, s)

    return {
        "w1":    glorot(ks[0], (F_IN, H1 * C1)),
        "asrc1": glorot(ks[1], (1, H1 * C1)),
        "adst1": glorot(ks[2], (1, H1 * C1)),
        "b1":    jnp.zeros((1, H1 * C1), jnp.float32),
        "w2":    glorot(ks[3], (F_MID, H2 * C2)),
        "asrc2": glorot(ks[4], (1, H2 * C2)),
        "adst2": glorot(ks[5], (1, H2 * C2)),
        "b2":    jnp.zeros((1, H2 * C2), jnp.float32),
    }


def build_adjacency(edge_index, num_nodes):
    """Dense int8 mask: adj[i, j] = 1 iff edge j -> i, with self-loops."""
    src, dst = edge_index[0], edge_index[1]
    adj = jnp.zeros((num_nodes, num_nodes), jnp.int8).at[dst, src].set(1)
    adj = jnp.maximum(adj, jnp.eye(num_nodes, dtype=jnp.int8))
    return adj


if __name__ == "__main__":
    N, F_IN = 32, 1433
    key = jax.random.PRNGKey(0)
    k_x, k_e, k_p = jax.random.split(key, 3)

    # deterministic node features (small Cora-like slice: 32 nodes x 1433 feats)
    x = jax.random.normal(k_x, (N, F_IN), jnp.float32)

    # deterministic synthetic graph: bidirectional ring + a few random edges
    idx = jnp.arange(N)
    ring_src = jnp.concatenate([idx, (idx + 1) % N])
    ring_dst = jnp.concatenate([(idx + 1) % N, idx])
    rnd_src = jax.random.randint(k_e, (48,), 0, N)
    rnd_dst = jax.random.randint(jax.random.fold_in(k_e, 1), (48,), 0, N)
    edge_index = jnp.stack([jnp.concatenate([ring_src, rnd_src]),
                            jnp.concatenate([ring_dst, rnd_dst])], axis=0)
    adj = build_adjacency(edge_index, N)

    params = init_params(k_p)

    out = jax.jit(net_forward)(x, adj, params)
    out = jax.block_until_ready(out)

    assert out.shape == (N, 7) and out.dtype == jnp.float32
    # rows of log_softmax must exp-sum to 1
    assert bool(jnp.all(jnp.abs(jnp.sum(jnp.exp(out), axis=1) - 1.0) < 1e-3))
    print("KERNEL_OK")
</pallas_src>

<mosaic_0001>
module attributes {stable_mosaic.version = 11 : i64} {
  func.func @_gat_net_kernel(%arg0: memref<32x1536xf32, #tpu.memory_space<vmem>>, %arg1: memref<32x32xi8, #tpu.memory_space<vmem>>, %arg2: memref<1536x64xf32, #tpu.memory_space<vmem>>, %arg3: memref<64x8xf32, #tpu.memory_space<vmem>>, %arg4: memref<8x64xf32, #tpu.memory_space<vmem>>, %arg5: memref<1x64xf32, #tpu.memory_space<vmem>>, %arg6: memref<64x128xf32, #tpu.memory_space<vmem>>, %arg7: memref<128x1xf32, #tpu.memory_space<vmem>>, %arg8: memref<1x128xf32, #tpu.memory_space<vmem>>, %arg9: memref<1x128xf32, #tpu.memory_space<vmem>>, %arg10: memref<32x128xf32, #tpu.memory_space<vmem>>, %arg11: memref<32x64xf32, #tpu.memory_space<vmem>>) attributes {dimension_semantics = [], scalar_prefetch = 0 : i64, scratch_operands = 1 : i64, tpu.core_type = #tpu.core_type<tc>} {
    %c0 = arith.constant 0 : index
    %c0_0 = arith.constant 0 : index
    %0 = vector.load %arg0[%c0, %c0_0] : memref<32x1536xf32, #tpu.memory_space<vmem>>, vector<32x1536xf32>
    %c0_1 = arith.constant 0 : index
    %c0_2 = arith.constant 0 : index
    %1 = vector.load %arg2[%c0_1, %c0_2] : memref<1536x64xf32, #tpu.memory_space<vmem>>, vector<1536x64xf32>
    %c0_3 = arith.constant 0 : index
    %c0_4 = arith.constant 0 : index
    %2 = vector.load %arg1[%c0_3, %c0_4] : memref<32x32xi8, #tpu.memory_space<vmem>>, vector<32x32xi8>
    %3 = arith.sitofp %2 : vector<32x32xi8> to vector<32x32xf32>
    %cst = arith.constant 1.000000e+00 : f32
    %4 = vector.broadcast %cst : f32 to vector<32x32xf32>
    %5 = arith.subf %3, %4 : vector<32x32xf32>
    %cst_5 = arith.constant 1.000000e+30 : f32
    %6 = vector.broadcast %cst_5 : f32 to vector<32x32xf32>
    %7 = arith.mulf %5, %6 : vector<32x32xf32>
    %cst_6 = arith.constant dense<0.000000e+00> : vector<32x64xf32>
    %8 = tpu.matmul %0, %1, %cst_6 {dimension_numbers = #tpu.dot_dimension_numbers<[1], [0], [0], [1], [0, 0, 1, 1], [], []>} : vector<32x1536xf32>, vector<1536x64xf32>, vector<32x64xf32> -> vector<32x64xf32>
    %c0_7 = arith.constant 0 : index
    %c0_8 = arith.constant 0 : index
    %9 = vector.load %arg3[%c0_7, %c0_8] : memref<64x8xf32, #tpu.memory_space<vmem>>, vector<64x8xf32>
    %cst_9 = arith.constant dense<0.000000e+00> : vector<32x8xf32>
    %10 = tpu.matmul %8, %9, %cst_9 {dimension_numbers = #tpu.dot_dimension_numbers<[1], [0], [0], [1], [0, 0, 1, 1], [], []>} : vector<32x64xf32>, vector<64x8xf32>, vector<32x8xf32> -> vector<32x8xf32>
    %c0_10 = arith.constant 0 : index
    %c0_11 = arith.constant 0 : index
    %11 = vector.load %arg4[%c0_10, %c0_11] : memref<8x64xf32, #tpu.memory_space<vmem>>, vector<8x64xf32>
    %cst_12 = arith.constant dense<0.000000e+00> : vector<8x32xf32>
    %12 = tpu.matmul %11, %8, %cst_12 {dimension_numbers = #tpu.dot_dimension_numbers<[1], [1], [0], [0], [0, 0, 1, 0], [], []>} : vector<8x64xf32>, vector<32x64xf32>, vector<8x32xf32> -> vector<8x32xf32>
    %c0_13 = arith.constant 0 : index
    %c0_14 = arith.constant 0 : index
    %13 = vector.load %arg5[%c0_13, %c0_14] : memref<1x64xf32, #tpu.memory_space<vmem>>, vector<1x64xf32>
    %14 = vector.extract_strided_slice %10 {offsets = [0, 0], sizes = [32, 1], strides = [1, 1]} : vector<32x8xf32> to vector<32x1xf32>
    %15 = vector.extract_strided_slice %12 {offsets = [0, 0], sizes = [1, 32], strides = [1, 1]} : vector<8x32xf32> to vector<1x32xf32>
    %16 = vector.broadcast %14 : vector<32x1xf32> to vector<32x32xf32>
    %17 = vector.broadcast %15 : vector<1x32xf32> to vector<32x32xf32>
    %18 = arith.addf %16, %17 : vector<32x32xf32>
    %cst_15 = arith.constant 0.000000e+00 : f32
    %19 = vector.broadcast %cst_15 : f32 to vector<32x32xf32>
    %20 = arith.cmpf ogt, %18, %19 : vector<32x32xf32>
    %cst_16 = arith.constant 2.000000e-01 : f32
    %21 = vector.broadcast %cst_16 : f32 to vector<32x32xf32>
    %22 = arith.mulf %21, %18 : vector<32x32xf32>
    %23 = arith.select %20, %18, %22 : vector<32x32xi1>, vector<32x32xf32>
    %24 = arith.addf %23, %7 : vector<32x32xf32>
    %cst_17 = arith.constant dense<0xFF800000> : vector<32xf32>
    %25 = vector.multi_reduction <maximumf>, %24, %cst_17 [1] : vector<32x32xf32> to vector<32xf32>
    %26 = vector.shape_cast %25 : vector<32xf32> to vector<32x1xf32>
    %27 = vector.broadcast %26 : vector<32x1xf32> to vector<32x32xf32>
    %28 = arith.subf %24, %27 : vector<32x32xf32>
    %29 = math.exp %28 : vector<32x32xf32>
    %cst_18 = arith.constant dense<0.000000e+00> : vector<32xf32>
    %30 = vector.multi_reduction <add>, %29, %cst_18 [1] : vector<32x32xf32> to vector<32xf32>
    %31 = vector.shape_cast %30 : vector<32xf32> to vector<32x1xf32>
    %32 = vector.broadcast %31 : vector<32x1xf32> to vector<32x32xf32>
    %33 = arith.divf %29, %32 : vector<32x32xf32>
    %34 = vector.extract_strided_slice %8 {offsets = [0, 0], sizes = [32, 8], strides = [1, 1]} : vector<32x64xf32> to vector<32x8xf32>
    %cst_19 = arith.constant dense<0.000000e+00> : vector<32x8xf32>
    %35 = tpu.matmul %33, %34, %cst_19 {dimension_numbers = #tpu.dot_dimension_numbers<[1], [0], [0], [1], [0, 0, 1, 1], [], []>} : vector<32x32xf32>, vector<32x8xf32>, vector<32x8xf32> -> vector<32x8xf32>
    %36 = vector.extract_strided_slice %13 {offsets = [0, 0], sizes = [1, 8], strides = [1, 1]} : vector<1x64xf32> to vector<1x8xf32>
    %37 = vector.broadcast %36 : vector<1x8xf32> to vector<32x8xf32>
    %38 = arith.addf %35, %37 : vector<32x8xf32>
    %cst_20 = arith.constant 0.000000e+00 : f32
    %39 = vector.broadcast %cst_20 : f32 to vector<32x8xf32>
    %40 = arith.cmpf ogt, %38, %39 : vector<32x8xf32>
    %41 = math.exp %38 : vector<32x8xf32>
    %cst_21 = arith.constant 1.000000e+00 : f32
    %42 = vector.broadcast %cst_21 : f32 to vector<32x8xf32>
    %43 = arith.subf %41, %42 : vector<32x8xf32>
    %44 = arith.select %40, %38, %43 : vector<32x8xi1>, vector<32x8xf32>
    %c0_22 = arith.constant 0 : index
    %c0_23 = arith.constant 0 : index
    %45 = vector.load %arg11[%c0_22, %c0_23] : memref<32x64xf32, #tpu.memory_space<vmem>>, vector<32x8xf32>
    tpu.vector_store %arg11[%c0_22, %c0_23], %44 {strides = array<i32>} : memref<32x64xf32, #tpu.memory_space<vmem>>, vector<32x8xf32>,
    %46 = vector.extract_strided_slice %10 {offsets = [0, 1], sizes = [32, 1], strides = [1, 1]} : vector<32x8xf32> to vector<32x1xf32>
    %47 = vector.extract_strided_slice %12 {offsets = [1, 0], sizes = [1, 32], strides = [1, 1]} : vector<8x32xf32> to vector<1x32xf32>
    %48 = vector.broadcast %46 : vector<32x1xf32> to vector<32x32xf32>
    %49 = vector.broadcast %47 : vector<1x32xf32> to vector<32x32xf32>
    %50 = arith.addf %48, %49 : vector<32x32xf32>
    %cst_24 = arith.constant 0.000000e+00 : f32
    %51 = vector.broadcast %cst_24 : f32 to vector<32x32xf32>
    %52 = arith.cmpf ogt, %50, %51 : vector<32x32xf32>
    %cst_25 = arith.constant 2.000000e-01 : f32
    %53 = vector.broadcast %cst_25 : f32 to vector<32x32xf32>
    %54 = arith.mulf %53, %50 : vector<32x32xf32>
    %55 = arith.select %52, %50, %54 : vector<32x32xi1>, vector<32x32xf32>
    %56 = arith.addf %55, %7 : vector<32x32xf32>
    %cst_26 = arith.constant dense<0xFF800000> : vector<32xf32>
    %57 = vector.multi_reduction <maximumf>, %56, %cst_26 [1] : vector<32x32xf32> to vector<32xf32>
    %58 = vector.shape_cast %57 : vector<32xf32> to vector<32x1xf32>
    %59 = vector.broadcast %58 : vector<32x1xf32> to vector<32x32xf32>
    %60 = arith.subf %56, %59 : vector<32x32xf32>
    %61 = math.exp %60 : vector<32x32xf32>
    %cst_27 = arith.constant dense<0.000000e+00> : vector<32xf32>
    %62 = vector.multi_reduction <add>, %61, %cst_27 [1] : vector<32x32xf32> to vector<32xf32>
    %63 = vector.shape_cast %62 : vector<32xf32> to vector<32x1xf32>
    %64 = vector.broadcast %63 : vector<32x1xf32> to vector<32x32xf32>
    %65 = arith.divf %61, %64 : vector<32x32xf32>
    %66 = vector.extract_strided_slice %8 {offsets = [0, 8], sizes = [32, 8], strides = [1, 1]} : vector<32x64xf32> to vector<32x8xf32>
    %cst_28 = arith.constant dense<0.000000e+00> : vector<32x8xf32>
    %67 = tpu.matmul %65, %66, %cst_28 {dimension_numbers = #tpu.dot_dimension_numbers<[1], [0], [0], [1], [0, 0, 1, 1], [], []>} : vector<32x32xf32>, vector<32x8xf32>, vector<32x8xf32> -> vector<32x8xf32>
    %68 = vector.extract_strided_slice %13 {offsets = [0, 8], sizes = [1, 8], strides = [1, 1]} : vector<1x64xf32> to vector<1x8xf32>
    %69 = vector.broadcast %68 : vector<1x8xf32> to vector<32x8xf32>
    %70 = arith.addf %67, %69 : vector<32x8xf32>
    %cst_29 = arith.constant 0.000000e+00 : f32
    %71 = vector.broadcast %cst_29 : f32 to vector<32x8xf32>
    %72 = arith.cmpf ogt, %70, %71 : vector<32x8xf32>
    %73 = math.exp %70 : vector<32x8xf32>
    %cst_30 = arith.constant 1.000000e+00 : f32
    %74 = vector.broadcast %cst_30 : f32 to vector<32x8xf32>
    %75 = arith.subf %73, %74 : vector<32x8xf32>
    %76 = arith.select %72, %70, %75 : vector<32x8xi1>, vector<32x8xf32>
    %c0_31 = arith.constant 0 : index
    %c8 = arith.constant 8 : index
    %77 = vector.load %arg11[%c0_31, %c8] : memref<32x64xf32, #tpu.memory_space<vmem>>, vector<32x8xf32>
    tpu.vector_store %arg11[%c0_31, %c8], %76 {strides = array<i32>} : memref<32x64xf32, #tpu.memory_space<vmem>>, vector<32x8xf32>,
    %78 = vector.extract_strided_slice %10 {offsets = [0, 2], sizes = [32, 1], strides = [1, 1]} : vector<32x8xf32> to vector<32x1xf32>
    %79 = vector.extract_strided_slice %12 {offsets = [2, 0], sizes = [1, 32], strides = [1, 1]} : vector<8x32xf32> to vector<1x32xf32>
    %80 = vector.broadcast %78 : vector<32x1xf32> to vector<32x32xf32>
    %81 = vector.broadcast %79 : vector<1x32xf32> to vector<32x32xf32>
    %82 = arith.addf %80, %81 : vector<32x32xf32>
    %cst_32 = arith.constant 0.000000e+00 : f32
    %83 = vector.broadcast %cst_32 : f32 to vector<32x32xf32>
    %84 = arith.cmpf ogt, %82, %83 : vector<32x32xf32>
    %cst_33 = arith.constant 2.000000e-01 : f32
    %85 = vector.broadcast %cst_33 : f32 to vector<32x32xf32>
    %86 = arith.mulf %85, %82 : vector<32x32xf32>
    %87 = arith.select %84, %82, %86 : vector<32x32xi1>, vector<32x32xf32>
    %88 = arith.addf %87, %7 : vector<32x32xf32>
    %cst_34 = arith.constant dense<0xFF800000> : vector<32xf32>
    %89 = vector.multi_reduction <maximumf>, %88, %cst_34 [1] : vector<32x32xf32> to vector<32xf32>
    %90 = vector.shape_cast %89 : vector<32xf32> to vector<32x1xf32>
    %91 = vector.broadcast %90 : vector<32x1xf32> to vector<32x32xf32>
    %92 = arith.subf %88, %91 : vector<32x32xf32>
    %93 = math.exp %92 : vector<32x32xf32>
    %cst_35 = arith.constant dense<0.000000e+00> : vector<32xf32>
    %94 = vector.multi_reduction <add>, %93, %cst_35 [1] : vector<32x32xf32> to vector<32xf32>
    %95 = vector.shape_cast %94 : vector<32xf32> to vector<32x1xf32>
    %96 = vector.broadcast %95 : vector<32x1xf32> to vector<32x32xf32>
    %97 = arith.divf %93, %96 : vector<32x32xf32>
    %98 = vector.extract_strided_slice %8 {offsets = [0, 16], sizes = [32, 8], strides = [1, 1]} : vector<32x64xf32> to vector<32x8xf32>
    %cst_36 = arith.constant dense<0.000000e+00> : vector<32x8xf32>
    %99 = tpu.matmul %97, %98, %cst_36 {dimension_numbers = #tpu.dot_dimension_numbers<[1], [0], [0], [1], [0, 0, 1, 1], [], []>} : vector<32x32xf32>, vector<32x8xf32>, vector<32x8xf32> -> vector<32x8xf32>
    %100 = vector.extract_strided_slice %13 {offsets = [0, 16], sizes = [1, 8], strides = [1, 1]} : vector<1x64xf32> to vector<1x8xf32>
    %101 = vector.broadcast %100 : vector<1x8xf32> to vector<32x8xf32>
    %102 = arith.addf %99, %101 : vector<32x8xf32>
    %cst_37 = arith.constant 0.000000e+00 : f32
    %103 = vector.broadcast %cst_37 : f32 to vector<32x8xf32>
    %104 = arith.cmpf ogt, %102, %103 : vector<32x8xf32>
    %105 = math.exp %102 : vector<32x8xf32>
    %cst_38 = arith.constant 1.000000e+00 : f32
    %106 = vector.broadcast %cst_38 : f32 to vector<32x8xf32>
    %107 = arith.subf %105, %106 : vector<32x8xf32>
    %108 = arith.select %104, %102, %107 : vector<32x8xi1>, vector<32x8xf32>
    %c0_39 = arith.constant 0 : index
    %c16 = arith.constant 16 : index
    %109 = vector.load %arg11[%c0_39, %c16] : memref<32x64xf32, #tpu.memory_space<vmem>>, vector<32x8xf32>
    tpu.vector_store %arg11[%c0_39, %c16], %108 {strides = array<i32>} : memref<32x64xf32, #tpu.memory_space<vmem>>, vector<32x8xf32>,
    %110 = vector.extract_strided_slice %10 {offsets = [0, 3], sizes = [32, 1], strides = [1, 1]} : vector<32x8xf32> to vector<32x1xf32>
    %111 = vector.extract_strided_slice %12 {offsets = [3, 0], sizes = [1, 32], strides = [1, 1]} : vector<8x32xf32> to vector<1x32xf32>
    %112 = vector.broadcast %110 : vector<32x1xf32> to vector<32x32xf32>
    %113 = vector.broadcast %111 : vector<1x32xf32> to vector<32x32xf32>
    %114 = arith.addf %112, %113 : vector<32x32xf32>
    %cst_40 = arith.constant 0.000000e+00 : f32
    %115 = vector.broadcast %cst_40 : f32 to vector<32x32xf32>
    %116 = arith.cmpf ogt, %114, %115 : vector<32x32xf32>
    %cst_41 = arith.constant 2.000000e-01 : f32
    %117 = vector.broadcast %cst_41 : f32 to vector<32x32xf32>
    %118 = arith.mulf %117, %114 : vector<32x32xf32>
    %119 = arith.select %116, %114, %118 : vector<32x32xi1>, vector<32x32xf32>
    %120 = arith.addf %119, %7 : vector<32x32xf32>
    %cst_42 = arith.constant dense<0xFF800000> : vector<32xf32>
    %121 = vector.multi_reduction <maximumf>, %120, %cst_42 [1] : vector<32x32xf32> to vector<32xf32>
    %122 = vector.shape_cast %121 : vector<32xf32> to vector<32x1xf32>
    %123 = vector.broadcast %122 : vector<32x1xf32> to vector<32x32xf32>
    %124 = arith.subf %120, %123 : vector<32x32xf32>
    %125 = math.exp %124 : vector<32x32xf32>
    %cst_43 = arith.constant dense<0.000000e+00> : vector<32xf32>
    %126 = vector.multi_reduction <add>, %125, %cst_43 [1] : vector<32x32xf32> to vector<32xf32>
    %127 = vector.shape_cast %126 : vector<32xf32> to vector<32x1xf32>
    %128 = vector.broadcast %127 : vector<32x1xf32> to vector<32x32xf32>
    %129 = arith.divf %125, %128 : vector<32x32xf32>
    %130 = vector.extract_strided_slice %8 {offsets = [0, 24], sizes = [32, 8], strides = [1, 1]} : vector<32x64xf32> to vector<32x8xf32>
    %cst_44 = arith.constant dense<0.000000e+00> : vector<32x8xf32>
    %131 = tpu.matmul %129, %130, %cst_44 {dimension_numbers = #tpu.dot_dimension_numbers<[1], [0], [0], [1], [0, 0, 1, 1], [], []>} : vector<32x32xf32>, vector<32x8xf32>, vector<32x8xf32> -> vector<32x8xf32>
    %132 = vector.extract_strided_slice %13 {offsets = [0, 24], sizes = [1, 8], strides = [1, 1]} : vector<1x64xf32> to vector<1x8xf32>
    %133 = vector.broadcast %132 : vector<1x8xf32> to vector<32x8xf32>
    %134 = arith.addf %131, %133 : vector<32x8xf32>
    %cst_45 = arith.constant 0.000000e+00 : f32
    %135 = vector.broadcast %cst_45 : f32 to vector<32x8xf32>
    %136 = arith.cmpf ogt, %134, %135 : vector<32x8xf32>
    %137 = math.exp %134 : vector<32x8xf32>
    %cst_46 = arith.constant 1.000000e+00 : f32
    %138 = vector.broadcast %cst_46 : f32 to vector<32x8xf32>
    %139 = arith.subf %137, %138 : vector<32x8xf32>
    %140 = arith.select %136, %134, %139 : vector<32x8xi1>, vector<32x8xf32>
    %c0_47 = arith.constant 0 : index
    %c24 = arith.constant 24 : index
    %141 = vector.load %arg11[%c0_47, %c24] : memref<32x64xf32, #tpu.memory_space<vmem>>, vector<32x8xf32>
    tpu.vector_store %arg11[%c0_47, %c24], %140 {strides = array<i32>} : memref<32x64xf32, #tpu.memory_space<vmem>>, vector<32x8xf32>,
    %142 = vector.extract_strided_slice %10 {offsets = [0, 4], sizes = [32, 1], strides = [1, 1]} : vector<32x8xf32> to vector<32x1xf32>
    %143 = vector.extract_strided_slice %12 {offsets = [4, 0], sizes = [1, 32], strides = [1, 1]} : vector<8x32xf32> to vector<1x32xf32>
    %144 = vector.broadcast %142 : vector<32x1xf32> to vector<32x32xf32>
    %145 = vector.broadcast %143 : vector<1x32xf32> to vector<32x32xf32>
    %146 = arith.addf %144, %145 : vector<32x32xf32>
    %cst_48 = arith.constant 0.000000e+00 : f32
    %147 = vector.broadcast %cst_48 : f32 to vector<32x32xf32>
    %148 = arith.cmpf ogt, %146, %147 : vector<32x32xf32>
    %cst_49 = arith.constant 2.000000e-01 : f32
    %149 = vector.broadcast %cst_49 : f32 to vector<32x32xf32>
    %150 = arith.mulf %149, %146 : vector<32x32xf32>
    %151 = arith.select %148, %146, %150 : vector<32x32xi1>, vector<32x32xf32>
    %152 = arith.addf %151, %7 : vector<32x32xf32>
    %cst_50 = arith.constant dense<0xFF800000> : vector<32xf32>
    %153 = vector.multi_reduction <maximumf>, %152, %cst_50 [1] : vector<32x32xf32> to vector<32xf32>
    %154 = vector.shape_cast %153 : vector<32xf32> to vector<32x1xf32>
    %155 = vector.broadcast %154 : vector<32x1xf32> to vector<32x32xf32>
    %156 = arith.subf %152, %155 : vector<32x32xf32>
    %157 = math.exp %156 : vector<32x32xf32>
    %cst_51 = arith.constant dense<0.000000e+00> : vector<32xf32>
    %158 = vector.multi_reduction <add>, %157, %cst_51 [1] : vector<32x32xf32> to vector<32xf32>
    %159 = vector.shape_cast %158 : vector<32xf32> to vector<32x1xf32>
    %160 = vector.broadcast %159 : vector<32x1xf32> to vector<32x32xf32>
    %161 = arith.divf %157, %160 : vector<32x32xf32>
    %162 = vector.extract_strided_slice %8 {offsets = [0, 32], sizes = [32, 8], strides = [1, 1]} : vector<32x64xf32> to vector<32x8xf32>
    %cst_52 = arith.constant dense<0.000000e+00> : vector<32x8xf32>
    %163 = tpu.matmul %161, %162, %cst_52 {dimension_numbers = #tpu.dot_dimension_numbers<[1], [0], [0], [1], [0, 0, 1, 1], [], []>} : vector<32x32xf32>, vector<32x8xf32>, vector<32x8xf32> -> vector<32x8xf32>
    %164 = vector.extract_strided_slice %13 {offsets = [0, 32], sizes = [1, 8], strides = [1, 1]} : vector<1x64xf32> to vector<1x8xf32>
    %165 = vector.broadcast %164 : vector<1x8xf32> to vector<32x8xf32>
    %166 = arith.addf %163, %165 : vector<32x8xf32>
    %cst_53 = arith.constant 0.000000e+00 : f32
    %167 = vector.broadcast %cst_53 : f32 to vector<32x8xf32>
    %168 = arith.cmpf ogt, %166, %167 : vector<32x8xf32>
    %169 = math.exp %166 : vector<32x8xf32>
    %cst_54 = arith.constant 1.000000e+00 : f32
    %170 = vector.broadcast %cst_54 : f32 to vector<32x8xf32>
    %171 = arith.subf %169, %170 : vector<32x8xf32>
    %172 = arith.select %168, %166, %171 : vector<32x8xi1>, vector<32x8xf32>
    %c0_55 = arith.constant 0 : index
    %c32 = arith.constant 32 : index
    %173 = vector.load %arg11[%c0_55, %c32] : memref<32x64xf32, #tpu.memory_space<vmem>>, vector<32x8xf32>
    tpu.vector_store %arg11[%c0_55, %c32], %172 {strides = array<i32>} : memref<32x64xf32, #tpu.memory_space<vmem>>, vector<32x8xf32>,
    %174 = vector.extract_strided_slice %10 {offsets = [0, 5], sizes = [32, 1], strides = [1, 1]} : vector<32x8xf32> to vector<32x1xf32>
    %175 = vector.extract_strided_slice %12 {offsets = [5, 0], sizes = [1, 32], strides = [1, 1]} : vector<8x32xf32> to vector<1x32xf32>
    %176 = vector.broadcast %174 : vector<32x1xf32> to vector<32x32xf32>
    %177 = vector.broadcast %175 : vector<1x32xf32> to vector<32x32xf32>
    %178 = arith.addf %176, %177 : vector<32x32xf32>
    %cst_56 = arith.constant 0.000000e+00 : f32
    %179 = vector.broadcast %cst_56 : f32 to vector<32x32xf32>
    %180 = arith.cmpf ogt, %178, %179 : vector<32x32xf32>
    %cst_57 = arith.constant 2.000000e-01 : f32
    %181 = vector.broadcast %cst_57 : f32 to vector<32x32xf32>
    %182 = arith.mulf %181, %178 : vector<32x32xf32>
    %183 = arith.select %180, %178, %182 : vector<32x32xi1>, vector<32x32xf32>
    %184 = arith.addf %183, %7 : vector<32x32xf32>
    %cst_58 = arith.constant dense<0xFF800000> : vector<32xf32>
    %185 = vector.multi_reduction <maximumf>, %184, %cst_58 [1] : vector<32x32xf32> to vector<32xf32>
    %186 = vector.shape_cast %185 : vector<32xf32> to vector<32x1xf32>
    %187 = vector.broadcast %186 : vector<32x1xf32> to vector<32x32xf32>
    %188 = arith.subf %184, %187 : vector<32x32xf32>
    %189 = math.exp %188 : vector<32x32xf32>
    %cst_59 = arith.constant dense<0.000000e+00> : vector<32xf32>
    %190 = vector.multi_reduction <add>, %189, %cst_59 [1] : vector<32x32xf32> to vector<32xf32>
    %191 = vector.shape_cast %190 : vector<32xf32> to vector<32x1xf32>
    %192 = vector.broadcast %191 : vector<32x1xf32> to vector<32x32xf32>
    %193 = arith.divf %189, %192 : vector<32x32xf32>
    %194 = vector.extract_strided_slice %8 {offsets = [0, 40], sizes = [32, 8], strides = [1, 1]} : vector<32x64xf32> to vector<32x8xf32>
    %cst_60 = arith.constant dense<0.000000e+00> : vector<32x8xf32>
    %195 = tpu.matmul %193, %194, %cst_60 {dimension_numbers = #tpu.dot_dimension_numbers<[1], [0], [0], [1], [0, 0, 1, 1], [], []>} : vector<32x32xf32>, vector<32x8xf32>, vector<32x8xf32> -> vector<32x8xf32>
    %196 = vector.extract_strided_slice %13 {offsets = [0, 40], sizes = [1, 8], strides = [1, 1]} : vector<1x64xf32> to vector<1x8xf32>
    %197 = vector.broadcast %196 : vector<1x8xf32> to vector<32x8xf32>
    %198 = arith.addf %195, %197 : vector<32x8xf32>
    %cst_61 = arith.constant 0.000000e+00 : f32
    %199 = vector.broadcast %cst_61 : f32 to vector<32x8xf32>
    %200 = arith.cmpf ogt, %198, %199 : vector<32x8xf32>
    %201 = math.exp %198 : vector<32x8xf32>
    %cst_62 = arith.constant 1.000000e+00 : f32
    %202 = vector.broadcast %cst_62 : f32 to vector<32x8xf32>
    %203 = arith.subf %201, %202 : vector<32x8xf32>
    %204 = arith.select %200, %198, %203 : vector<32x8xi1>, vector<32x8xf32>
    %c0_63 = arith.constant 0 : index
    %c40 = arith.constant 40 : index
    %205 = vector.load %arg11[%c0_63, %c40] : memref<32x64xf32, #tpu.memory_space<vmem>>, vector<32x8xf32>
    tpu.vector_store %arg11[%c0_63, %c40], %204 {strides = array<i32>} : memref<32x64xf32, #tpu.memory_space<vmem>>, vector<32x8xf32>,
    %206 = vector.extract_strided_slice %10 {offsets = [0, 6], sizes = [32, 1], strides = [1, 1]} : vector<32x8xf32> to vector<32x1xf32>
    %207 = vector.extract_strided_slice %12 {offsets = [6, 0], sizes = [1, 32], strides = [1, 1]} : vector<8x32xf32> to vector<1x32xf32>
    %208 = vector.broadcast %206 : vector<32x1xf32> to vector<32x32xf32>
    %209 = vector.broadcast %207 : vector<1x32xf32> to vector<32x32xf32>
    %210 = arith.addf %208, %209 : vector<32x32xf32>
    %cst_64 = arith.constant 0.000000e+00 : f32
    %211 = vector.broadcast %cst_64 : f32 to vector<32x32xf32>
    %212 = arith.cmpf ogt, %210, %211 : vector<32x32xf32>
    %cst_65 = arith.constant 2.000000e-01 : f32
    %213 = vector.broadcast %cst_65 : f32 to vector<32x32xf32>
    %214 = arith.mulf %213, %210 : vector<32x32xf32>
    %215 = arith.select %212, %210, %214 : vector<32x32xi1>, vector<32x32xf32>
    %216 = arith.addf %215, %7 : vector<32x32xf32>
    %cst_66 = arith.constant dense<0xFF800000> : vector<32xf32>
    %217 = vector.multi_reduction <maximumf>, %216, %cst_66 [1] : vector<32x32xf32> to vector<32xf32>
    %218 = vector.shape_cast %217 : vector<32xf32> to vector<32x1xf32>
    %219 = vector.broadcast %218 : vector<32x1xf32> to vector<32x32xf32>
    %220 = arith.subf %216, %219 : vector<32x32xf32>
    %221 = math.exp %220 : vector<32x32xf32>
    %cst_67 = arith.constant dense<0.000000e+00> : vector<32xf32>
    %222 = vector.multi_reduction <add>, %221, %cst_67 [1] : vector<32x32xf32> to vector<32xf32>
    %223 = vector.shape_cast %222 : vector<32xf32> to vector<32x1xf32>
    %224 = vector.broadcast %223 : vector<32x1xf32> to vector<32x32xf32>
    %225 = arith.divf %221, %224 : vector<32x32xf32>
    %226 = vector.extract_strided_slice %8 {offsets = [0, 48], sizes = [32, 8], strides = [1, 1]} : vector<32x64xf32> to vector<32x8xf32>
    %cst_68 = arith.constant dense<0.000000e+00> : vector<32x8xf32>
    %227 = tpu.matmul %225, %226, %cst_68 {dimension_numbers = #tpu.dot_dimension_numbers<[1], [0], [0], [1], [0, 0, 1, 1], [], []>} : vector<32x32xf32>, vector<32x8xf32>, vector<32x8xf32> -> vector<32x8xf32>
    %228 = vector.extract_strided_slice %13 {offsets = [0, 48], sizes = [1, 8], strides = [1, 1]} : vector<1x64xf32> to vector<1x8xf32>
    %229 = vector.broadcast %228 : vector<1x8xf32> to vector<32x8xf32>
    %230 = arith.addf %227, %229 : vector<32x8xf32>
    %cst_69 = arith.constant 0.000000e+00 : f32
    %231 = vector.broadcast %cst_69 : f32 to vector<32x8xf32>
    %232 = arith.cmpf ogt, %230, %231 : vector<32x8xf32>
    %233 = math.exp %230 : vector<32x8xf32>
    %cst_70 = arith.constant 1.000000e+00 : f32
    %234 = vector.broadcast %cst_70 : f32 to vector<32x8xf32>
    %235 = arith.subf %233, %234 : vector<32x8xf32>
    %236 = arith.select %232, %230, %235 : vector<32x8xi1>, vector<32x8xf32>
    %c0_71 = arith.constant 0 : index
    %c48 = arith.constant 48 : index
    %237 = vector.load %arg11[%c0_71, %c48] : memref<32x64xf32, #tpu.memory_space<vmem>>, vector<32x8xf32>
    tpu.vector_store %arg11[%c0_71, %c48], %236 {strides = array<i32>} : memref<32x64xf32, #tpu.memory_space<vmem>>, vector<32x8xf32>,
    %238 = vector.extract_strided_slice %10 {offsets = [0, 7], sizes = [32, 1], strides = [1, 1]} : vector<32x8xf32> to vector<32x1xf32>
    %239 = vector.extract_strided_slice %12 {offsets = [7, 0], sizes = [1, 32], strides = [1, 1]} : vector<8x32xf32> to vector<1x32xf32>
    %240 = vector.broadcast %238 : vector<32x1xf32> to vector<32x32xf32>
    %241 = vector.broadcast %239 : vector<1x32xf32> to vector<32x32xf32>
    %242 = arith.addf %240, %241 : vector<32x32xf32>
    %cst_72 = arith.constant 0.000000e+00 : f32
    %243 = vector.broadcast %cst_72 : f32 to vector<32x32xf32>
    %244 = arith.cmpf ogt, %242, %243 : vector<32x32xf32>
    %cst_73 = arith.constant 2.000000e-01 : f32
    %245 = vector.broadcast %cst_73 : f32 to vector<32x32xf32>
    %246 = arith.mulf %245, %242 : vector<32x32xf32>
    %247 = arith.select %244, %242, %246 : vector<32x32xi1>, vector<32x32xf32>
    %248 = arith.addf %247, %7 : vector<32x32xf32>
    %cst_74 = arith.constant dense<0xFF800000> : vector<32xf32>
    %249 = vector.multi_reduction <maximumf>, %248, %cst_74 [1] : vector<32x32xf32> to vector<32xf32>
    %250 = vector.shape_cast %249 : vector<32xf32> to vector<32x1xf32>
    %251 = vector.broadcast %250 : vector<32x1xf32> to vector<32x32xf32>
    %252 = arith.subf %248, %251 : vector<32x32xf32>
    %253 = math.exp %252 : vector<32x32xf32>
    %cst_75 = arith.constant dense<0.000000e+00> : vector<32xf32>
    %254 = vector.multi_reduction <add>, %253, %cst_75 [1] : vector<32x32xf32> to vector<32xf32>
    %255 = vector.shape_cast %254 : vector<32xf32> to vector<32x1xf32>
    %256 = vector.broadcast %255 : vector<32x1xf32> to vector<32x32xf32>
    %257 = arith.divf %253, %256 : vector<32x32xf32>
    %258 = vector.extract_strided_slice %8 {offsets = [0, 56], sizes = [32, 8], strides = [1, 1]} : vector<32x64xf32> to vector<32x8xf32>
    %cst_76 = arith.constant dense<0.000000e+00> : vector<32x8xf32>
    %259 = tpu.matmul %257, %258, %cst_76 {dimension_numbers = #tpu.dot_dimension_numbers<[1], [0], [0], [1], [0, 0, 1, 1], [], []>} : vector<32x32xf32>, vector<32x8xf32>, vector<32x8xf32> -> vector<32x8xf32>
    %260 = vector.extract_strided_slice %13 {offsets = [0, 56], sizes = [1, 8], strides = [1, 1]} : vector<1x64xf32> to vector<1x8xf32>
    %261 = vector.broadcast %260 : vector<1x8xf32> to vector<32x8xf32>
    %262 = arith.addf %259, %261 : vector<32x8xf32>
    %cst_77 = arith.constant 0.000000e+00 : f32
    %263 = vector.broadcast %cst_77 : f32 to vector<32x8xf32>
    %264 = arith.cmpf ogt, %262, %263 : vector<32x8xf32>
    %265 = math.exp %262 : vector<32x8xf32>
    %cst_78 = arith.constant 1.000000e+00 : f32
    %266 = vector.broadcast %cst_78 : f32 to vector<32x8xf32>
    %267 = arith.subf %265, %266 : vector<32x8xf32>
    %268 = arith.select %264, %262, %267 : vector<32x8xi1>, vector<32x8xf32>
    %c0_79 = arith.constant 0 : index
    %c56 = arith.constant 56 : index
    %269 = vector.load %arg11[%c0_79, %c56] : memref<32x64xf32, #tpu.memory_space<vmem>>, vector<32x8xf32>
    tpu.vector_store %arg11[%c0_79, %c56], %268 {strides = array<i32>} : memref<32x64xf32, #tpu.memory_space<vmem>>, vector<32x8xf32>,
    %c0_80 = arith.constant 0 : index
    %c0_81 = arith.constant 0 : index
    %270 = vector.load %arg11[%c0_80, %c0_81] : memref<32x64xf32, #tpu.memory_space<vmem>>, vector<32x64xf32>
    %c0_82 = arith.constant 0 : index
    %c0_83 = arith.constant 0 : index
    %271 = vector.load %arg6[%c0_82, %c0_83] : memref<64x128xf32, #tpu.memory_space<vmem>>, vector<64x128xf32>
    %cst_84 = arith.constant dense<0.000000e+00> : vector<32x128xf32>
    %272 = tpu.matmul %270, %271, %cst_84 {dimension_numbers = #tpu.dot_dimension_numbers<[1], [0], [0], [1], [0, 0, 1, 1], [], []>} : vector<32x64xf32>, vector<64x128xf32>, vector<32x128xf32> -> vector<32x128xf32>
    %c0_85 = arith.constant 0 : index
    %c0_86 = arith.constant 0 : index
    %273 = vector.load %arg7[%c0_85, %c0_86] : memref<128x1xf32, #tpu.memory_space<vmem>>, vector<128x1xf32>
    %cst_87 = arith.constant dense<0.000000e+00> : vector<32x1xf32>
    %274 = tpu.matmul %272, %273, %cst_87 {dimension_numbers = #tpu.dot_dimension_numbers<[1], [0], [0], [1], [0, 0, 1, 1], [], []>} : vector<32x128xf32>, vector<128x1xf32>, vector<32x1xf32> -> vector<32x1xf32>
    %c0_88 = arith.constant 0 : index
    %c0_89 = arith.constant 0 : index
    %275 = vector.load %arg8[%c0_88, %c0_89] : memref<1x128xf32, #tpu.memory_space<vmem>>, vector<1x128xf32>
    %cst_90 = arith.constant dense<0.000000e+00> : vector<1x32xf32>
    %276 = tpu.matmul %275, %272, %cst_90 {dimension_numbers = #tpu.dot_dimension_numbers<[1], [1], [0], [0], [0, 0, 1, 0], [], []>} : vector<1x128xf32>, vector<32x128xf32>, vector<1x32xf32> -> vector<1x32xf32>
    %277 = vector.broadcast %274 : vector<32x1xf32> to vector<32x32xf32>
    %278 = vector.broadcast %276 : vector<1x32xf32> to vector<32x32xf32>
    %279 = arith.addf %277, %278 : vector<32x32xf32>
    %cst_91 = arith.constant 0.000000e+00 : f32
    %280 = vector.broadcast %cst_91 : f32 to vector<32x32xf32>
    %281 = arith.cmpf ogt, %279, %280 : vector<32x32xf32>
    %cst_92 = arith.constant 2.000000e-01 : f32
    %282 = vector.broadcast %cst_92 : f32 to vector<32x32xf32>
    %283 = arith.mulf %282, %279 : vector<32x32xf32>
    %284 = arith.select %281, %279, %283 : vector<32x32xi1>, vector<32x32xf32>
    %285 = arith.addf %284, %7 : vector<32x32xf32>
    %cst_93 = arith.constant dense<0xFF800000> : vector<32xf32>
    %286 = vector.multi_reduction <maximumf>, %285, %cst_93 [1] : vector<32x32xf32> to vector<32xf32>
    %287 = vector.shape_cast %286 : vector<32xf32> to vector<32x1xf32>
    %288 = vector.broadcast %287 : vector<32x1xf32> to vector<32x32xf32>
    %289 = arith.subf %285, %288 : vector<32x32xf32>
    %290 = math.exp %289 : vector<32x32xf32>
    %cst_94 = arith.constant dense<0.000000e+00> : vector<32xf32>
    %291 = vector.multi_reduction <add>, %290, %cst_94 [1] : vector<32x32xf32> to vector<32xf32>
    %292 = vector.shape_cast %291 : vector<32xf32> to vector<32x1xf32>
    %293 = vector.broadcast %292 : vector<32x1xf32> to vector<32x32xf32>
    %294 = arith.divf %290, %293 : vector<32x32xf32>
    %cst_95 = arith.constant dense<0.000000e+00> : vector<32x128xf32>
    %295 = tpu.matmul %294, %272, %cst_95 {dimension_numbers = #tpu.dot_dimension_numbers<[1], [0], [0], [1], [0, 0, 1, 1], [], []>} : vector<32x32xf32>, vector<32x128xf32>, vector<32x128xf32> -> vector<32x128xf32>
    %c0_96 = arith.constant 0 : index
    %c0_97 = arith.constant 0 : index
    %296 = vector.load %arg9[%c0_96, %c0_97] : memref<1x128xf32, #tpu.memory_space<vmem>>, vector<1x128xf32>
    %297 = vector.broadcast %296 : vector<1x128xf32> to vector<32x128xf32>
    %298 = arith.addf %295, %297 : vector<32x128xf32>
    %299 = tpu.iota {dimensions = array<i32: 1>} : vector<32x128xi32>
    %c7_i32 = arith.constant 7 : i32
    %300 = vector.broadcast %c7_i32 : i32 to vector<32x128xi32>
    %301 = arith.cmpi slt, %299, %300 : vector<32x128xi32>
    %cst_98 = arith.constant -1.000000e+30 : f32
    %302 = vector.broadcast %cst_98 : f32 to vector<32x128xf32>
    %303 = arith.select %301, %298, %302 : vector<32x128xi1>, vector<32x128xf32>
    %cst_99 = arith.constant dense<0xFF800000> : vector<32xf32>
    %304 = vector.multi_reduction <maximumf>, %303, %cst_99 [1] : vector<32x128xf32> to vector<32xf32>
    %305 = vector.shape_cast %304 : vector<32xf32> to vector<32x1xf32>
    %306 = vector.broadcast %305 : vector<32x1xf32> to vector<32x128xf32>
    %307 = arith.subf %303, %306 : vector<32x128xf32>
    %308 = math.exp %307 : vector<32x128xf32>
    %cst_100 = arith.constant dense<0.000000e+00> : vector<32xf32>
    %309 = vector.multi_reduction <add>, %308, %cst_100 [1] : vector<32x128xf32> to vector<32xf32>
    %310 = vector.shape_cast %309 : vector<32xf32> to vector<32x1xf32>
    %311 = math.log %310 : vector<32x1xf32>
    %312 = vector.broadcast %305 : vector<32x1xf32> to vector<32x128xf32>
    %313 = arith.subf %303, %312 : vector<32x128xf32>
    %314 = vector.broadcast %311 : vector<32x1xf32> to vector<32x128xf32>
    %315 = arith.subf %313, %314 : vector<32x128xf32>
    %c0_101 = arith.constant 0 : index
    %c0_102 = arith.constant 0 : index
    %316 = vector.load %arg10[%c0_101, %c0_102] : memref<32x128xf32, #tpu.memory_space<vmem>>, vector<32x128xf32>
    tpu.vector_store %arg10[%c0_101, %c0_102], %315 {strides = array<i32>} : memref<32x128xf32, #tpu.memory_space<vmem>>, vector<32x128xf32>,
    return
  }
}

</mosaic_0001>

<bundles_post_ra>
// kernel: eq.8
= control target key start
LH: loop header
LB: loop body
LE: loop exit
PB: predicated region body
PF: predicated region fallthrough
CT: control target
= control target key end

     0   :  { %s67_s10 = smov 56   ;;  %s68_s11 = smov 40   ;;  %vm3_vm0 = vcmask 64512   ;;  %vm9_vm1 = vcmask 523712   ;;  %vm15_vm2 = vcmask 458112   ;;  %vm21_vm3 = vcmask 392512   ;;  %s111_s0 = inlined_call_operand.vmem [shape: s32[8,8], index: 0, kind: input, shape index: {}]   ;;  %s112_s1 = inlined_call_operand.vmem [shape: s32[64], index: 1, kind: output, shape index: {}]  }
   0x1   :  { %v53_v0 = vld [vmem:[%s111_s0 + $0x7] sm:$0x1]   ;;  %v55_v1 = vld [vmem:[%s111_s0 + $0x5] sm:$0x1]   ;;  %v54_v2 = vld [vmem:[%s111_s0 + $0x6] sm:$0x1]  }
   0x2   :  { %7 = vrot.lane.b32.xlu0 %v53_v0, %s67_s10  ;;  %19 = vrot.lane.b32.xlu1 %v55_v1, %s68_s11  ;;  %v56_v3 = vld [vmem:[%s111_s0 + $0x4] sm:$0x1]   ;;  %v2_v4 = vld [vmem:[%s111_s0] sm:$0x1]   ;;  %s69_s18 = smov 48   ;;  %s70_s19 = smov 32  }
   0x3   :  { %4 = vst.msk [vmem:[#allocation0] sm:$0x1] %vm3_vm0, %v2_v4   ;;  %v57_v5 = vld [vmem:[%s111_s0 + $0x3] sm:$0x1]   ;;  %v58_v6 = vld [vmem:[%s111_s0 + $0x2] sm:$0x1]  }
   0x4   :  { %s71_s24 = smov 24   ;;  %s72_s25 = smov 16   ;;  %v59_v7 = vld [vmem:[%s111_s0 + $0x1] sm:$0x1]   ;;  %vm27_vm4 = vcmask 326912   ;;  %vm33_vm5 = vcmask 261312  }
   0x5   :  { %s73_s0 = smov 8   ;;  %vm39_vm6 = vcmask 195712   ;;  %vm45_vm7 = vcmask 130112  }
   0x6   :  { %13 = vrot.lane.b32.xlu0 %v54_v2, %s69_s18  ;;  %25 = vrot.lane.b32.xlu1 %v56_v3, %s70_s19 }
   0xa   :  { %31 = vrot.lane.b32.xlu0 %v57_v5, %s71_s24  ;;  %37 = vrot.lane.b32.xlu1 %v58_v6, %s72_s25 }
   0xe   :  { %43 = vrot.lane.b32.xlu0 %v59_v7, %s73_s0 }
  0x74   :  { %v8_v8 = vpop.permute.xlu0 %7   ;;  %v20_v9 = vpop.permute.xlu1 %19  }
  0x75   :  { %10 = vst.msk [vmem:[#allocation0] sm:$0x1] %vm9_vm1, %v8_v8  }
  0x78   :  { %v14_v10 = vpop.permute.xlu0 %13   ;;  %v26_v11 = vpop.permute.xlu1 %25  }
  0x79   :  { %16 = vst.msk [vmem:[#allocation0] sm:$0x1] %vm15_vm2, %v14_v10  }
  0x7a   :  { %22 = vst.msk [vmem:[#allocation0] sm:$0x1] %vm21_vm3, %v20_v9  }
  0x7b   :  { %28 = vst.msk [vmem:[#allocation0] sm:$0x1] %vm27_vm4, %v26_v11  }
  0x7c   :  { %v32_v12 = vpop.permute.xlu0 %31   ;;  %v38_v13 = vpop.permute.xlu1 %37  }
  0x7d   :  { %34 = vst.msk [vmem:[#allocation0] sm:$0x1] %vm33_vm5, %v32_v12  }
  0x7e   :  { %40 = vst.msk [vmem:[#allocation0] sm:$0x1] %vm39_vm6, %v38_v13  }
  0x80   :  { %v44_v14 = vpop.permute.xlu0 %43  }
  0x81   :  { %46 = vst.msk [vmem:[#allocation0] sm:$0x1] %vm45_vm7, %v44_v14  }
  0x88   :  { %v50_v15 = vld [vmem:[#allocation0] sm:$0x1] }
  0x89   :  { %52 = vst [vmem:[%s112_s1] sm:$0x1] %v50_v15 }

// kernel: net_forward.1
= control target key start
LH: loop header
LB: loop body
LE: loop exit
PB: predicated region body
PF: predicated region fallthrough
CT: control target
= control target key end

     0   :  { %vm810_vm0 = vcmask 523264   ;;  %vm4793_vm1 = vmmov 0   ;;  %s4796_s26 = smov 120   ;;  %s4797_s27 = smov 80   ;;  %vm1027_vm5 = vcmask 261120   ;;  %s6538_s2 = inlined_call_operand.vmem [shape: f32[1536,64], index: 2, kind: input, shape index: {}]   ;;  %s6539_s0 = inlined_call_operand.vmem [shape: f32[32,1536], index: 0, kind: input, shape index: {}]   ;;  %s6540_s3 = inlined_call_operand.vmem [shape: f32[64,8], index: 3, kind: input, shape index: {}]   ;;  %s6541_s4 = inlined_call_operand.vmem [shape: f32[8,64], index: 4, kind: input, shape index: {}]   ;;  %s6542_s1 = inlined_call_operand.vmem [shape: s8[32,32], index: 1, kind: input, shape index: {}]   ;;  %s6543_s5 = inlined_call_operand.vmem [shape: f32[1,64], index: 5, kind: input, shape index: {}]   ;;  %s6544_s6 = inlined_call_operand.vmem [shape: f32[64,128], index: 6, kind: input, shape index: {}]   ;;  %s6545_s7 = inlined_call_operand.vmem [shape: f32[128,1], index: 7, kind: input, shape index: {}]   ;;  %s6546_s8 = inlined_call_operand.vmem [shape: f32[1,128], index: 8, kind: input, shape index: {}]   ;;  %s6547_s9 = inlined_call_operand.vmem [shape: f32[1,128], index: 9, kind: input, shape index: {}]   ;;  %s6548_s10 = inlined_call_operand.vmem [shape: f32[32,128], index: 10, kind: output, shape index: {}]  }
   0x1   :  { %v99_v0 = vld [vmem:[%s6538_s2 + $0x80] sm:$0xff]  ;;  %v100_v1 = vld [vmem:[%s6538_s2 + $0x88] sm:$0xff]  ;;  %v101_v11 = vld [vmem:[%s6538_s2 + $0x90] sm:$0xff]  ;;  %s4798_s28 = smov 112   ;;  %s4799_s29 = smov 96  }
   0x2   :  { %v131_v2 = vld [vmem:[%s6538_s2 + $0x180] sm:$0xff]  ;;  %v4094_v3 = vpack.c.bf16 %v100_v1, %v99_v0  ;;  %v132_v4 = vld [vmem:[%s6538_s2 + $0x188] sm:$0xff]  ;;  %v102_v13 = vld [vmem:[%s6538_s2 + $0x98] sm:$0xff]  ;;  %s4800_s30 = smov 88   ;;  %s4811_s15 = smov 16  }
   0x3   :  { %v83_v5 = vld [vmem:[%s6538_s2] sm:$0xff]  ;;  %v84_v6 = vld [vmem:[%s6538_s2 + $0x8] sm:$0xff]  ;;  %v4126_v7 = vpack.c.bf16 %v132_v4, %v131_v2  ;;  %v133_v14 = vld [vmem:[%s6538_s2 + $0x190] sm:$0xff]  ;;  %v4098_v16 = vpack.c.bf16 %v102_v13, %v101_v11  ;;  %s4812_s16 = smov 24   ;;  %s4813_s17 = smov 32  }
   0x4   :  { %v4096_v8 = vpack.c.bf16 %v84_v6, %v83_v5  ;;  %v115_v9 = vld [vmem:[%s6538_s2 + $0x100] sm:$0xff]  ;;  %v116_v10 = vld [vmem:[%s6538_s2 + $0x108] sm:$0xff]  ;;  %4095 = vmatprep.subr.bf16.mxu0 %v4094_v3  ;;  %v134_v15 = vld [vmem:[%s6538_s2 + $0x198] sm:$0xff]  ;;  %s4814_s18 = smov 40   ;;  %s4816_s12 = smov 56  }
   0x5   :  { %v4128_v12 = vpack.c.bf16 %v116_v10, %v115_v9  ;;  %4127 = vmatprep.subr.bf16.mxu1 %v4126_v7  ;;  %v4130_v17 = vpack.c.bf16 %v134_v15, %v133_v14  ;;  %v85_v18 = vld [vmem:[%s6538_s2 + $0x10] sm:$0xff]  ;;  %v86_v19 = vld [vmem:[%s6538_s2 + $0x18] sm:$0xff]  ;;  %v103_v23 = vld [vmem:[%s6538_s2 + $0xa0] sm:$0xff] }
   0x6   :  { %4097 = vmatpush3.bf16.msra.mxu0 %v4096_v8  ;;  %v117_v20 = vld [vmem:[%s6538_s2 + $0x110] sm:$0xff]  ;;  %v4100_v21 = vpack.c.bf16 %v86_v19, %v85_v18  ;;  %v118_v22 = vld [vmem:[%s6538_s2 + $0x118] sm:$0xff]  ;;  %v104_v24 = vld [vmem:[%s6538_s2 + $0xa8] sm:$0xff] }
   0x7   :  { %4129 = vmatpush3.bf16.msra.mxu1 %v4128_v12  ;;  %4099 = vmatprep.subr.bf16.mxu0 %v4098_v16  ;;  %v4132_v25 = vpack.c.bf16 %v118_v22, %v117_v20  ;;  %v4102_v26 = vpack.c.bf16 %v104_v24, %v103_v23  ;;  %v135_v27 = vld [vmem:[%s6538_s2 + $0x1a0] sm:$0xff]  ;;  %v136_v28 = vld [vmem:[%s6538_s2 + $0x1a8] sm:$0xff]  ;;  %v105_v35 = vld [vmem:[%s6538_s2 + $0xb0] sm:$0xff] }
   0x8   :  { %4131 = vmatprep.subr.bf16.mxu1 %v4130_v17  ;;  %v87_v29 = vld [vmem:[%s6538_s2 + $0x20] sm:$0xff]  ;;  %v4134_v30 = vpack.c.bf16 %v136_v28, %v135_v27  ;;  %v88_v31 = vld [vmem:[%s6538_s2 + $0x28] sm:$0xff]  ;;  %v106_v36 = vld [vmem:[%s6538_s2 + $0xb8] sm:$0xff] }
   0x9   :  { %v119_v32 = vld [vmem:[%s6538_s2 + $0x120] sm:$0xff]  ;;  %v120_v33 = vld [vmem:[%s6538_s2 + $0x128] sm:$0xff]  ;;  %v4104_v34 = vpack.c.bf16 %v88_v31, %v87_v29  ;;  %v137_v37 = vld [vmem:[%s6538_s2 + $0x1b0] sm:$0xff]  ;;  %v4106_v39 = vpack.c.bf16 %v106_v36, %v105_v35 }
   0xa   :  { %4101 = vmatpush3.bf16.msra.mxu0 %v4100_v21  ;;  %v4136_v38 = vpack.c.bf16 %v120_v33, %v119_v32  ;;  %v138_v40 = vld [vmem:[%s6538_s2 + $0x1b8] sm:$0xff]  ;;  %v89_v41 = vld [vmem:[%s6538_s2 + $0x30] sm:$0xff]  ;;  %v107_v46 = vld [vmem:[%s6538_s2 + $0xc0] sm:$0xff] }
   0xb   :  { %4133 = vmatpush3.bf16.msra.mxu1 %v4132_v25  ;;  %4103 = vmatprep.subr.bf16.mxu0 %v4102_v26  ;;  %v90_v42 = vld [vmem:[%s6538_s2 + $0x38] sm:$0xff]  ;;  %v4138_v43 = vpack.c.bf16 %v138_v40, %v137_v37  ;;  %v121_v44 = vld [vmem:[%s6538_s2 + $0x130] sm:$0xff]  ;;  %v108_v47 = vld [vmem:[%s6538_s2 + $0xc8] sm:$0xff] }
   0xc   :  { %4135 = vmatprep.subr.bf16.mxu1 %v4134_v30  ;;  %v122_v45 = vld [vmem:[%s6538_s2 + $0x138] sm:$0xff]  ;;  %v139_v48 = vld [vmem:[%s6538_s2 + $0x1c0] sm:$0xff]  ;;  %v140_v49 = vld [vmem:[%s6538_s2 + $0x1c8] sm:$0xff]  ;;  %v4108_v50 = vpack.c.bf16 %v90_v42, %v89_v41  ;;  %v4110_v52 = vpack.c.bf16 %v108_v47, %v107_v46 }
   0xd   :  { %v4140_v51 = vpack.c.bf16 %v122_v45, %v121_v44  ;;  %v91_v53 = vld [vmem:[%s6538_s2 + $0x40] sm:$0xff]  ;;  %v92_v54 = vld [vmem:[%s6538_s2 + $0x48] sm:$0xff]  ;;  %v4142_v56 = vpack.c.bf16 %v140_v49, %v139_v48  ;;  %v109_v58 = vld [vmem:[%s6538_s2 + $0xd0] sm:$0xff] }
   0xe   :  { %4105 = vmatpush3.bf16.msra.mxu0 %v4104_v34  ;;  %v123_v55 = vld [vmem:[%s6538_s2 + $0x140] sm:$0xff]  ;;  %v124_v57 = vld [vmem:[%s6538_s2 + $0x148] sm:$0xff]  ;;  %v110_v59 = vld [vmem:[%s6538_s2 + $0xd8] sm:$0xff]  ;;  %v4112_v62 = vpack.c.bf16 %v92_v54, %v91_v53 }
   0xf   :  { %4137 = vmatpush3.bf16.msra.mxu1 %v4136_v38  ;;  %4107 = vmatprep.subr.bf16.mxu0 %v4106_v39  ;;  %v141_v60 = vld [vmem:[%s6538_s2 + $0x1d0] sm:$0xff]  ;;  %v142_v61 = vld [vmem:[%s6538_s2 + $0x1d8] sm:$0xff]  ;;  %v4144_v63 = vpack.c.bf16 %v124_v57, %v123_v55  ;;  %v4114_v0 = vpack.c.bf16 %v110_v59, %v109_v58  ;;  %v111_v6 = vld [vmem:[%s6538_s2 + $0xe0] sm:$0xff] }
  0x10   :  { %4139 = vmatprep.subr.bf16.mxu1 %v4138_v43  ;;  %v93_v1 = vld [vmem:[%s6538_s2 + $0x50] sm:$0xff]  ;;  %v94_v2 = vld [vmem:[%s6538_s2 + $0x58] sm:$0xff]  ;;  %v4146_v4 = vpack.c.bf16 %v142_v61, %v141_v60  ;;  %v112_v7 = vld [vmem:[%s6538_s2 + $0xe8] sm:$0xff] }
  0x11   :  { %v125_v3 = vld [vmem:[%s6538_s2 + $0x150] sm:$0xff]  ;;  %v126_v5 = vld [vmem:[%s6538_s2 + $0x158] sm:$0xff]  ;;  %v143_v8 = vld [vmem:[%s6538_s2 + $0x1e0] sm:$0xff]  ;;  %v4116_v10 = vpack.c.bf16 %v94_v2, %v93_v1  ;;  %v4118_v14 = vpack.c.bf16 %v112_v7, %v111_v6 }
  0x12   :  { %4109 = vmatpush3.bf16.msra.mxu0 %v4108_v50  ;;  %v144_v9 = vld [vmem:[%s6538_s2 + $0x1e8] sm:$0xff]  ;;  %v95_v11 = vld [vmem:[%s6538_s2 + $0x60] sm:$0xff]  ;;  %v4148_v13 = vpack.c.bf16 %v126_v5, %v125_v3  ;;  %v38_v17 = vld [vmem:[%s6539_s0 + $0x18] sm:$0xff] }
  0x13   :  { %4141 = vmatpush3.bf16.msra.mxu1 %v4140_v51  ;;  %4111 = vmatprep.subr.bf16.mxu0 %v4110_v52  ;;  %v96_v12 = vld [vmem:[%s6538_s2 + $0x68] sm:$0xff]  ;;  %v127_v15 = vld [vmem:[%s6538_s2 + $0x160] sm:$0xff]  ;;  %v4150_v18 = vpack.c.bf16 %v144_v9, %v143_v8  ;;  %v113_v20 = vld [vmem:[%s6538_s2 + $0xf0] sm:$0xff] }
  0x14   :  { %4143 = vmatprep.subr.bf16.mxu1 %v4142_v56  ;;  %v36_v16 = vld [vmem:[%s6539_s0 + $0x8] sm:$0xff]  ;;  %v114_v21 = vld [vmem:[%s6538_s2 + $0xf8] sm:$0xff]  ;;  %v145_v22 = vld [vmem:[%s6538_s2 + $0x1f0] sm:$0xff]  ;;  %441 = vmatprep.mubr.f32.mxu1 %v38_v17  ;;  %v4120_v24 = vpack.c.bf16 %v96_v12, %v95_v11 }
  0x15   :  { %v128_v19 = vld [vmem:[%s6538_s2 + $0x168] sm:$0xff]  ;;  %356 = vmatprep.mubr.f32.mxu0 %v36_v16  ;;  %v146_v23 = vld [vmem:[%s6538_s2 + $0x1f8] sm:$0xff]  ;;  %v4122_v26 = vpack.c.bf16 %v114_v21, %v113_v20  ;;  %v97_v27 = vld [vmem:[%s6538_s2 + $0x70] sm:$0xff] }
  0x16   :  { %4113 = vmatpush3.bf16.msra.mxu0 %v4112_v62  ;;  %v4152_v25 = vpack.c.bf16 %v128_v19, %v127_v15  ;;  %v98_v28 = vld [vmem:[%s6538_s2 + $0x78] sm:$0xff]  ;;  %v129_v29 = vld [vmem:[%s6538_s2 + $0x170] sm:$0xff]  ;;  %v4154_v30 = vpack.c.bf16 %v146_v23, %v145_v22  ;;  %v163_v32 = vld [vmem:[%s6538_s2 + $0x280] sm:$0xff] }
  0x17   :  { %4145 = vmatpush3.bf16.msra.mxu1 %v4144_v63  ;;  %4115 = vmatprep.subr.bf16.mxu0 %v4114_v0  ;;  %v130_v31 = vld [vmem:[%s6538_s2 + $0x178] sm:$0xff]  ;;  %v164_v33 = vld [vmem:[%s6538_s2 + $0x288] sm:$0xff]  ;;  %v195_v34 = vld [vmem:[%s6538_s2 + $0x380] sm:$0xff]  ;;  %v4124_v36 = vpack.c.bf16 %v98_v28, %v97_v27 }
  0x18   :  { %4147 = vmatprep.subr.bf16.mxu1 %v4146_v4  ;;  %v196_v35 = vld [vmem:[%s6538_s2 + $0x388] sm:$0xff]  ;;  %v4156_v37 = vpack.c.bf16 %v130_v31, %v129_v29  ;;  %v4158_v38 = vpack.c.bf16 %v164_v33, %v163_v32  ;;  %v147_v39 = vld [vmem:[%s6538_s2 + $0x200] sm:$0xff]  ;;  %v165_v44 = vld [vmem:[%s6538_s2 + $0x290] sm:$0xff] }
  0x19   :  { %v148_v40 = vld [vmem:[%s6538_s2 + $0x208] sm:$0xff]  ;;  %v179_v41 = vld [vmem:[%s6538_s2 + $0x300] sm:$0xff]  ;;  %v4190_v42 = vpack.c.bf16 %v196_v35, %v195_v34  ;;  %v166_v45 = vld [vmem:[%s6538_s2 + $0x298] sm:$0xff] }
  0x1a   :  { %4117 = vmatpush3.bf16.msra.mxu0 %v4116_v10  ;;  %v180_v43 = vld [vmem:[%s6538_s2 + $0x308] sm:$0xff]  ;;  %v197_v46 = vld [vmem:[%s6538_s2 + $0x390] sm:$0xff]  ;;  %v198_v47 = vld [vmem:[%s6538_s2 + $0x398] sm:$0xff]  ;;  %v4160_v50 = vpack.c.bf16 %v148_v40, %v147_v39  ;;  %v4162_v52 = vpack.c.bf16 %v166_v45, %v165_v44 }
  0x1b   :  { %4149 = vmatpush3.bf16.msra.mxu1 %v4148_v13  ;;  %4119 = vmatprep.subr.bf16.mxu0 %v4118_v14  ;;  %v35_v48 = vld [vmem:[%s6539_s0] sm:$0xff]  ;;  %v37_v49 = vld [vmem:[%s6539_s0 + $0x10] sm:$0xff]  ;;  %v4192_v51 = vpack.c.bf16 %v180_v43, %v179_v41  ;;  %v150_v54 = vld [vmem:[%s6538_s2 + $0x218] sm:$0xff]  ;;  %v4194_v56 = vpack.c.bf16 %v198_v47, %v197_v46 }
  0x1c   :  { %4151 = vmatprep.subr.bf16.mxu1 %v4150_v18  ;;  %v149_v53 = vld [vmem:[%s6538_s2 + $0x210] sm:$0xff]  ;;  %v182_v57 = vld [vmem:[%s6538_s2 + $0x318] sm:$0xff]  ;;  %v167_v58 = vld [vmem:[%s6538_s2 + $0x2a0] sm:$0xff] }
  0x1d   :  { %v181_v55 = vld [vmem:[%s6538_s2 + $0x310] sm:$0xff]  ;;  %v168_v59 = vld [vmem:[%s6538_s2 + $0x2a8] sm:$0xff]  ;;  %v151_v60 = vld [vmem:[%s6538_s2 + $0x220] sm:$0xff]  ;;  %v4164_v63 = vpack.c.bf16 %v150_v54, %v149_v53 }
  0x1e   :  { %4121 = vmatpush3.bf16.msra.mxu0 %v4120_v24  ;;  %v199_v61 = vld [vmem:[%s6538_s2 + $0x3a0] sm:$0xff]  ;;  %v200_v62 = vld [vmem:[%s6538_s2 + $0x3a8] sm:$0xff]  ;;  %v50_v1 = vld [vmem:[%s6539_s0 + $0x78] sm:$0xff]  ;;  %v4196_v3 = vpack.c.bf16 %v182_v57, %v181_v55  ;;  %v4166_v4 = vpack.c.bf16 %v168_v59, %v167_v58 }
  0x1f   :  { %4153 = vmatpush3.bf16.msra.mxu1 %v4152_v25  ;;  %4123 = vmatprep.subr.bf16.mxu0 %v4122_v26  ;;  %v48_v0 = vld [vmem:[%s6539_s0 + $0x68] sm:$0xff]  ;;  %v47_v2 = vld [vmem:[%s6539_s0 + $0x60] sm:$0xff]  ;;  %v49_v7 = vld [vmem:[%s6539_s0 + $0x70] sm:$0xff]  ;;  %v4198_v8 = vpack.c.bf16 %v200_v62, %v199_v61 }
  0x20   :  { %4155 = vmatprep.subr.bf16.mxu1 %v4154_v30  ;;  %v152_v5 = vld [vmem:[%s6538_s2 + $0x228] sm:$0xff]  ;;  %v183_v6 = vld [vmem:[%s6538_s2 + $0x320] sm:$0xff]  ;;  %v169_v10 = vld [vmem:[%s6538_s2 + $0x2b0] sm:$0xff] }
  0x21   :  { %v184_v9 = vld [vmem:[%s6538_s2 + $0x328] sm:$0xff]  ;;  %v170_v11 = vld [vmem:[%s6538_s2 + $0x2b8] sm:$0xff]  ;;  %v153_v12 = vld [vmem:[%s6538_s2 + $0x230] sm:$0xff]  ;;  %v4168_v15 = vpack.c.bf16 %v152_v5, %v151_v60 }
  0x22   :  { %4125 = vmatpush3.bf16.msra.mxu0 %v4124_v36  ;;  %v201_v13 = vld [vmem:[%s6538_s2 + $0x3b0] sm:$0xff]  ;;  %v202_v14 = vld [vmem:[%s6538_s2 + $0x3b8] sm:$0xff]  ;;  %v60_v16 = vld [vmem:[%s6539_s0 + $0xc8] sm:$0xff]  ;;  %v4200_v19 = vpack.c.bf16 %v184_v9, %v183_v6  ;;  %v4170_v20 = vpack.c.bf16 %v170_v11, %v169_v10 }
  0x23   :  { %4157 = vmatpush3.bf16.msra.mxu1 %v4156_v37  ;;  %4159 = vmatprep.subr.bf16.mxu0 %v4158_v38  ;;  %v62_v17 = vld [vmem:[%s6539_s0 + $0xd8] sm:$0xff]  ;;  %v59_v18 = vld [vmem:[%s6539_s0 + $0xc0] sm:$0xff]  ;;  %v185_v22 = vld [vmem:[%s6538_s2 + $0x330] sm:$0xff]  ;;  %v4202_v24 = vpack.c.bf16 %v202_v14, %v201_v13 }
  0x24   :  { %4191 = vmatprep.subr.bf16.mxu1 %v4190_v42  ;;  %v154_v21 = vld [vmem:[%s6538_s2 + $0x238] sm:$0xff]  ;;  %v61_v23 = vld [vmem:[%s6539_s0 + $0xd0] sm:$0xff]  ;;  %v171_v26 = vld [vmem:[%s6538_s2 + $0x2c0] sm:$0xff] }
  0x25   :  { %357 = vmatmul.mubr.f32.vlgmr.msra.gmra.mrb[0].mxu0 %v35_v48  ;;  %v186_v25 = vld [vmem:[%s6538_s2 + $0x338] sm:$0xff]  ;;  %v172_v27 = vld [vmem:[%s6538_s2 + $0x2c8] sm:$0xff]  ;;  %v155_v28 = vld [vmem:[%s6538_s2 + $0x240] sm:$0xff]  ;;  %v4172_v31 = vpack.c.bf16 %v154_v21, %v153_v12 }
  0x26   :  { %442 = vmatmul.mubr.f32.vlgmr.msra.gmra.mrb[0].mxu1 %v37_v49  ;;  %4161 = vmatpush3.bf16.msra.mxu0 %v4160_v50  ;;  %v203_v29 = vld [vmem:[%s6538_s2 + $0x3c0] sm:$0xff]  ;;  %v204_v30 = vld [vmem:[%s6538_s2 + $0x3c8] sm:$0xff]  ;;  %v74_v33 = vld [vmem:[%s6539_s0 + $0x138] sm:$0xff]  ;;  %v4204_v35 = vpack.c.bf16 %v186_v25, %v185_v22  ;;  %v4174_v36 = vpack.c.bf16 %v172_v27, %v171_v26 }
  0x27   :  { %4193 = vmatpush3.bf16.msra.mxu1 %v4192_v51  ;;  %4163 = vmatprep.subr.bf16.mxu0 %v4162_v52  ;;  %v72_v32 = vld [vmem:[%s6539_s0 + $0x128] sm:$0xff]  ;;  %v71_v34 = vld [vmem:[%s6539_s0 + $0x120] sm:$0xff]  ;;  %v73_v39 = vld [vmem:[%s6539_s0 + $0x130] sm:$0xff]  ;;  %v4206_v40 = vpack.c.bf16 %v204_v30, %v203_v29 }
  0x28   :  { %4195 = vmatprep.subr.bf16.mxu1 %v4194_v56  ;;  %361 = vmatprep.mubr.f32.mxu0 %v48_v0  ;;  %v156_v37 = vld [vmem:[%s6538_s2 + $0x248] sm:$0xff]  ;;  %v187_v38 = vld [vmem:[%s6538_s2 + $0x340] sm:$0xff]  ;;  %v173_v42 = vld [vmem:[%s6538_s2 + $0x2d0] sm:$0xff] }
  0x29   :  { %446 = vmatprep.mubr.f32.mxu1 %v50_v1  ;;  %362 = vmatmul.mubr.f32.gmra.mrb[2].mxu0 %v47_v2  ;;  %v188_v41 = vld [vmem:[%s6538_s2 + $0x348] sm:$0xff]  ;;  %v174_v43 = vld [vmem:[%s6538_s2 + $0x2d8] sm:$0xff]  ;;  %v205_v44 = vld [vmem:[%s6538_s2 + $0x3d0] sm:$0xff]  ;;  %v4176_v46 = vpack.c.bf16 %v156_v37, %v155_v28 }
  0x2a   :  { %4165 = vmatpush3.bf16.msra.mxu0 %v4164_v63  ;;  %447 = vmatmul.mubr.f32.gmra.mrb[2].mxu1 %v49_v7  ;;  %v206_v45 = vld [vmem:[%s6538_s2 + $0x3d8] sm:$0xff]  ;;  %v157_v47 = vld [vmem:[%s6538_s2 + $0x250] sm:$0xff]  ;;  %v40_v48 = vld [vmem:[%s6539_s0 + $0x28] sm:$0xff]  ;;  %v4208_v49 = vpack.c.bf16 %v188_v41, %v187_v38  ;;  %v4178_v50 = vpack.c.bf16 %v174_v43, %v173_v42 }
  0x2b   :  { %4197 = vmatpush3.bf16.msra.mxu1 %v4196_v3  ;;  %4167 = vmatprep.subr.bf16.mxu0 %v4166_v4  ;;  %v158_v51 = vld [vmem:[%s6538_s2 + $0x258] sm:$0xff]  ;;  %v189_v52 = vld [vmem:[%s6538_s2 + $0x350] sm:$0xff]  ;;  %v4210_v54 = vpack.c.bf16 %v206_v45, %v205_v44  ;;  %v175_v56 = vld [vmem:[%s6538_s2 + $0x2e0] sm:$0xff] }
  0x2c   :  { %4199 = vmatprep.subr.bf16.mxu1 %v4198_v8  ;;  %366 = vmatprep.mubr.f32.mxu0 %v60_v16  ;;  %v42_v53 = vld [vmem:[%s6539_s0 + $0x38] sm:$0xff]  ;;  %v176_v57 = vld [vmem:[%s6538_s2 + $0x2e8] sm:$0xff]  ;;  %v207_v58 = vld [vmem:[%s6538_s2 + $0x3e0] sm:$0xff]  ;;  %v4180_v60 = vpack.c.bf16 %v158_v51, %v157_v47 }
  0x2d   :  { %451 = vmatprep.mubr.f32.mxu1 %v62_v17  ;;  %367 = vmatmul.mubr.f32.gmra.mrb[4].mxu0 %v59_v18  ;;  %v190_v55 = vld [vmem:[%s6538_s2 + $0x358] sm:$0xff]  ;;  %v208_v59 = vld [vmem:[%s6538_s2 + $0x3e8] sm:$0xff]  ;;  %v4182_v62 = vpack.c.bf16 %v176_v57, %v175_v56  ;;  %v159_v63 = vld [vmem:[%s6538_s2 + $0x260] sm:$0xff] }
  0x2e   :  { %4169 = vmatpush3.bf16.msra.mxu0 %v4168_v15  ;;  %452 = vmatmul.mubr.f32.gmra.mrb[4].mxu1 %v61_v23  ;;  %v4212_v61 = vpack.c.bf16 %v190_v55, %v189_v52  ;;  %v160_v0 = vld [vmem:[%s6538_s2 + $0x268] sm:$0xff]  ;;  %v191_v1 = vld [vmem:[%s6538_s2 + $0x360] sm:$0xff]  ;;  %v4214_v2 = vpack.c.bf16 %v208_v59, %v207_v58  ;;  %v177_v4 = vld [vmem:[%s6538_s2 + $0x2f0] sm:$0xff] }
  0x2f   :  { %4201 = vmatpush3.bf16.msra.mxu1 %v4200_v19  ;;  %4171 = vmatprep.subr.bf16.mxu0 %v4170_v20  ;;  %v192_v3 = vld [vmem:[%s6538_s2 + $0x368] sm:$0xff]  ;;  %v178_v5 = vld [vmem:[%s6538_s2 + $0x2f8] sm:$0xff]  ;;  %v209_v6 = vld [vmem:[%s6538_s2 + $0x3f0] sm:$0xff]  ;;  %v4184_v8 = vpack.c.bf16 %v160_v0, %v159_v63 }
  0x30   :  { %4203 = vmatprep.subr.bf16.mxu1 %v4202_v24  ;;  %371 = vmatprep.mubr.f32.mxu0 %v72_v32  ;;  %v210_v7 = vld [vmem:[%s6538_s2 + $0x3f8] sm:$0xff]  ;;  %v4216_v9 = vpack.c.bf16 %v192_v3, %v191_v1  ;;  %v4186_v10 = vpack.c.bf16 %v178_v5, %v177_v4  ;;  %v161_v11 = vld [vmem:[%s6538_s2 + $0x270] sm:$0xff]  ;;  %v227_v16 = vld [vmem:[%s6538_s2 + $0x480] sm:$0xff] }
  0x31   :  { %456 = vmatprep.mubr.f32.mxu1 %v74_v33  ;;  %372 = vmatmul.mubr.f32.gmra.mrb[6].mxu0 %v71_v34  ;;  %v162_v12 = vld [vmem:[%s6538_s2 + $0x278] sm:$0xff]  ;;  %v193_v13 = vld [vmem:[%s6538_s2 + $0x370] sm:$0xff]  ;;  %v4218_v14 = vpack.c.bf16 %v210_v7, %v209_v6  ;;  %v228_v17 = vld [vmem:[%s6538_s2 + $0x488] sm:$0xff] }
  0x32   :  { %4173 = vmatpush3.bf16.msra.mxu0 %v4172_v31  ;;  %457 = vmatmul.mubr.f32.gmra.mrb[6].mxu1 %v73_v39  ;;  %v194_v15 = vld [vmem:[%s6538_s2 + $0x378] sm:$0xff]  ;;  %v259_v18 = vld [vmem:[%s6538_s2 + $0x580] sm:$0xff]  ;;  %v260_v19 = vld [vmem:[%s6538_s2 + $0x588] sm:$0xff]  ;;  %v4188_v20 = vpack.c.bf16 %v162_v12, %v161_v11  ;;  %v4222_v22 = vpack.c.bf16 %v228_v17, %v227_v16 }
  0x33   :  { %4205 = vmatpush3.bf16.msra.mxu1 %v4204_v35  ;;  %4175 = vmatprep.subr.bf16.mxu0 %v4174_v36  ;;  %v4220_v21 = vpack.c.bf16 %v194_v15, %v193_v13  ;;  %v211_v23 = vld [vmem:[%s6538_s2 + $0x400] sm:$0xff]  ;;  %v212_v24 = vld [vmem:[%s6538_s2 + $0x408] sm:$0xff]  ;;  %v4254_v25 = vpack.c.bf16 %v260_v19, %v259_v18  ;;  %v229_v29 = vld [vmem:[%s6538_s2 + $0x490] sm:$0xff] }
  0x34   :  { %4207 = vmatprep.subr.bf16.mxu1 %v4206_v40  ;;  %526 = vmatprep.mubr.f32.mxu0 %v40_v48  ;;  %v243_v26 = vld [vmem:[%s6538_s2 + $0x500] sm:$0xff]  ;;  %v244_v27 = vld [vmem:[%s6538_s2 + $0x508] sm:$0xff]  ;;  %v230_v30 = vld [vmem:[%s6538_s2 + $0x498] sm:$0xff]  ;;  %v4224_v31 = vpack.c.bf16 %v212_v24, %v211_v23 }
  0x35   :  { %611 = vmatprep.mubr.f32.mxu1 %v42_v53  ;;  %v39_v28 = vld [vmem:[%s6539_s0 + $0x20] sm:$0xff]  ;;  %v41_v32 = vld [vmem:[%s6539_s0 + $0x30] sm:$0xff]  ;;  %v262_v34 = vld [vmem:[%s6538_s2 + $0x598] sm:$0xff]  ;;  %v4256_v35 = vpack.c.bf16 %v244_v27, %v243_v26  ;;  %v4226_v40 = vpack.c.bf16 %v230_v30, %v229_v29 }
  0x36   :  { %4177 = vmatpush3.bf16.msra.mxu0 %v4176_v46  ;;  %v261_v33 = vld [vmem:[%s6538_s2 + $0x590] sm:$0xff]  ;;  %v52_v36 = vld [vmem:[%s6539_s0 + $0x88] sm:$0xff]  ;;  %v214_v38 = vld [vmem:[%s6538_s2 + $0x418] sm:$0xff] }
  0x37   :  { %4209 = vmatpush3.bf16.msra.mxu1 %v4208_v49  ;;  %4179 = vmatprep.subr.bf16.mxu0 %v4178_v50  ;;  %v213_v37 = vld [vmem:[%s6538_s2 + $0x410] sm:$0xff]  ;;  %v51_v39 = vld [vmem:[%s6539_s0 + $0x80] sm:$0xff]  ;;  %v246_v42 = vld [vmem:[%s6538_s2 + $0x518] sm:$0xff]  ;;  %v4258_v44 = vpack.c.bf16 %v262_v34, %v261_v33 }
  0x38   :  { %4211 = vmatprep.subr.bf16.mxu1 %v4210_v54  ;;  %v245_v41 = vld [vmem:[%s6538_s2 + $0x510] sm:$0xff]  ;;  %v54_v43 = vld [vmem:[%s6539_s0 + $0x98] sm:$0xff]  ;;  %v231_v45 = vld [vmem:[%s6538_s2 + $0x4a0] sm:$0xff]  ;;  %v4228_v47 = vpack.c.bf16 %v214_v38, %v213_v37 }
  0x39   :  { %v232_v46 = vld [vmem:[%s6538_s2 + $0x4a8] sm:$0xff]  ;;  %v53_v48 = vld [vmem:[%s6539_s0 + $0x90] sm:$0xff]  ;;  %v263_v49 = vld [vmem:[%s6538_s2 + $0x5a0] sm:$0xff]  ;;  %v4260_v51 = vpack.c.bf16 %v246_v42, %v245_v41 }
  0x3a   :  { %4181 = vmatpush3.bf16.msra.mxu0 %v4180_v60  ;;  %v264_v50 = vld [vmem:[%s6538_s2 + $0x5a8] sm:$0xff]  ;;  %v215_v53 = vld [vmem:[%s6538_s2 + $0x420] sm:$0xff]  ;;  %v4230_v56 = vpack.c.bf16 %v232_v46, %v231_v45  ;;  %v66_v57 = vld [vmem:[%s6539_s0 + $0xf8] sm:$0xff] }
  0x3b   :  { %4213 = vmatpush3.bf16.msra.mxu1 %v4212_v61  ;;  %4183 = vmatprep.subr.bf16.mxu0 %v4182_v62  ;;  %v64_v52 = vld [vmem:[%s6539_s0 + $0xe8] sm:$0xff]  ;;  %v63_v55 = vld [vmem:[%s6539_s0 + $0xe0] sm:$0xff]  ;;  %v4262_v60 = vpack.c.bf16 %v264_v50, %v263_v49  ;;  %v65_v61 = vld [vmem:[%s6539_s0 + $0xf0] sm:$0xff] }
  0x3c   :  { %4215 = vmatprep.subr.bf16.mxu1 %v4214_v2  ;;  %v216_v54 = vld [vmem:[%s6538_s2 + $0x428] sm:$0xff]  ;;  %v247_v58 = vld [vmem:[%s6538_s2 + $0x520] sm:$0xff]  ;;  %v233_v62 = vld [vmem:[%s6538_s2 + $0x4b0] sm:$0xff] }
  0x3d   :  { %v248_v59 = vld [vmem:[%s6538_s2 + $0x528] sm:$0xff]  ;;  %v234_v63 = vld [vmem:[%s6538_s2 + $0x4b8] sm:$0xff]  ;;  %v4232_v0 = vpack.c.bf16 %v216_v54, %v215_v53  ;;  %v265_v2 = vld [vmem:[%s6538_s2 + $0x5b0] sm:$0xff] }
  0x3e   :  { %4185 = vmatpush3.bf16.msra.mxu0 %v4184_v8  ;;  %v76_v1 = vld [vmem:[%s6539_s0 + $0x148] sm:$0xff]  ;;  %v266_v3 = vld [vmem:[%s6538_s2 + $0x5b8] sm:$0xff]  ;;  %v4264_v4 = vpack.c.bf16 %v248_v59, %v247_v58  ;;  %v217_v5 = vld [vmem:[%s6538_s2 + $0x430] sm:$0xff]  ;;  %v4234_v8 = vpack.c.bf16 %v234_v63, %v233_v62 }
  0x3f   :  { %4217 = vmatpush3.bf16.msra.mxu1 %v4216_v9  ;;  %4187 = vmatprep.subr.bf16.mxu0 %v4186_v10  ;;  %v218_v6 = vld [vmem:[%s6538_s2 + $0x438] sm:$0xff]  ;;  %v249_v7 = vld [vmem:[%s6538_s2 + $0x530] sm:$0xff]  ;;  %v235_v10 = vld [vmem:[%s6538_s2 + $0x4c0] sm:$0xff]  ;;  %v4266_v13 = vpack.c.bf16 %v266_v3, %v265_v2 }
  0x40   :  { %4219 = vmatprep.subr.bf16.mxu1 %v4218_v14  ;;  %v250_v9 = vld [vmem:[%s6538_s2 + $0x538] sm:$0xff]  ;;  %v236_v11 = vld [vmem:[%s6538_s2 + $0x4c8] sm:$0xff]  ;;  %v267_v14 = vld [vmem:[%s6538_s2 + $0x5c0] sm:$0xff]  ;;  %v4236_v17 = vpack.c.bf16 %v218_v6, %v217_v5 }
  0x41   :  { %v78_v12 = vld [vmem:[%s6539_s0 + $0x158] sm:$0xff]  ;;  %v268_v15 = vld [vmem:[%s6538_s2 + $0x5c8] sm:$0xff]  ;;  %v75_v16 = vld [vmem:[%s6539_s0 + $0x140] sm:$0xff]  ;;  %v4268_v19 = vpack.c.bf16 %v250_v9, %v249_v7 }
  0x42   :  { %4189 = vmatpush3.bf16.msra.mxu0 %v4188_v20  ;;  %v77_v18 = vld [vmem:[%s6539_s0 + $0x150] sm:$0xff]  ;;  %v4238_v20 = vpack.c.bf16 %v236_v11, %v235_v10  ;;  %v251_v23 = vld [vmem:[%s6538_s2 + $0x540] sm:$0xff]  ;;  %v4270_v24 = vpack.c.bf16 %v268_v15, %v267_v14  ;;  %v238_v27 = vld [vmem:[%s6538_s2 + $0x4d8] sm:$0xff] }
  0x43   :  { %4221 = vmatpush3.bf16.msra.mxu1 %v4220_v21  ;;  %4223 = vmatprep.subr.bf16.mxu0 %v4222_v22  ;;  %v219_v21 = vld [vmem:[%s6538_s2 + $0x440] sm:$0xff]  ;;  %v220_v22 = vld [vmem:[%s6538_s2 + $0x448] sm:$0xff]  ;;  %v237_v26 = vld [vmem:[%s6538_s2 + $0x4d0] sm:$0xff] }
  0x44   :  { %4255 = vmatprep.subr.bf16.mxu1 %v4254_v25  ;;  %v252_v25 = vld [vmem:[%s6538_s2 + $0x548] sm:$0xff]  ;;  %v270_v29 = vld [vmem:[%s6538_s2 + $0x5d8] sm:$0xff]  ;;  %v4242_v34 = vpack.c.bf16 %v238_v27, %v237_v26  ;;  %v253_v37 = vld [vmem:[%s6538_s2 + $0x550] sm:$0xff] }
  0x45   :  { %527 = vmatmul.mubr.f32.vlgmr.msra.gmra.mrb[8].mxu0 %v39_v28  ;;  %v269_v28 = vld [vmem:[%s6538_s2 + $0x5d0] sm:$0xff]  ;;  %v44_v30 = vld [vmem:[%s6539_s0 + $0x48] sm:$0xff]  ;;  %v4272_v33 = vpack.c.bf16 %v252_v25, %v251_v23  ;;  %v271_v42 = vld [vmem:[%s6538_s2 + $0x5e0] sm:$0xff] }
  0x46   :  { %4225 = vmatpush3.bf16.msra.mxu0 %v4224_v31  ;;  %612 = vmatmul.mubr.f32.vlgmr.msra.gmra.mrb[8].mxu1 %v41_v32  ;;  %v4240_v31 = vpack.c.bf16 %v220_v22, %v219_v21  ;;  %v46_v32 = vld [vmem:[%s6539_s0 + $0x58] sm:$0xff]  ;;  %v4274_v38 = vpack.c.bf16 %v270_v29, %v269_v28  ;;  %v240_v41 = vld [vmem:[%s6538_s2 + $0x4e8] sm:$0xff]  ;;  %v255_v49 = vld [vmem:[%s6538_s2 + $0x560] sm:$0xff]  ;;  %v6552_v28 = vmov 0.0|0.0  }
  0x47   :  { %4257 = vmatpush3.bf16.msra.mxu1 %v4256_v35  ;;  %531 = vmatprep.mubr.f32.mxu0 %v52_v36  ;;  %v221_v35 = vld [vmem:[%s6538_s2 + $0x450] sm:$0xff]  ;;  %v222_v36 = vld [vmem:[%s6538_s2 + $0x458] sm:$0xff]  ;;  %v43_v2 = vld [vmem:[%s6539_s0 + $0x40] sm:$0xff] }
  0x48   :  { %4227 = vmatprep.subr.bf16.mxu0 %v4226_v40  ;;  %616 = vmatprep.mubr.f32.mxu1 %v54_v43  ;;  %v239_v40 = vld [vmem:[%s6538_s2 + $0x4e0] sm:$0xff]  ;;  %v272_v43 = vld [vmem:[%s6538_s2 + $0x5e8] sm:$0xff]  ;;  %v242_v53 = vld [vmem:[%s6538_s2 + $0x4f8] sm:$0xff] }
  0x49   :  { %532 = vmatmul.mubr.f32.gmra.mrb[10].mxu0 %v51_v39  ;;  %4259 = vmatprep.subr.bf16.mxu1 %v4258_v44  ;;  %v254_v39 = vld [vmem:[%s6538_s2 + $0x558] sm:$0xff]  ;;  %v4244_v44 = vpack.c.bf16 %v222_v36, %v221_v35  ;;  %v4246_v46 = vpack.c.bf16 %v240_v41, %v239_v40  ;;  %v4278_v50 = vpack.c.bf16 %v272_v43, %v271_v42  ;;  %v273_v54 = vld [vmem:[%s6538_s2 + $0x5f0] sm:$0xff]  ;;  %v55_v6 = vld [vmem:[%s6539_s0 + $0xa0] sm:$0xff] }
  0x4a   :  { %4229 = vmatpush3.bf16.msra.mxu0 %v4228_v47  ;;  %617 = vmatmul.mubr.f32.gmra.mrb[10].mxu1 %v53_v48  ;;  %v4276_v45 = vpack.c.bf16 %v254_v39, %v253_v37  ;;  %v223_v47 = vld [vmem:[%s6538_s2 + $0x460] sm:$0xff]  ;;  %v224_v48 = vld [vmem:[%s6538_s2 + $0x468] sm:$0xff]  ;;  %v225_v59 = vld [vmem:[%s6538_s2 + $0x470] sm:$0xff] }
  0x4b   :  { %4261 = vmatpush3.bf16.msra.mxu1 %v4260_v51  ;;  %536 = vmatprep.mubr.f32.mxu0 %v64_v52  ;;  %v256_v51 = vld [vmem:[%s6538_s2 + $0x568] sm:$0xff]  ;;  %v241_v52 = vld [vmem:[%s6538_s2 + $0x4f0] sm:$0xff]  ;;  %v258_v63 = vld [vmem:[%s6538_s2 + $0x578] sm:$0xff] }
  0x4c   :  { %4231 = vmatprep.subr.bf16.mxu0 %v4230_v56  ;;  %621 = vmatprep.mubr.f32.mxu1 %v66_v57  ;;  %v4248_v56 = vpack.c.bf16 %v224_v48, %v223_v47  ;;  %v4280_v57 = vpack.c.bf16 %v256_v51, %v255_v49  ;;  %v4250_v58 = vpack.c.bf16 %v242_v53, %v241_v52  ;;  %v257_v62 = vld [vmem:[%s6538_s2 + $0x570] sm:$0xff]  ;;  %v58_v5 = vld [vmem:[%s6539_s0 + $0xb8] sm:$0xff]  ;;  %v67_v10 = vld [vmem:[%s6539_s0 + $0x100] sm:$0xff] }
  0x4d   :  { %537 = vmatmul.mubr.f32.gmra.mrb[12].mxu0 %v63_v55  ;;  %4263 = vmatprep.subr.bf16.mxu1 %v4262_v60  ;;  %v274_v55 = vld [vmem:[%s6538_s2 + $0x5f8] sm:$0xff]  ;;  %v45_v3 = vld [vmem:[%s6539_s0 + $0x50] sm:$0xff]  ;;  %v79_v14 = vld [vmem:[%s6539_s0 + $0x160] sm:$0xff] }
  0x4e   :  { %4233 = vmatpush3.bf16.msra.mxu0 %v4232_v0  ;;  %622 = vmatmul.mubr.f32.gmra.mrb[12].mxu1 %v65_v61  ;;  %v226_v60 = vld [vmem:[%s6538_s2 + $0x478] sm:$0xff]  ;;  %v4282_v61 = vpack.c.bf16 %v274_v55, %v273_v54  ;;  %v57_v7 = vld [vmem:[%s6539_s0 + $0xb0] sm:$0xff]  ;;  %v806_v22 = vld [vmem:[%s6540_s3 + $0x20] sm:$0xff] }
  0x4f   :  { %4265 = vmatpush3.bf16.msra.mxu1 %v4264_v4  ;;  %541 = vmatprep.mubr.f32.mxu0 %v76_v1  ;;  %v4252_v0 = vpack.c.bf16 %v226_v60, %v225_v59  ;;  %v4284_v1 = vpack.c.bf16 %v258_v63, %v257_v62  ;;  %v56_v4 = vld [vmem:[%s6539_s0 + $0xa8] sm:$0xff]  ;;  %v70_v9 = vld [vmem:[%s6539_s0 + $0x118] sm:$0xff]  ;;  %v69_v11 = vld [vmem:[%s6539_s0 + $0x110] sm:$0xff] }
  0x50   :  { %4235 = vmatprep.subr.bf16.mxu0 %v4234_v8  ;;  %626 = vmatprep.mubr.f32.mxu1 %v78_v12  ;;  %v68_v8 = vld [vmem:[%s6539_s0 + $0x108] sm:$0xff]  ;;  %v81_v15 = vld [vmem:[%s6539_s0 + $0x170] sm:$0xff]  ;;  %v809_v26 = vld [vmem:[%s6540_s3 + $0x38] sm:$0xff] }
  0x51   :  { %542 = vmatmul.mubr.f32.gmra.mrb[14].mxu0 %v75_v16  ;;  %4267 = vmatprep.subr.bf16.mxu1 %v4266_v13  ;;  %v80_v12 = vld [vmem:[%s6539_s0 + $0x168] sm:$0xff]  ;;  %v82_v13 = vld [vmem:[%s6539_s0 + $0x178] sm:$0xff]  ;;  %v802_v16 = vld [vmem:[%s6540_s3] sm:$0xff] }
  0x52   :  { %4237 = vmatpush3.bf16.msra.mxu0 %v4236_v17  ;;  %627 = vmatmul.mubr.f32.gmra.mrb[14].mxu1 %v77_v18  ;;  %v803_v17 = vld [vmem:[%s6540_s3 + $0x8] sm:$0xff]  ;;  %v804_v18 = vld [vmem:[%s6540_s3 + $0x10] sm:$0xff]  ;;  %vm5625_vm2 = vmpackc.low %vm810_vm0, %vm810_vm0 }
  0x53   :  { %4269 = vmatpush3.bf16.msra.mxu1 %v4268_v19  ;;  %4239 = vmatprep.subr.bf16.mxu0 %v4238_v20  ;;  %v4286_v19 = vpack.c.bf16 %v803_v17, %v802_v16  ;;  %v805_v20 = vld [vmem:[%s6540_s3 + $0x18] sm:$0xff]  ;;  %v807_v23 = vld [vmem:[%s6540_s3 + $0x28] sm:$0xff]  ;;  %v808_v25 = vld [vmem:[%s6540_s3 + $0x30] sm:$0xff]  ;;  %s4795_s3 = smov 104  }
  0x54   :  { %4271 = vmatprep.subr.bf16.mxu1 %v4270_v24  ;;  %696 = vmatprep.mubr.f32.mxu0 %v44_v30  ;;  %v4290_v21 = vpack.c.bf16 %v805_v20, %v804_v18  ;;  %v4294_v24 = vpack.c.bf16 %v807_v23, %v806_v22  ;;  %v4298_v27 = vpack.c.bf16 %v809_v26, %v808_v25 }
  0x55   :  { %781 = vmatprep.mubr.f32.mxu1 %v46_v32 }
  0x56   :  { %4241 = vmatpush3.bf16.msra.mxu0 %v4240_v31 }
  0x57   :  { %4273 = vmatpush3.bf16.msra.mxu1 %v4272_v33  ;;  %4243 = vmatprep.subr.bf16.mxu0 %v4242_v34 }
  0x58   :  { %4275 = vmatprep.subr.bf16.mxu1 %v4274_v38 }
  0x5a   :  { %4245 = vmatpush3.bf16.msra.mxu0 %v4244_v44 }
  0x5b   :  { %4277 = vmatpush3.bf16.msra.mxu1 %v4276_v45  ;;  %4247 = vmatprep.subr.bf16.mxu0 %v4246_v46 }
  0x5c   :  { %4279 = vmatprep.subr.bf16.mxu1 %v4278_v50 }
  0x5e   :  { %4249 = vmatpush3.bf16.msra.mxu0 %v4248_v56 }
  0x5f   :  { %4281 = vmatpush3.bf16.msra.mxu1 %v4280_v57  ;;  %4251 = vmatprep.subr.bf16.mxu0 %v4250_v58 }
  0x60   :  { %4283 = vmatprep.subr.bf16.mxu1 %v4282_v61 }
  0x62   :  { %4253 = vmatpush3.bf16.msra.mxu0 %v4252_v0 }
  0x63   :  { %4285 = vmatpush3.bf16.msra.mxu1 %v4284_v1  ;;  %4287 = vmatprep.subr.bf16.mxu0 %v4286_v19 }
  0x64   :  { %4302 = vmatprep.subr.bf16.mxu1 %v6552_v28 }
  0x65   :  { %697 = vmatmul.mubr.f32.vlgmr.msra.gmra.mrb[16].mxu0 %v43_v2 }
  0x66   :  { %782 = vmatmul.mubr.f32.vlgmr.msra.gmra.mrb[16].mxu1 %v45_v3  ;;  %701 = vmatprep.mubr.f32.mxu0 %v56_v4 }
  0x67   :  { %786 = vmatprep.mubr.f32.mxu1 %v58_v5  ;;  %4289 = vmatpush3.bf16.msra.mxu0 %v4286_v19 }
  0x68   :  { %4291 = vmatprep.subr.bf16.mxu0 %v4290_v21 }
  0x69   :  { %702 = vmatmul.mubr.f32.gmra.mrb[18].mxu0 %v55_v6 }
  0x6a   :  { %787 = vmatmul.mubr.f32.gmra.mrb[18].mxu1 %v57_v7  ;;  %706 = vmatprep.mubr.f32.mxu0 %v68_v8 }
  0x6b   :  { %791 = vmatprep.mubr.f32.mxu1 %v70_v9  ;;  %4293 = vmatpush3.bf16.msra.mxu0 %v4290_v21 }
  0x6c   :  { %4295 = vmatprep.subr.bf16.mxu0 %v4294_v24 }
  0x6d   :  { %707 = vmatmul.mubr.f32.gmra.mrb[20].mxu0 %v67_v10 }
  0x6e   :  { %792 = vmatmul.mubr.f32.gmra.mrb[20].mxu1 %v69_v11  ;;  %711 = vmatprep.mubr.f32.mxu0 %v80_v12 }
  0x6f   :  { %796 = vmatprep.mubr.f32.mxu1 %v82_v13  ;;  %4297 = vmatpush3.bf16.msra.mxu0 %v4294_v24 }
  0x70   :  { %4299 = vmatprep.subr.bf16.mxu0 %v4298_v27 }
  0x71   :  { %712 = vmatmul.mubr.f32.gmra.mrb[22].mxu0 %v79_v14 }
  0x72   :  { %797 = vmatmul.mubr.f32.gmra.mrb[22].mxu1 %v81_v15 }
  0x73   :  { %4301 = vmatpush3.bf16.msra.mxu0 %v4298_v27 }
  0xf8   :  { %v3506_v29 = vpop.f32.mrb[0].mxu0 }
  0xf9   :  { %v3550_v30 = vpop.f32.mrb[0].mxu1  ;;  %v3507_v31 = vpop.f32.mrb[1].mxu0 }
  0xfa   :  { %v3508_v32 = vadd.f32 %v3507_v31, %v3506_v29  ;;  %v3551_v33 = vpop.f32.mrb[1].mxu1 }
  0xfb   :  { %v3552_v34 = vadd.f32 %v3551_v33, %v3550_v30 }
  0xfc   :  { %v3509_v35 = vpop.f32.mrb[2].mxu0 }
  0xfd   :  { %v444_v36 = vadd.f32 %v3552_v34, %v3508_v32  ;;  %v3553_v37 = vpop.f32.mrb[2].mxu1  ;;  %v3510_v38 = vpop.f32.mrb[3].mxu0 }
  0xfe   :  { %v3511_v39 = vadd.f32 %v3510_v38, %v3509_v35  ;;  %v3554_v40 = vpop.f32.mrb[3].mxu1 }
  0xff   :  { %v3555_v41 = vadd.f32 %v3554_v40, %v3553_v37 }
 0x100   :  { %v3512_v42 = vpop.f32.mrb[4].mxu0 }
 0x101   :  { %v449_v43 = vadd.f32 %v3555_v41, %v3511_v39  ;;  %v3556_v44 = vpop.f32.mrb[4].mxu1  ;;  %v3513_v45 = vpop.f32.mrb[5].mxu0  ;;  %v6551_v39 = vmov 0.0  }
 0x102   :  { %v3514_v46 = vadd.f32 %v3513_v45, %v3512_v42  ;;  %v3557_v47 = vpop.f32.mrb[5].mxu1  ;;  %3894 = vmatprep.mubr.msk.f32.mxu1 %vm4793_vm1, %v6551_v39 }
 0x103   :  { %v3558_v48 = vadd.f32 %v3557_v47, %v3556_v44 }
 0x104   :  { %v3515_v49 = vpop.f32.mrb[6].mxu0 }
 0x105   :  { %v454_v50 = vadd.f32 %v3558_v48, %v3514_v46  ;;  %v3559_v51 = vpop.f32.mrb[6].mxu1  ;;  %v3516_v52 = vpop.f32.mrb[7].mxu0 }
 0x106   :  { %v3517_v53 = vadd.f32 %v3516_v52, %v3515_v49  ;;  %v3560_v54 = vpop.f32.mrb[7].mxu1 }
 0x107   :  { %v3561_v55 = vadd.f32 %v3560_v54, %v3559_v51 }
 0x109   :  { %v459_v56 = vadd.f32 %v3561_v55, %v3517_v53 }
 0x118   :  { %v3594_v57 = vpop.f32.mrb[8].mxu0 }
 0x119   :  { %v3595_v58 = vpop.f32.mrb[9].mxu0  ;;  %v3638_v59 = vpop.f32.mrb[8].mxu1 }
 0x11a   :  { %v3596_v60 = vadd.f32 %v3595_v58, %v3594_v57  ;;  %v3639_v61 = vpop.f32.mrb[9].mxu1 }
 0x11b   :  { %v3640_v62 = vadd.f32 %v3639_v61, %v3638_v59 }
 0x11c   :  { %v529_v63 = vadd.f32 %v3596_v60, %v444_v36  ;;  %v3597_v0 = vpop.f32.mrb[10].mxu0 }
 0x11d   :  { %v3598_v1 = vpop.f32.mrb[11].mxu0  ;;  %v3641_v2 = vpop.f32.mrb[10].mxu1 }
 0x11e   :  { %v614_v3 = vadd.f32 %v3640_v62, %v529_v63  ;;  %v3599_v4 = vadd.f32 %v3598_v1, %v3597_v0  ;;  %v3642_v5 = vpop.f32.mrb[11].mxu1  ;;  %v908_v0 = vld [vmem:[%s6541_s4] sm:$0xff]  ;;  %v4801_v1 = vmov 1  }
 0x11f   :  { %v3643_v6 = vadd.f32 %v3642_v5, %v3641_v2  ;;  %4521 = vset.pattern.permute.xlu1 %v4801_v1  ;;  %v4802_v2 = vmov 0  }
 0x120   :  { %v534_v7 = vadd.f32 %v3599_v4, %v449_v43  ;;  %v3600_v8 = vpop.f32.mrb[12].mxu0  ;;  %4520 = vset.pattern.permute.xlu0 %v4802_v2 }
 0x121   :  { %v3601_v9 = vpop.f32.mrb[13].mxu0  ;;  %v3644_v10 = vpop.f32.mrb[12].mxu1 }
 0x122   :  { %v619_v11 = vadd.f32 %v3643_v6, %v534_v7  ;;  %v3602_v12 = vadd.f32 %v3601_v9, %v3600_v8  ;;  %v3645_v13 = vpop.f32.mrb[13].mxu1 }
 0x123   :  { %v3646_v14 = vadd.f32 %v3645_v13, %v3644_v10 }
 0x124   :  { %v539_v15 = vadd.f32 %v3602_v12, %v454_v50  ;;  %v3603_v16 = vpop.f32.mrb[14].mxu0 }
 0x125   :  { %v3604_v17 = vpop.f32.mrb[15].mxu0  ;;  %v3647_v18 = vpop.f32.mrb[14].mxu1 }
 0x126   :  { %v624_v19 = vadd.f32 %v3646_v14, %v539_v15  ;;  %v3605_v20 = vadd.f32 %v3604_v17, %v3603_v16  ;;  %v3648_v21 = vpop.f32.mrb[15].mxu1 }
 0x127   :  { %v3649_v22 = vadd.f32 %v3648_v21, %v3647_v18 }
 0x128   :  { %v544_v23 = vadd.f32 %v3605_v20, %v459_v56 }
 0x12a   :  { %v629_v24 = vadd.f32 %v3649_v22, %v544_v23  ;;  %v4803_v22 = vmov 3   ;;  %v4804_v23 = vmov 2  }
 0x138   :  { %v3682_v25 = vpop.f32.mrb[16].mxu0 }
 0x139   :  { %v3683_v26 = vpop.f32.mrb[17].mxu0  ;;  %v3726_v27 = vpop.f32.mrb[16].mxu1 }
 0x13a   :  { %v3684_v29 = vadd.f32 %v3683_v26, %v3682_v25  ;;  %v3727_v30 = vpop.f32.mrb[17].mxu1  ;;  %v4805_v26 = vmov 5  }
 0x13b   :  { %v3728_v31 = vadd.f32 %v3727_v30, %v3726_v27  ;;  %v4806_v27 = vmov 4   ;;  %v4808_v30 = vmov 6  }
 0x13c   :  { %v699_v32 = vadd.f32 %v3684_v29, %v614_v3  ;;  %v3685_v33 = vpop.f32.mrb[18].mxu0  ;;  %v4807_v29 = vmov 7  }
 0x13d   :  { %v3686_v34 = vpop.f32.mrb[19].mxu0  ;;  %v3729_v35 = vpop.f32.mrb[18].mxu1 }
 0x13e   :  { %v784_v36 = vadd.f32 %v3728_v31, %v699_v32  ;;  %v3687_v37 = vadd.f32 %v3686_v34, %v3685_v33  ;;  %v3730_v38 = vpop.f32.mrb[19].mxu1 }
 0x13f   :  { %v3731_v40 = vadd.f32 %v3730_v38, %v3729_v35 }
 0x140   :  { %v704_v41 = vadd.f32 %v3687_v37, %v619_v11  ;;  %v3688_v42 = vpop.f32.mrb[20].mxu0  ;;  %3880 = vmatprep.mubr.msk.f32.mxu0 %vm810_vm0, %v784_v36  ;;  %v5692_v37 = vld [vmem:[%s6542_s1] sm:$0xff]  ;;  %s4809_s1 = smov 72  }
 0x141   :  { %v3689_v43 = vpop.f32.mrb[21].mxu0  ;;  %v3732_v44 = vpop.f32.mrb[20].mxu1 }
 0x142   :  { %v789_v45 = vadd.f32 %v3731_v40, %v704_v41  ;;  %v3690_v46 = vadd.f32 %v3689_v43, %v3688_v42  ;;  %v3733_v47 = vpop.f32.mrb[21].mxu1  ;;  %v277_v41 = vunpack.c.1.s8 %v5692_v37 }
 0x143   :  { %v3734_v48 = vadd.f32 %v3733_v47, %v3732_v44 }
 0x144   :  { %v709_v49 = vadd.f32 %v3690_v46, %v624_v19  ;;  %v3691_v50 = vpop.f32.mrb[22].mxu0  ;;  %3881 = vmatmul.mubr.msk.f32.vlgmr.msra.gmra.mrb[24].mxu0 %vm810_vm0, %v789_v45  ;;  %v5621_v51 = vpack.i.bf16 %v789_v45, %v784_v36  ;;  %v4303_v52 = vpack.c.bf16 %v789_v45, %v784_v36  ;;  %v6549_v36 = vlaneseq }
 0x145   :  { %v3692_v54 = vpop.f32.mrb[23].mxu0  ;;  %v3735_v55 = vpop.f32.mrb[22].mxu1  ;;  %v281_v44 = vcvt.s32.f32 %v277_v41 }
 0x146   :  { %v794_v56 = vadd.f32 %v3734_v48, %v709_v49  ;;  %v3693_v57 = vadd.f32 %v3692_v54, %v3691_v50  ;;  %4476 = vrot.lane.b32.xlu1 %v5621_v51, %s4795_s3  ;;  %4466 = vrot.lane.b32.xlu0 %v5621_v51, %s4796_s26  ;;  %v3736_v58 = vpop.f32.mrb[23].mxu1  ;;  %v5695_v38 = vshrl.u32 %v6549_v36, 7 }
 0x147   :  { %4305 = vmatpush3.bf16.xpose.msk.msra.mxu1 %vm5625_vm2, %v4303_v52  ;;  %4311 = vmatprep.subr.bf16.mxu0 %v4303_v52  ;;  %v3737_v59 = vadd.f32 %v3736_v58, %v3735_v55 }
 0x148   :  { %v714_v60 = vadd.f32 %v3693_v57, %v629_v24  ;;  %4313 = vmatpush3.bf16.msra.mxu0 %v4303_v52  ;;  %3883 = vmatprep.mubr.msk.f32.mxu0 %vm810_vm0, %v794_v56  ;;  %v1218_v42 = vsub.s32 1, %v5695_v38  ;;  %v6550_v43 = vsub.s32 0, %v5695_v38  ;;  %v1692_v49 = vsub.s32 3, %v5695_v38 }
 0x149   :  { %4306 = vmatprep.subr.bf16.mxu1 %v6552_v28  ;;  %v1455_v50 = vsub.s32 2, %v5695_v38  ;;  %v3388_v52 = vadd.f32 -1.0, %v281_v44 }
 0x14a   :  { %v799_v61 = vadd.f32 %v3737_v59, %v714_v60  ;;  %4491 = vrot.lane.b32.xlu1 %v5621_v51, %s4797_s27  ;;  %4471 = vrot.lane.b32.xlu0 %v5621_v51, %s4798_s28 }
 0x14b   :  { %v5724_v59 = vmul.f32 1e+30, %v3388_v52 }
 0x14c   :  { %3884 = vmatmul.mubr.msk.f32.gmra.mrb[26].mxu0 %vm810_vm0, %v799_v61  ;;  %v5642_v62 = vpack.i.bf16 %v799_v61, %v794_v56  ;;  %v4307_v63 = vpack.c.bf16 %v799_v61, %v794_v56 }
 0x14d   :  { %6559 = vst [vmem:[#allocation3_spill] sm:$0xff] %v5724_v59 }
 0x14e   :  { %4496 = vrot.lane.b32.xlu1 %v5642_v62, %s4796_s26  ;;  %4481 = vrot.lane.b32.xlu0 %v5621_v51, %s4799_s29 }
 0x14f   :  { %4309 = vmatpush3.bf16.xpose.msk.msra.mxu1 %vm5625_vm2, %v4307_v63  ;;  %4315 = vmatprep.subr.bf16.mxu0 %v4307_v63 }
 0x150   :  { %4317 = vmatpush3.bf16.msra.mxu0 %v4307_v63  ;;  %v2166_v63 = vsub.s32 5, %v5695_v38 }
 0x152   :  { %4506 = vrot.lane.b32.xlu1 %v5642_v62, %s4795_s3  ;;  %4486 = vrot.lane.b32.xlu0 %v5621_v51, %s4800_s30 }
 0x156   :  { %4501 = vrot.lane.b32.xlu0 %v5642_v62, %s4798_s28  ;;  %3895 = vmatmul.mubr.msk.f32.vlgmr.msra.gmra.mrb[24].mxu1 %vm810_vm0, %v908_v0 }
 0x15a   :  { %4511 = vrot.lane.b32.xlu0 %v5642_v62, %s4799_s29 }
 0x15e   :  { %4516 = vrot.lane.b32.xlu0 %v5642_v62, %s4800_s30 }
 0x1b8   :  { %v4477_v3 = vpop.permute.xlu1 %4476  ;;  %v4467_v4 = vpop.permute.xlu0 %4466 }
 0x1b9   :  { %v4469_v5 = vunpack.i.h.bf16 %v4467_v4  ;;  %v4468_v6 = vunpack.i.l.bf16 %v4467_v4  ;;  %v4479_v14 = vunpack.i.h.bf16 %v4477_v3  ;;  %v4478_v15 = vunpack.i.l.bf16 %v4477_v3 }
 0x1ba   :  { %v1929_v4 = vsub.s32 4, %v5695_v38 }
 0x1bb   :  { %v4318_v7 = vpack.c.bf16 %v4469_v5, %v4468_v6  ;;  %v5671_v19 = vpack.c.bf16 %v4479_v14, %v4478_v15 }
 0x1bc   :  { %v5666_v8 = vpop.permute.xlu1 %4491  ;;  %v4472_v9 = vpop.permute.xlu0 %4471 }
 0x1bd   :  { %v4474_v10 = vunpack.i.h.bf16 %v4472_v9  ;;  %v4473_v11 = vunpack.i.l.bf16 %v4472_v9  ;;  %4319 = vmatprep.subr.bf16.mxu1 %v4318_v7 }
 0x1be   :  { %4321 = vmatpush3.bf16.msra.mxu1 %v4318_v7 }
 0x1bf   :  { %v5668_v12 = vpack.c.bf16 %v4474_v10, %v4473_v11 }
 0x1c0   :  { %v4497_v13 = vpop.permute.xlu1 %4496  ;;  %v5683_v33 = vpop.permute.xlu0 %4481 }
 0x1c1   :  { %v4499_v16 = vunpack.i.h.bf16 %v4497_v13  ;;  %v4498_v17 = vunpack.i.l.bf16 %v4497_v13  ;;  %4327 = vmatprep.subr.bf16.mxu0 %v5668_v12 }
 0x1c3   :  { %v4322_v18 = vpack.c.bf16 %v4499_v16, %v4498_v17 }
 0x1c4   :  { %v5685_v34 = vpop.permute.xlu0 %4486  ;;  %v5702_v45 = vpop.permute.xlu1 %4506 }
 0x1c5   :  { %4323 = vmatprep.subr.bf16.mxu1 %v4322_v18 }
 0x1c6   :  { %4325 = vmatpush3.bf16.msra.mxu1 %v4322_v18 }
 0x1c7   :  { %4335 = vmatprep.subr.bf16.mxu1 %v5671_v19 }
 0x1c8   :  { %v5687_v35 = vpop.permute.xlu0 %4501 }
 0x1cc   :  { %v5697_v40 = vpop.permute.xlu0 %4511 }
 0x1d0   :  { %v5704_v46 = vpop.permute.xlu0 %4516 }
 0x217   :  { %v3882_v20 = vpop.f32.mrb[24].mxu0 }
 0x218   :  { %1205 = vperm.xlu1 %4521, %v3882_v20   ;;  %990 = vperm.xlu0 %4520, %v3882_v20   ;;  %v889_v21 = vpop.f32.mrb[25].mxu0 }
 0x21c   :  { %4523 = vset.pattern.permute.xlu1 %v4803_v22  ;;  %4522 = vset.pattern.permute.xlu0 %v4804_v23 }
 0x21d   :  { %1679 = vperm.xlu1 %4523, %v3882_v20   ;;  %1442 = vperm.xlu0 %4522, %v3882_v20  }
 0x21f   :  { %v3885_v24 = vpop.f32.mrb[26].mxu0 }
 0x220   :  { %v899_v25 = vpop.f32.mrb[27].mxu0 }
 0x221   :  { %4525 = vset.pattern.permute.xlu1 %v4805_v26  ;;  %4524 = vset.pattern.permute.xlu0 %v4806_v27 }
 0x222   :  { %2153 = vperm.xlu1 %4525, %v3882_v20   ;;  %1916 = vperm.xlu0 %4524, %v3882_v20  }
 0x226   :  { %4527 = vset.pattern.permute.xlu1 %v4807_v29  ;;  %4526 = vset.pattern.permute.xlu0 %v4808_v30 }
 0x227   :  { %2627 = vperm.xlu1 %4527, %v3882_v20   ;;  %2390 = vperm.xlu0 %4526, %v3882_v20  }
 0x229   :  { %v5674_v31 = vpop.f32.mrb[24].mxu1 }
 0x22a   :  { %v3896_v32 = vpop.f32.mrb[25].mxu1  ;;  %v5707_v47 = vrot.slane %v5674_v31, %v1218_v42  ;;  %v5712_v48 = vrot.slane %v5674_v31, %v6550_v43  ;;  %v5719_v57 = vrot.slane %v5674_v31, %v1692_v49  ;;  %v5722_v58 = vrot.slane %v5674_v31, %v1455_v50 }
 0x22b   :  { %4529 = vset.pattern.permute.xlu1 %v4801_v1  ;;  %4528 = vset.pattern.permute.xlu0 %v4802_v2  ;;  %v5741_v15 = vrot.slane %v5674_v31, %v2166_v63  ;;  %v5744_v16 = vrot.slane %v5674_v31, %v1929_v4 }
 0x22c   :  { %1201 = vperm.xlu1 %4529, %v889_v21   ;;  %985 = vperm.xlu0 %4528, %v889_v21  }
 0x230   :  { %4530 = vset.pattern.permute.xlu1 %v4804_v23  ;;  %995 = vperm.xlu0 %4528, %v899_v25  }
 0x231   :  { %1438 = vperm.xlu1 %4530, %v889_v21  }
 0x234   :  { %4544 = vset.pattern.permute.xlu0 %v4801_v1 }
 0x235   :  { %4531 = vset.pattern.permute.xlu1 %v4803_v22  ;;  %1209 = vperm.xlu0 %4544, %v899_v25  }
 0x236   :  { %1675 = vperm.xlu1 %4531, %v889_v21  }
 0x239   :  { %4545 = vset.pattern.permute.xlu0 %v4804_v23 }
 0x23a   :  { %4532 = vset.pattern.permute.xlu1 %v4806_v27  ;;  %1446 = vperm.xlu0 %4545, %v899_v25  }
 0x23b   :  { %1912 = vperm.xlu1 %4532, %v889_v21  }
 0x23e   :  { %4546 = vset.pattern.permute.xlu0 %v4803_v22 }
 0x23f   :  { %4533 = vset.pattern.permute.xlu1 %v4805_v26  ;;  %1683 = vperm.xlu0 %4546, %v899_v25  }
 0x240   :  { %2149 = vperm.xlu1 %4533, %v889_v21  }
 0x243   :  { %4547 = vset.pattern.permute.xlu0 %v4806_v27 }
 0x244   :  { %4534 = vset.pattern.permute.xlu1 %v4808_v30  ;;  %1920 = vperm.xlu0 %4547, %v899_v25  }
 0x245   :  { %2386 = vperm.xlu1 %4534, %v889_v21  }
 0x248   :  { %4548 = vset.pattern.permute.xlu0 %v4805_v26 }
 0x249   :  { %4535 = vset.pattern.permute.xlu1 %v4807_v29  ;;  %2157 = vperm.xlu0 %4548, %v899_v25  }
 0x24a   :  { %2623 = vperm.xlu1 %4535, %v889_v21   ;;  %v2403_v21 = vsub.s32 6, %v5695_v38 }
 0x24c   :  { %v5760_v42 = vrot.slane %v5674_v31, %v2403_v21 }
 0x24d   :  { %4549 = vset.pattern.permute.xlu0 %v4808_v30 }
 0x24e   :  { %4536 = vset.pattern.permute.xlu1 %v4802_v2  ;;  %2394 = vperm.xlu0 %4549, %v899_v25  }
 0x24f   :  { %1000 = vperm.xlu1 %4536, %v3885_v24  }
 0x252   :  { %4550 = vset.pattern.permute.xlu0 %v4807_v29 }
 0x253   :  { %4537 = vset.pattern.permute.xlu1 %v4801_v1  ;;  %2631 = vperm.xlu0 %4550, %v899_v25  }
 0x254   :  { %1213 = vperm.xlu1 %4537, %v3885_v24  }
 0x257   :  { %4566 = vset.pattern.permute.xlu0 %v4802_v2 }
 0x258   :  { %4538 = vset.pattern.permute.xlu1 %v4804_v23  ;;  %v276_v23 = vunpack.c.0.s8 %v5692_v37 }
 0x259   :  { %1450 = vperm.xlu1 %4538, %v3885_v24  }
 0x25a   :  { %v280_v44 = vcvt.s32.f32 %v276_v23 }
 0x25d   :  { %4539 = vset.pattern.permute.xlu1 %v4803_v22 }
 0x25e   :  { %1687 = vperm.xlu1 %4539, %v3885_v24  }
 0x262   :  { %4540 = vset.pattern.permute.xlu1 %v4806_v27  ;;  %v2640_v27 = vsub.s32 7, %v5695_v38 }
 0x263   :  { %1924 = vperm.xlu1 %4540, %v3885_v24  }
 0x264   :  { %v5763_v49 = vrot.slane %v5674_v31, %v2640_v27 }
 0x267   :  { %4541 = vset.pattern.permute.xlu1 %v4805_v26 }
 0x268   :  { %2161 = vperm.xlu1 %4541, %v3885_v24  }
 0x26c   :  { %4542 = vset.pattern.permute.xlu1 %v4808_v30 }
 0x26d   :  { %2398 = vperm.xlu1 %4542, %v3885_v24  }
 0x271   :  { %4543 = vset.pattern.permute.xlu1 %v4807_v29 }
 0x272   :  { %2635 = vperm.xlu1 %4543, %v3885_v24  }
 0x276   :  { %4567 = vset.pattern.permute.xlu1 %v4802_v2 }
 0x297   :  { %v1206_v53 = vpop.permute.xlu1 %1205  ;;  %v991_v54 = vpop.permute.xlu0 %990 }
 0x298   :  { %v1221_v55 = vadd.f32 %v5707_v47, %v1206_v53  ;;  %v1008_v56 = vadd.f32 %v5712_v48, %v991_v54 }
 0x29a   :  { %v1229_v60 = vmul.f32 0.2, %v1221_v55  ;;  %v1016_v61 = vmul.f32 0.2, %v1008_v56  ;;  %vm1225_vm3 = vcmp.gt.f32.partialorder %v1221_v55, 0.0  ;;  %vm1012_vm4 = vcmp.gt.f32.partialorder %v1008_v56, 0.0 }
 0x29c   :  { %v1680_v0 = vpop.permute.xlu1 %1679  ;;  %v1443_v1 = vpop.permute.xlu0 %1442  ;;  %v1233_v2 = vsel %vm1225_vm3, %v1221_v55, %v1229_v60  ;;  %v1020_v3 = vsel %vm1012_vm4, %v1008_v56, %v1016_v61 }
 0x29d   :  { %v1695_v5 = vadd.f32 %v5719_v57, %v1680_v0  ;;  %v1458_v6 = vadd.f32 %v5722_v58, %v1443_v1  ;;  %v5731_v7 = vadd.f32 %v1233_v2, %v5724_v59  ;;  %v5734_v9 = vadd.f32 %v1020_v3, %v5724_v59 }
 0x29e   :  { %v3387_v0 = vadd.f32 -1.0, %v280_v44 }
 0x29f   :  { %v1703_v10 = vmul.f32 0.2, %v1695_v5  ;;  %v1466_v11 = vmul.f32 0.2, %v1458_v6  ;;  %v1243_v13 = vsel %vm1027_vm5, %v5731_v7, -inf  ;;  %v1031_v14 = vsel %vm1027_vm5, %v5734_v9, -inf }
 0x2a0   :  { %1244 = vmax.xlane.f32.xlu1 %v1243_v13  ;;  %1032 = vmax.xlane.f32.xlu0 %v1031_v14  ;;  %vm1462_vm6 = vcmp.gt.f32.partialorder %v1458_v6, 0.0  ;;  %vm1699_vm7 = vcmp.gt.f32.partialorder %v1695_v5, 0.0 }
 0x2a1   :  { %v2154_v17 = vpop.permute.xlu1 %2153  ;;  %v1917_v18 = vpop.permute.xlu0 %1916  ;;  %v1470_v20 = vsel %vm1462_vm6, %v1458_v6, %v1466_v11  ;;  %v1707_v22 = vsel %vm1699_vm7, %v1695_v5, %v1703_v10  ;;  %v5779_v10 = vmul.f32 1e+30, %v3387_v0 }
 0x2a2   :  { %v2169_v24 = vadd.f32 %v5741_v15, %v2154_v17  ;;  %v1932_v25 = vadd.f32 %v5744_v16, %v1917_v18  ;;  %v5751_v26 = vadd.f32 %v1470_v20, %v5724_v59  ;;  %v5757_v32 = vadd.f32 %v1707_v22, %v5724_v59 }
 0x2a4   :  { %v1940_v29 = vmul.f32 0.2, %v1932_v25  ;;  %v1480_v30 = vsel %vm1027_vm5, %v5751_v26, -inf  ;;  %v2177_v41 = vmul.f32 0.2, %v2169_v24  ;;  %vm1936_vm8 = vcmp.gt.f32.partialorder %v1932_v25, 0.0 }
 0x2a5   :  { %1481 = vmax.xlane.f32.xlu1 %v1480_v30  ;;  %vm2173_vm9 = vcmp.gt.f32.partialorder %v2169_v24, 0.0  ;;  %v1717_v56 = vsel %vm1027_vm5, %v5757_v32, -inf }
 0x2a6   :  { %v2628_v50 = vpop.permute.xlu1 %2627  ;;  %v2391_v52 = vpop.permute.xlu0 %2390  ;;  %v1944_v53 = vsel %vm1936_vm8, %v1932_v25, %v1940_v29  ;;  %v2181_v63 = vsel %vm2173_vm9, %v2169_v24, %v2177_v41 }
 0x2a7   :  { %v2406_v54 = vadd.f32 %v5760_v42, %v2391_v52  ;;  %v2643_v55 = vadd.f32 %v5763_v49, %v2628_v50  ;;  %v5770_v60 = vadd.f32 %v1944_v53, %v5724_v59  ;;  %v5776_v5 = vadd.f32 %v2181_v63, %v5724_v59 }
 0x2a9   :  { %v2414_v61 = vmul.f32 0.2, %v2406_v54  ;;  %1718 = vmax.xlane.f32.xlu1 %v1717_v56  ;;  %vm2410_vm10 = vcmp.gt.f32.partialorder %v2406_v54, 0.0  ;;  %v2651_v2 = vmul.f32 0.2, %v2643_v55  ;;  %v1954_v4 = vsel %vm1027_vm5, %v5770_v60, -inf }
 0x2aa   :  { %vm2647_vm11 = vcmp.gt.f32.partialorder %v2643_v55, 0.0  ;;  %v2191_v17 = vsel %vm1027_vm5, %v5776_v5, -inf }
 0x2ab   :  { %v1202_v31 = vpop.permute.xlu1 %1201  ;;  %v986_v1 = vpop.permute.xlu0 %985  ;;  %v2418_v11 = vsel %vm2410_vm10, %v2406_v54, %v2414_v61  ;;  %v2655_v21 = vsel %vm2647_vm11, %v2643_v55, %v2651_v2 }
 0x2ac   :  { %v1220_v3 = vadd.f32 %v5707_v47, %v1202_v31  ;;  %v1007_v6 = vadd.f32 %v5712_v48, %v986_v1  ;;  %v5784_v20 = vadd.f32 %v2418_v11, %v5724_v59  ;;  %v5793_v29 = vadd.f32 %v2655_v21, %v5724_v59 }
 0x2ad   :  { %1955 = vmax.xlane.f32.xlu1 %v1954_v4  ;;  %v4484_v59 = vunpack.i.h.bf16 %v5683_v33 }
 0x2ae   :  { %v1228_v13 = vmul.f32 0.2, %v1220_v3  ;;  %vm1224_vm12 = vcmp.gt.f32.partialorder %v1220_v3, 0.0  ;;  %v1015_v22 = vmul.f32 0.2, %v1007_v6  ;;  %vm1011_vm13 = vcmp.gt.f32.partialorder %v1007_v6, 0.0 }
 0x2af   :  { %v2428_v30 = vsel %vm1027_vm5, %v5784_v20, -inf  ;;  %v996_v41 = vpop.permute.xlu0 %995  ;;  %v2665_v55 = vsel %vm1027_vm5, %v5793_v29, -inf }
 0x2b0   :  { %v1439_v14 = vpop.permute.xlu1 %1438  ;;  %v1232_v18 = vsel %vm1224_vm12, %v1220_v3, %v1228_v13  ;;  %v1019_v52 = vsel %vm1011_vm13, %v1007_v6, %v1015_v22  ;;  %v278_v13 = vunpack.c.2.s8 %v5692_v37 }
 0x2b1   :  { %v1457_v23 = vadd.f32 %v5722_v58, %v1439_v14  ;;  %2192 = vmax.xlane.f32.xlu1 %v2191_v17  ;;  %v5788_v24 = vadd.f32 %v1232_v18, %v5779_v10  ;;  %v5806_v63 = vadd.f32 %v1019_v52, %v5779_v10  ;;  %v1009_v52 = vadd.f32 %v5712_v48, %v996_v41 }
 0x2b3   :  { %v1465_v25 = vmul.f32 0.2, %v1457_v23  ;;  %v1240_v27 = vsel %vm1027_vm5, %v5788_v24, -inf  ;;  %vm1461_vm14 = vcmp.gt.f32.partialorder %v1457_v23, 0.0  ;;  %v1028_v4 = vsel %vm1027_vm5, %v5806_v63, -inf }
 0x2b4   :  { %1241 = vmax.xlane.f32.xlu0 %v1240_v27  ;;  %v1210_v1 = vpop.permute.xlu0 %1209  ;;  %v282_v27 = vcvt.s32.f32 %v278_v13  ;;  %vm1013_vm6 = vcmp.gt.f32.partialorder %v1009_v52, 0.0 }
 0x2b5   :  { %v1676_v44 = vpop.permute.xlu1 %1675  ;;  %2429 = vmax.xlane.f32.xlu1 %v2428_v30  ;;  %v1469_v50 = vsel %vm1461_vm14, %v1457_v23, %v1465_v25  ;;  %v279_v30 = vunpack.c.3.s8 %v5692_v37  ;;  %v1017_v37 = vmul.f32 0.2, %v1009_v52 }
 0x2b6   :  { %v1694_v53 = vadd.f32 %v5719_v57, %v1676_v44  ;;  %v5799_v54 = vadd.f32 %v1469_v50, %v5779_v10 }
 0x2b8   :  { %v1702_v56 = vmul.f32 0.2, %v1694_v53  ;;  %v1477_v61 = vsel %vm1027_vm5, %v5799_v54, -inf  ;;  %vm1698_vm15 = vcmp.gt.f32.partialorder %v1694_v53, 0.0 }
 0x2b9   :  { %2666 = vmax.xlane.f32.xlu1 %v2665_v55  ;;  %1478 = vmax.xlane.f32.xlu0 %v1477_v61  ;;  %v1447_v22 = vpop.permute.xlu0 %1446 }
 0x2ba   :  { %v1913_v0 = vpop.permute.xlu1 %1912  ;;  %v1706_v31 = vsel %vm1698_vm15, %v1694_v53, %v1702_v56  ;;  %v3389_v56 = vadd.f32 -1.0, %v282_v27 }
 0x2bb   :  { %v1931_v2 = vadd.f32 %v5744_v16, %v1913_v0  ;;  %v5810_v3 = vadd.f32 %v1706_v31, %v5779_v10 }
 0x2bd   :  { %v1939_v6 = vmul.f32 0.2, %v1931_v2  ;;  %1029 = vmax.xlane.f32.xlu1 %v1028_v4  ;;  %v1714_v11 = vsel %vm1027_vm5, %v5810_v3, -inf  ;;  %vm1935_vm2 = vcmp.gt.f32.partialorder %v1931_v2, 0.0  ;;  %v1222_v4 = vadd.f32 %v5707_v47, %v1210_v1 }
 0x2be   :  { %1715 = vmax.xlane.f32.xlu0 %v1714_v11  ;;  %v1684_v61 = vpop.permute.xlu0 %1683  ;;  %v1459_v1 = vadd.f32 %v5722_v58, %v1447_v22 }
 0x2bf   :  { %v2150_v14 = vpop.permute.xlu1 %2149  ;;  %v1943_v17 = vsel %vm1935_vm2, %v1931_v2, %v1939_v6  ;;  %v283_v2 = vcvt.s32.f32 %v279_v30  ;;  %v1021_v30 = vsel %vm1013_vm6, %v1009_v52, %v1017_v37  ;;  %vm1226_vm8 = vcmp.gt.f32.partialorder %v1222_v4, 0.0 }
 0x2c0   :  { %v2168_v18 = vadd.f32 %v5741_v15, %v2150_v14  ;;  %v5819_v21 = vadd.f32 %v1943_v17, %v5779_v10  ;;  %v5836_v14 = vmul.f32 1e+30, %v3389_v56  ;;  %v1696_v52 = vadd.f32 %v5719_v57, %v1684_v61 }
 0x2c1   :  { %v3390_v17 = vadd.f32 -1.0, %v283_v2  ;;  %vm1463_vm10 = vcmp.gt.f32.partialorder %v1459_v1, 0.0 }
 0x2c2   :  { %v2176_v23 = vmul.f32 0.2, %v2168_v18  ;;  %v1951_v25 = vsel %vm1027_vm5, %v5819_v21, -inf  ;;  %vm2172_vm3 = vcmp.gt.f32.partialorder %v2168_v18, 0.0  ;;  %6560 = vst [vmem:[#allocation4_spill] sm:$0xff] %v5836_v14  ;;  %vm1700_vm12 = vcmp.gt.f32.partialorder %v1696_v52, 0.0 }
 0x2c3   :  { %1952 = vmax.xlane.f32.xlu0 %v1951_v25  ;;  %v1921_v27 = vpop.permute.xlu0 %1920  ;;  %v1704_v61 = vmul.f32 0.2, %v1696_v52 }
 0x2c4   :  { %v2387_v44 = vpop.permute.xlu1 %2386  ;;  %v2180_v50 = vsel %vm2172_vm3, %v2168_v18, %v2176_v23  ;;  %v1230_v18 = vmul.f32 0.2, %v1222_v4 }
 0x2c5   :  { %v2405_v53 = vadd.f32 %v5760_v42, %v2387_v44  ;;  %v5827_v55 = vadd.f32 %v2180_v50, %v5779_v10 }
 0x2c6   :  { %v1234_v2 = vsel %vm1226_vm8, %v1222_v4, %v1230_v18 }
 0x2c7   :  { %v2413_v0 = vmul.f32 0.2, %v2405_v53  ;;  %v2188_v31 = vsel %vm1027_vm5, %v5827_v55, -inf  ;;  %vm2409_vm4 = vcmp.gt.f32.partialorder %v2405_v53, 0.0  ;;  %v5858_v4 = vadd.f32 %v1234_v2, %v5836_v14 }
 0x2c8   :  { %2189 = vmax.xlane.f32.xlu0 %v2188_v31  ;;  %v5848_v31 = vmul.f32 1e+30, %v3390_v17  ;;  %v1933_v17 = vadd.f32 %v5744_v16, %v1921_v27 }
 0x2c9   :  { %v2624_v6 = vpop.permute.xlu1 %2623  ;;  %v2417_v11 = vsel %vm2409_vm4, %v2405_v53, %v2413_v0  ;;  %v5846_v0 = vadd.f32 %v1021_v30, %v5836_v14 }
 0x2ca   :  { %v2642_v41 = vadd.f32 %v5763_v49, %v2624_v6  ;;  %v5834_v13 = vadd.f32 %v2417_v11, %v5779_v10  ;;  %6561 = vst [vmem:[#allocation5_spill] sm:$0xff] %v5848_v31  ;;  %v1467_v6 = vmul.f32 0.2, %v1459_v1  ;;  %vm1937_vm13 = vcmp.gt.f32.partialorder %v1933_v17, 0.0 }
 0x2cb   :  { %v1034_v18 = vsel %vm1027_vm5, %v5846_v0, -inf }
 0x2cc   :  { %v2650_v23 = vmul.f32 0.2, %v2642_v41  ;;  %v2425_v25 = vsel %vm1027_vm5, %v5834_v13, -inf  ;;  %vm2646_vm7 = vcmp.gt.f32.partialorder %v2642_v41, 0.0  ;;  %v1471_v30 = vsel %vm1463_vm10, %v1459_v1, %v1467_v6 }
 0x2cd   :  { %2426 = vmax.xlane.f32.xlu0 %v2425_v25  ;;  %v5872_v6 = vadd.f32 %v1471_v30, %v5836_v14  ;;  %vm1195_vm10 = vcmask 64512  }
 0x2ce   :  { %v1001_v44 = vpop.permute.xlu1 %1000  ;;  %v2654_v50 = vsel %vm2646_vm7, %v2642_v41, %v2650_v23 }
 0x2cf   :  { %v1010_v53 = vadd.f32 %v5712_v48, %v1001_v44  ;;  %v5843_v56 = vadd.f32 %v2654_v50, %v5779_v10  ;;  %v2158_v48 = vpop.permute.xlu0 %2157 }
 0x2d1   :  { %v1018_v11 = vmul.f32 0.2, %v1010_v53  ;;  %v2662_v22 = vsel %vm1027_vm5, %v5843_v56, -inf  ;;  %vm1014_vm9 = vcmp.gt.f32.partialorder %v1010_v53, 0.0 }
 0x2d2   :  { %2663 = vmax.xlane.f32.xlu0 %v2662_v22 }
 0x2d3   :  { %v1214_v37 = vpop.permute.xlu1 %1213  ;;  %v1022_v41 = vsel %vm1014_vm9, %v1010_v53, %v1018_v11  ;;  %v1246_v53 = vsel %vm1027_vm5, %v5858_v4, -inf  ;;  %v1941_v11 = vmul.f32 0.2, %v1933_v17  ;;  %v2395_v27 = vpop.permute.xlu0 %2394 }
 0x2d4   :  { %v1223_v23 = vadd.f32 %v5707_v47, %v1214_v37  ;;  %v5855_v25 = vadd.f32 %v1022_v41, %v5848_v31  ;;  %v2170_v37 = vadd.f32 %v5741_v15, %v2158_v48  ;;  %v1708_v41 = vsel %vm1700_vm12, %v1696_v52, %v1704_v61 }
 0x2d5   :  { %v1945_v30 = vsel %vm1937_vm13, %v1933_v17, %v1941_v11  ;;  %v2407_v48 = vadd.f32 %v5760_v42, %v2395_v27 }
 0x2d6   :  { %v1231_v44 = vmul.f32 0.2, %v1223_v23  ;;  %1035 = vmax.xlane.f32.xlu0 %v1034_v18  ;;  %v1037_v50 = vsel %vm1027_vm5, %v5855_v25, -inf  ;;  %vm1227_vm11 = vcmp.gt.f32.partialorder %v1223_v23, 0.0  ;;  %vm2174_vm15 = vcmp.gt.f32.partialorder %v2170_v37, 0.0 }
 0x2d7   :  { %1038 = vmax.xlane.f32.xlu1 %v1037_v50  ;;  %v2415_v11 = vmul.f32 0.2, %v2407_v48  ;;  %vm2411_vm3 = vcmp.gt.f32.partialorder %v2407_v48, 0.0 }
 0x2d8   :  { %v1451_v47 = vpop.permute.xlu1 %1450  ;;  %v1235_v2 = vsel %vm1227_vm11, %v1223_v23, %v1231_v44 }
 0x2d9   :  { %v1460_v22 = vadd.f32 %v5722_v58, %v1451_v47  ;;  %v5869_v1 = vadd.f32 %v1235_v2, %v5848_v31  ;;  %v1483_v58 = vsel %vm1027_vm5, %v5872_v6, -inf  ;;  %v5880_v47 = vadd.f32 %v1708_v41, %v5836_v14 }
 0x2da   :  { %1247 = vmax.xlane.f32.xlu0 %v1246_v53  ;;  %v2178_v2 = vmul.f32 0.2, %v2170_v37  ;;  %v2632_v53 = vpop.permute.xlu0 %2631 }
 0x2db   :  { %v1468_v18 = vmul.f32 0.2, %v1460_v22  ;;  %v1249_v50 = vsel %vm1027_vm5, %v5869_v1, -inf  ;;  %vm1464_vm14 = vcmp.gt.f32.partialorder %v1460_v22, 0.0  ;;  %v1720_v17 = vsel %vm1027_vm5, %v5880_v47, -inf }
 0x2dc   :  { %1250 = vmax.xlane.f32.xlu1 %v1249_v50 }
 0x2dd   :  { %v1688_v23 = vpop.permute.xlu1 %1687  ;;  %v1472_v44 = vsel %vm1464_vm14, %v1460_v22, %v1468_v18  ;;  %v5890_v22 = vadd.f32 %v1945_v30, %v5836_v14  ;;  %v2182_v18 = vsel %vm2174_vm15, %v2170_v37, %v2178_v2  ;;  %v2419_v37 = vsel %vm2411_vm3, %v2407_v48, %v2415_v11 }
 0x2de   :  { %v1697_v52 = vadd.f32 %v5719_v57, %v1688_v23  ;;  %1484 = vmax.xlane.f32.xlu0 %v1483_v58  ;;  %v5885_v61 = vadd.f32 %v1472_v44, %v5848_v31  ;;  %v2644_v57 = vadd.f32 %v5763_v49, %v2632_v53  ;;  %v5904_v43 = vadd.f32 %v2182_v18, %v5836_v14 }
 0x2df   :  { %v1957_v44 = vsel %vm1027_vm5, %v5890_v22, -inf }
 0x2e0   :  { %v1705_v50 = vmul.f32 0.2, %v1697_v52  ;;  %v1486_v36 = vsel %vm1027_vm5, %v5885_v61, -inf  ;;  %vm1701_vm2 = vcmp.gt.f32.partialorder %v1697_v52, 0.0  ;;  %v2652_v53 = vmul.f32 0.2, %v2644_v57 }
 0x2e1   :  { %1487 = vmax.xlane.f32.xlu1 %v1486_v36  ;;  %vm2648_vm6 = vcmp.gt.f32.partialorder %v2644_v57, 0.0 }
 0x2e2   :  { %v1925_v27 = vpop.permute.xlu1 %1924  ;;  %1721 = vmax.xlane.f32.xlu0 %v1720_v17  ;;  %v1709_v41 = vsel %vm1701_vm2, %v1697_v52, %v1705_v50  ;;  %v2194_v17 = vsel %vm1027_vm5, %v5904_v43, -inf  ;;  %v2656_v48 = vsel %vm2648_vm6, %v2644_v57, %v2652_v53 }
 0x2e3   :  { %v1934_v23 = vadd.f32 %v5744_v16, %v1925_v27  ;;  %v5897_v58 = vadd.f32 %v1709_v41, %v5848_v31  ;;  %v5913_v27 = vadd.f32 %v2419_v37, %v5836_v14 }
 0x2e5   :  { %v1942_v36 = vmul.f32 0.2, %v1934_v23  ;;  %v1723_v30 = vsel %vm1027_vm5, %v5897_v58, -inf  ;;  %vm1938_vm4 = vcmp.gt.f32.partialorder %v1934_v23, 0.0 }
 0x2e6   :  { %1724 = vmax.xlane.f32.xlu1 %v1723_v30  ;;  %1958 = vmax.xlane.f32.xlu0 %v1957_v44  ;;  %v2431_v44 = vsel %vm1027_vm5, %v5913_v27, -inf  ;;  %v5924_v30 = vadd.f32 %v2656_v48, %v5836_v14  ;;  %v4483_v14 = vunpack.i.l.bf16 %v5683_v33 }
 0x2e7   :  { %v2162_v16 = vpop.permute.xlu1 %2161  ;;  %v1946_v2 = vsel %vm1938_vm4, %v1934_v23, %v1942_v36 }
 0x2e8   :  { %v2171_v52 = vadd.f32 %v5741_v15, %v2162_v16  ;;  %v5908_v50 = vadd.f32 %v1946_v2, %v5848_v31 }
 0x2ea   :  { %v2179_v41 = vmul.f32 0.2, %v2171_v52  ;;  %2195 = vmax.xlane.f32.xlu0 %v2194_v17  ;;  %v1960_v18 = vsel %vm1027_vm5, %v5908_v50, -inf  ;;  %vm2175_vm7 = vcmp.gt.f32.partialorder %v2171_v52, 0.0 }
 0x2eb   :  { %1961 = vmax.xlane.f32.xlu1 %v1960_v18 }
 0x2ec   :  { %v2399_v11 = vpop.permute.xlu1 %2398  ;;  %v2183_v23 = vsel %vm2175_vm7, %v2171_v52, %v2179_v41 }
 0x2ed   :  { %v2408_v15 = vadd.f32 %v5760_v42, %v2399_v11  ;;  %v5921_v36 = vadd.f32 %v2183_v23, %v5848_v31  ;;  %v2668_v42 = vsel %vm1027_vm5, %v5924_v30, -inf }
 0x2ee   :  { %2432 = vmax.xlane.f32.xlu0 %v2431_v44 }
 0x2ef   :  { %v2416_v37 = vmul.f32 0.2, %v2408_v15  ;;  %v2197_v16 = vsel %vm1027_vm5, %v5921_v36, -inf  ;;  %vm2412_vm8 = vcmp.gt.f32.partialorder %v2408_v15, 0.0 }
 0x2f0   :  { %2198 = vmax.xlane.f32.xlu1 %v2197_v16 }
 0x2f1   :  { %v2636_v57 = vpop.permute.xlu1 %2635  ;;  %v2420_v53 = vsel %vm2412_vm8, %v2408_v15, %v2416_v37 }
 0x2f2   :  { %v2645_v2 = vadd.f32 %v5763_v49, %v2636_v57  ;;  %2669 = vmax.xlane.f32.xlu0 %v2668_v42  ;;  %v5932_v52 = vadd.f32 %v2420_v53, %v5848_v31 }
 0x2f4   :  { %v2653_v17 = vmul.f32 0.2, %v2645_v2  ;;  %v2434_v41 = vsel %vm1027_vm5, %v5932_v52, -inf  ;;  %vm2649_vm9 = vcmp.gt.f32.partialorder %v2645_v2, 0.0 }
 0x2f5   :  { %2435 = vmax.xlane.f32.xlu1 %v2434_v41 }
 0x2f6   :  { %v2657_v18 = vsel %vm2649_vm9, %v2645_v2, %v2653_v17 }
 0x2f7   :  { %v5937_v48 = vadd.f32 %v2657_v18, %v5848_v31 }
 0x2f9   :  { %v2671_v11 = vsel %vm1027_vm5, %v5937_v48, -inf }
 0x2fa   :  { %2672 = vmax.xlane.f32.xlu1 %v2671_v11 }
 0x308   :  { %4552 = vrot.lane.b32.xlu0 %v5621_v51, %s4809_s1 }
 0x32d   :  { %v1245_v49 = vpop.xlane.xlu1 %1244  ;;  %v1033_v23 = vpop.xlane.xlu0 %1032 }
 0x32e   :  { %v1253_v15 = vsub.f32 %v5731_v7, %v1245_v49  ;;  %v1041_v44 = vsub.f32 %v5734_v9, %v1033_v23 }
 0x330   :  { %v1046_v37 = vmul.f32 1.442695, %v1041_v44  ;;  %v1258_v16 = vmul.f32 1.442695, %v1253_v15 }
 0x332   :  { %v1482_v57 = vpop.xlane.xlu1 %1481  ;;  %4568 = vpow2.f32 %v1046_v37 }
 0x333   :  { %v1490_v42 = vsub.f32 %v5751_v26, %v1482_v57  ;;  %4570 = vpow2.f32 %v1258_v16 }
 0x335   :  { %v1495_v53 = vmul.f32 1.442695, %v1490_v42 }
 0x336   :  { %v1719_v2 = vpop.xlane.xlu1 %1718 }
 0x337   :  { %v1727_v17 = vsub.f32 %v5757_v32, %v1719_v2  ;;  %4572 = vpow2.f32 %v1495_v53 }
 0x339   :  { %v1732_v41 = vmul.f32 1.442695, %v1727_v17 }
 0x33a   :  { %v1956_v51 = vpop.xlane.xlu1 %1955 }
 0x33b   :  { %v1964_v18 = vsub.f32 %v5770_v60, %v1956_v51  ;;  %4574 = vpow2.f32 %v1732_v41 }
 0x33c   :  { %v5948_v11 = vpop.eup %4568 }
 0x33d   :  { %v1969_v7 = vmul.f32 1.442695, %v1964_v18  ;;  %v1055_v49 = vsel %vm1027_vm5, %v5948_v11, 0.0  ;;  %v5952_v23 = vpop.eup %4570 }
 0x33e   :  { %v2193_v9 = vpop.xlane.xlu1 %2192  ;;  %1056 = vadd.xlane.f32.xlu1 %v1055_v49  ;;  %v1267_v60 = vsel %vm1027_vm5, %v5952_v23, 0.0 }
 0x33f   :  { %v2201_v26 = vsub.f32 %v5776_v5, %v2193_v9  ;;  %4576 = vpow2.f32 %v1969_v7 }
 0x341   :  { %v2206_v32 = vmul.f32 1.442695, %v2201_v26  ;;  %v1242_v15 = vpop.xlane.xlu0 %1241  ;;  %v5957_v37 = vpop.eup %4572 }
 0x342   :  { %v2430_v44 = vpop.xlane.xlu1 %2429  ;;  %1268 = vadd.xlane.f32.xlu1 %v1267_v60  ;;  %v1504_v53 = vsel %vm1027_vm5, %v5957_v37, 0.0  ;;  %v1252_v41 = vsub.f32 %v5788_v24, %v1242_v15 }
 0x343   :  { %v2438_v16 = vsub.f32 %v5784_v20, %v2430_v44  ;;  %4578 = vpow2.f32 %v2206_v32 }
 0x344   :  { %v1256_v26 = vmul.f32 1.442695, %v1252_v41 }
 0x345   :  { %v2443_v57 = vmul.f32 1.442695, %v2438_v16  ;;  %v5962_v2 = vpop.eup %4574 }
 0x346   :  { %v2667_v42 = vpop.xlane.xlu1 %2666  ;;  %v1479_v5 = vpop.xlane.xlu0 %1478  ;;  %1505 = vadd.xlane.f32.xlu1 %v1504_v53  ;;  %v1741_v20 = vsel %vm1027_vm5, %v5962_v2, 0.0 }
 0x347   :  { %v2675_v17 = vsub.f32 %v5793_v29, %v2667_v42  ;;  %4580 = vpow2.f32 %v2443_v57  ;;  %v1489_v32 = vsub.f32 %v5799_v54, %v1479_v5 }
 0x349   :  { %v2680_v51 = vmul.f32 1.442695, %v2675_v17  ;;  %v5968_v7 = vpop.eup %4576  ;;  %v1493_v60 = vmul.f32 1.442695, %v1489_v32 }
 0x34a   :  { %v1030_v18 = vpop.xlane.xlu1 %1029  ;;  %1742 = vadd.xlane.f32.xlu1 %v1741_v20  ;;  %v1978_v24 = vsel %vm1027_vm5, %v5968_v7, 0.0 }
 0x34b   :  { %v1040_v9 = vsub.f32 %v5806_v63, %v1030_v18  ;;  %v1716_v49 = vpop.xlane.xlu0 %1715  ;;  %4582 = vpow2.f32 %v2680_v51 }
 0x34c   :  { %v1726_v16 = vsub.f32 %v5810_v3, %v1716_v49 }
 0x34d   :  { %v1044_v29 = vmul.f32 1.442695, %v1040_v9  ;;  %v5974_v15 = vpop.eup %4578 }
 0x34e   :  { %1979 = vadd.xlane.f32.xlu1 %v1978_v24  ;;  %v2215_v63 = vsel %vm1027_vm5, %v5974_v15, 0.0  ;;  %v1730_v54 = vmul.f32 1.442695, %v1726_v16 }
 0x34f   :  { %4584 = vpow2.f32 %v1044_v29 }
 0x350   :  { %v1953_v44 = vpop.xlane.xlu0 %1952  ;;  %4586 = vpow2.f32 %v1256_v26 }
 0x351   :  { %v5979_v57 = vpop.eup %4580  ;;  %4588 = vpow2.f32 %v1493_v60  ;;  %v1963_v42 = vsub.f32 %v5819_v21, %v1953_v44 }
 0x352   :  { %2216 = vadd.xlane.f32.xlu1 %v2215_v63  ;;  %v2452_v5 = vsel %vm1027_vm5, %v5979_v57, 0.0  ;;  %4590 = vpow2.f32 %v1730_v54 }
 0x353   :  { %v1967_v3 = vmul.f32 1.442695, %v1963_v42 }
 0x355   :  { %v2190_v53 = vpop.xlane.xlu0 %2189  ;;  %v5984_v17 = vpop.eup %4582  ;;  %4592 = vpow2.f32 %v1967_v3 }
 0x356   :  { %2453 = vadd.xlane.f32.xlu1 %v2452_v5  ;;  %v2200_v51 = vsub.f32 %v5827_v55, %v2190_v53  ;;  %v2689_v18 = vsel %vm1027_vm5, %v5984_v17, 0.0 }
 0x358   :  { %v2204_v49 = vmul.f32 1.442695, %v2200_v51 }
 0x359   :  { %v5986_v41 = vpop.eup %4584 }
 0x35a   :  { %v2427_v20 = vpop.xlane.xlu0 %2426  ;;  %v1052_v21 = vsel %vm1027_vm5, %v5986_v41, 0.0  ;;  %v5993_v9 = vpop.eup %4586  ;;  %2690 = vadd.xlane.f32.xlu1 %v2689_v18  ;;  %4594 = vpow2.f32 %v2204_v49 }
 0x35b   :  { %1053 = vadd.xlane.f32.xlu0 %v1052_v21  ;;  %v2437_v26 = vsub.f32 %v5834_v13, %v2427_v20  ;;  %v1264_v32 = vsel %vm1027_vm5, %v5993_v9, 0.0  ;;  %v5998_v29 = vpop.eup %4588 }
 0x35c   :  { %v1501_v60 = vsel %vm1027_vm5, %v5998_v29, 0.0  ;;  %v6003_v16 = vpop.eup %4590 }
 0x35d   :  { %v2441_v44 = vmul.f32 1.442695, %v2437_v26  ;;  %v1738_v5 = vsel %vm1027_vm5, %v6003_v16, 0.0 }
 0x35f   :  { %1265 = vadd.xlane.f32.xlu0 %v1264_v32  ;;  %v2664_v55 = vpop.xlane.xlu0 %2663  ;;  %4596 = vpow2.f32 %v2441_v44 }
 0x360   :  { %v2674_v24 = vsub.f32 %v5843_v56, %v2664_v55  ;;  %v6009_v56 = vpop.eup %4592 }
 0x362   :  { %v2678_v54 = vmul.f32 1.442695, %v2674_v24 }
 0x363   :  { %1502 = vadd.xlane.f32.xlu0 %v1501_v60  ;;  %v1036_v63 = vpop.xlane.xlu0 %1035 }
 0x364   :  { %v1039_v13 = vpop.xlane.xlu1 %1038  ;;  %v1042_v42 = vsub.f32 %v5846_v0, %v1036_v63  ;;  %4598 = vpow2.f32 %v2678_v54  ;;  %v1975_v0 = vsel %vm1027_vm5, %v6009_v56, 0.0 }
 0x365   :  { %v1043_v53 = vsub.f32 %v5855_v25, %v1039_v13  ;;  %v6015_v25 = vpop.eup %4594 }
 0x366   :  { %v1048_v18 = vmul.f32 1.442695, %v1042_v42 }
 0x367   :  { %v1050_v3 = vmul.f32 1.442695, %v1043_v53  ;;  %1739 = vadd.xlane.f32.xlu0 %v1738_v5  ;;  %v1248_v51 = vpop.xlane.xlu0 %1247 }
 0x368   :  { %v1254_v20 = vsub.f32 %v5858_v4, %v1248_v51  ;;  %v2212_v4 = vsel %vm1027_vm5, %v6015_v25, 0.0 }
 0x369   :  { %4600 = vpow2.f32 %v1050_v3  ;;  %v1251_v21 = vpop.xlane.xlu1 %1250  ;;  %v6020_v60 = vpop.eup %4596 }
 0x36a   :  { %v1255_v49 = vsub.f32 %v5869_v1, %v1251_v21  ;;  %4602 = vpow2.f32 %v1048_v18  ;;  %v1260_v55 = vmul.f32 1.442695, %v1254_v20 }
 0x36b   :  { %1976 = vadd.xlane.f32.xlu0 %v1975_v0  ;;  %v1485_v26 = vpop.xlane.xlu0 %1484 }
 0x36c   :  { %v1262_v32 = vmul.f32 1.442695, %v1255_v49  ;;  %v1491_v24 = vsub.f32 %v5872_v6, %v1485_v26  ;;  %v2449_v6 = vsel %vm1027_vm5, %v6020_v60, 0.0 }
 0x36e   :  { %4604 = vpow2.f32 %v1262_v32  ;;  %v1488_v44 = vpop.xlane.xlu1 %1487  ;;  %v1497_v54 = vmul.f32 1.442695, %v1491_v24  ;;  %v6024_v53 = vpop.eup %4598 }
 0x36f   :  { %v1492_v1 = vsub.f32 %v5885_v61, %v1488_v44  ;;  %2213 = vadd.xlane.f32.xlu0 %v2212_v4  ;;  %v1722_v63 = vpop.xlane.xlu0 %1721  ;;  %4606 = vpow2.f32 %v1260_v55  ;;  %v2686_v21 = vsel %vm1027_vm5, %v6024_v53, 0.0 }
 0x370   :  { %v1728_v42 = vsub.f32 %v5880_v47, %v1722_v63 }
 0x371   :  { %v1499_v13 = vmul.f32 1.442695, %v1492_v1 }
 0x372   :  { %v1734_v20 = vmul.f32 1.442695, %v1728_v42 }
 0x373   :  { %v6028_v5 = vpop.eup %4600  ;;  %4608 = vpow2.f32 %v1499_v13  ;;  %v1725_v3 = vpop.xlane.xlu1 %1724  ;;  %2450 = vadd.xlane.f32.xlu0 %v2449_v6 }
 0x374   :  { %v1959_v51 = vpop.xlane.xlu0 %1958  ;;  %v1729_v61 = vsub.f32 %v5897_v58, %v1725_v3  ;;  %v1061_v18 = vsel %vm1027_vm5, %v6028_v5, 0.0  ;;  %4610 = vpow2.f32 %v1497_v54  ;;  %v6035_v49 = vpop.eup %4602 }
 0x375   :  { %1062 = vadd.xlane.f32.xlu1 %v1061_v18  ;;  %v1058_v24 = vsel %vm1027_vm5, %v6035_v49, 0.0 }
 0x376   :  { %v1736_v47 = vmul.f32 1.442695, %v1729_v61 }
 0x377   :  { %2687 = vadd.xlane.f32.xlu0 %v2686_v21 }
 0x378   :  { %v2196_v0 = vpop.xlane.xlu0 %2195  ;;  %v6037_v26 = vpop.eup %4604  ;;  %4612 = vpow2.f32 %v1736_v47 }
 0x379   :  { %v1962_v32 = vpop.xlane.xlu1 %1961  ;;  %4614 = vpow2.f32 %v1734_v20  ;;  %v1273_v55 = vsel %vm1027_vm5, %v6037_v26, 0.0  ;;  %v6044_v44 = vpop.eup %4606 }
 0x37a   :  { %v1966_v58 = vsub.f32 %v5908_v50, %v1962_v32  ;;  %1274 = vadd.xlane.f32.xlu1 %v1273_v55  ;;  %v1270_v3 = vsel %vm1027_vm5, %v6044_v44, 0.0 }
 0x37b   :  { %1059 = vadd.xlane.f32.xlu0 %v1058_v24 }
 0x37c   :  { %v1973_v4 = vmul.f32 1.442695, %v1966_v58  ;;  %v2433_v1 = vpop.xlane.xlu0 %2432 }
 0x37d   :  { %v2439_v63 = vsub.f32 %v5913_v27, %v2433_v1  ;;  %v6047_v54 = vpop.eup %4608  ;;  %v2199_v13 = vpop.xlane.xlu1 %2198 }
 0x37e   :  { %4616 = vpow2.f32 %v1973_v4  ;;  %v2203_v50 = vsub.f32 %v5921_v36, %v2199_v13  ;;  %v1510_v6 = vsel %vm1027_vm5, %v6047_v54, 0.0  ;;  %v6054_v61 = vpop.eup %4610 }
 0x37f   :  { %v2445_v42 = vmul.f32 1.442695, %v2439_v63  ;;  %1511 = vadd.xlane.f32.xlu1 %v1510_v6  ;;  %1271 = vadd.xlane.f32.xlu0 %v1270_v3  ;;  %v1507_v32 = vsel %vm1027_vm5, %v6054_v61, 0.0  ;;  %v2202_v3 = vsub.f32 %v5904_v43, %v2196_v0 }
 0x380   :  { %v2670_v18 = vpop.xlane.xlu0 %2669  ;;  %v2210_v27 = vmul.f32 1.442695, %v2203_v50 }
 0x381   :  { %4618 = vpow2.f32 %v2445_v42  ;;  %v2676_v20 = vsub.f32 %v5924_v30, %v2670_v18  ;;  %v1965_v30 = vsub.f32 %v5890_v22, %v1959_v51 }
 0x382   :  { %v6057_v47 = vpop.eup %4612  ;;  %4620 = vpow2.f32 %v2210_v27  ;;  %v2436_v36 = vpop.xlane.xlu1 %2435 }
 0x383   :  { %v2682_v21 = vmul.f32 1.442695, %v2676_v20  ;;  %v6061_v58 = vpop.eup %4614  ;;  %v2440_v55 = vsub.f32 %v5932_v52, %v2436_v36  ;;  %1508 = vadd.xlane.f32.xlu0 %v1507_v32  ;;  %v1747_v24 = vsel %vm1027_vm5, %v6057_v47, 0.0  ;;  %v1971_v6 = vmul.f32 1.442695, %v1965_v30 }
 0x384   :  { %1748 = vadd.xlane.f32.xlu1 %v1747_v24  ;;  %v1744_v1 = vsel %vm1027_vm5, %v6061_v58, 0.0  ;;  %v2208_v20 = vmul.f32 1.442695, %v2202_v3 }
 0x385   :  { %4622 = vpow2.f32 %v2682_v21  ;;  %v2447_v4 = vmul.f32 1.442695, %v2440_v55 }
 0x387   :  { %4624 = vpow2.f32 %v2447_v4  ;;  %v2673_v13 = vpop.xlane.xlu1 %2672  ;;  %1745 = vadd.xlane.f32.xlu0 %v1744_v1  ;;  %v6110_v1 = vld [vmem:[%s6543_s5] ss:$0 sm:$0xff]  ;;  %s4810_s5 = smov 8  }
 0x388   :  { %v6069_v63 = vpop.eup %4616  ;;  %v2677_v42 = vsub.f32 %v5937_v48, %v2673_v13 }
 0x389   :  { %v1984_v52 = vsel %vm1027_vm5, %v6069_v63, 0.0 }
 0x38a   :  { %1985 = vadd.xlane.f32.xlu1 %v1984_v52  ;;  %v2684_v22 = vmul.f32 1.442695, %v2677_v42  ;;  %v6126_v52 = vpop.permute.xlu0 %4552 }
 0x38b   :  { %v6074_v50 = vpop.eup %4618 }
 0x38c   :  { %v2455_v51 = vsel %vm1027_vm5, %v6074_v50, 0.0  ;;  %v6079_v18 = vpop.eup %4620  ;;  %4626 = vpow2.f32 %v2684_v22 }
 0x38d   :  { %2456 = vadd.xlane.f32.xlu0 %v2455_v51  ;;  %v2221_v48 = vsel %vm1027_vm5, %v6079_v18, 0.0  ;;  %4628 = vpow2.f32 %v1971_v6 }
 0x38e   :  { %2222 = vadd.xlane.f32.xlu1 %v2221_v48  ;;  %4630 = vpow2.f32 %v2208_v20 }
 0x38f   :  { %v6083_v27 = vpop.eup %4622 }
 0x390   :  { %v2692_v21 = vsel %vm1027_vm5, %v6083_v27, 0.0 }
 0x391   :  { %2693 = vadd.xlane.f32.xlu0 %v2692_v21  ;;  %v6087_v43 = vpop.eup %4624 }
 0x392   :  { %v2458_v0 = vsel %vm1027_vm5, %v6087_v43, 0.0 }
 0x393   :  { %2459 = vadd.xlane.f32.xlu1 %v2458_v0 }
 0x396   :  { %v6091_v36 = vpop.eup %4626 }
 0x397   :  { %v2695_v32 = vsel %vm1027_vm5, %v6091_v36, 0.0  ;;  %v6095_v55 = vpop.eup %4628 }
 0x398   :  { %2696 = vadd.xlane.f32.xlu1 %v2695_v32  ;;  %v1981_v24 = vsel %vm1027_vm5, %v6095_v55, 0.0  ;;  %v6099_v4 = vpop.eup %4630  ;;  %v4504_v32 = vunpack.i.h.bf16 %v5687_v35 }
 0x399   :  { %v2218_v30 = vsel %vm1027_vm5, %v6099_v4, 0.0 }
 0x39c   :  { %1982 = vadd.xlane.f32.xlu1 %v1981_v24  ;;  %v4503_v24 = vunpack.i.l.bf16 %v5687_v35 }
 0x39e   :  { %v4330_v35 = vpack.c.bf16 %v4504_v32, %v4503_v24 }
 0x3a0   :  { %2219 = vadd.xlane.f32.xlu1 %v2218_v30 }
 0x3a7   :  { %4562 = vrot.lane.b32.xlu0 %v5642_v62, %s4809_s1 }
 0x3ab   :  { %1533 = vrot.lane.b32.xlu0 %v6110_v1, %s4798_s28 }
 0x3af   :  { %2007 = vrot.lane.b32.xlu0 %v6110_v1, %s4799_s29  ;;  %s4815_s29 = smov 48  }
 0x3b1   :  { %4557 = vrot.lane.b32.xlu1 %v5642_v62, %s4797_s27 }
 0x3b3   :  { %2481 = vrot.lane.b32.xlu0 %v6110_v1, %s4797_s27 }
 0x3b5   :  { %1296 = vrot.lane.b32.xlu1 %v6110_v1, %s4796_s26 }
 0x3b9   :  { %1770 = vrot.lane.b32.xlu1 %v6110_v1, %s4795_s3 }
 0x3bd   :  { %2244 = vrot.lane.b32.xlu1 %v6110_v1, %s4800_s30 }
 0x3c1   :  { %2718 = vrot.lane.b32.xlu1 %v6110_v1, %s4809_s1 }
 0x3cb   :  { %v1057_v62 = vpop.xlane.xlu1 %1056 }
 0x3cc   :  { %4632 = vrcp.f32 %v1057_v62 }
 0x3cf   :  { %v1269_v13 = vpop.xlane.xlu1 %1268 }
 0x3d3   :  { %v1506_v42 = vpop.xlane.xlu1 %1505 }
 0x3d6   :  { %v4633_v21 = vpop.eup %4632 }
 0x3d7   :  { %v1743_v6 = vpop.xlane.xlu1 %1742  ;;  %v1067_v62 = vmul.f32 %v4633_v21, %v5948_v11  ;;  %v6152_v21 = vpack.c.bf16 %v4484_v59, %v4483_v14 }
 0x3db   :  { %v6128_v22 = vpop.xlane.xlu1 %1979 }
 0x3df   :  { %v6130_v20 = vpop.xlane.xlu1 %2216 }
 0x3e3   :  { %v6141_v31 = vpop.xlane.xlu1 %2453 }
 0x3e8   :  { %v1054_v3 = vpop.xlane.xlu0 %1053 }
 0x3e9   :  { %4634 = vrcp.f32 %v1054_v3  ;;  %v4509_v3 = vunpack.i.h.bf16 %v5702_v45 }
 0x3ea   :  { %4636 = vrcp.f32 %v1269_v13 }
 0x3ec   :  { %v1266_v51 = vpop.xlane.xlu0 %1265 }
 0x3ed   :  { %4638 = vrcp.f32 %v1266_v51  ;;  %v4508_v51 = vunpack.i.l.bf16 %v5702_v45  ;;  %v4488_v45 = vunpack.i.l.bf16 %v5685_v34 }
 0x3ef   :  { %v4338_v33 = vpack.c.bf16 %v4509_v3, %v4508_v51 }
 0x3f0   :  { %v1503_v48 = vpop.xlane.xlu0 %1502 }
 0x3f1   :  { %4640 = vrcp.f32 %v1503_v48 }
 0x3f3   :  { %v4635_v0 = vpop.eup %4634 }
 0x3f4   :  { %v1740_v30 = vpop.xlane.xlu0 %1739  ;;  %v1065_v39 = vmul.f32 %v4635_v0, %v5986_v41  ;;  %v4637_v28 = vpop.eup %4636 }
 0x3f5   :  { %v1279_v11 = vmul.f32 %v4637_v28, %v5952_v23  ;;  %v6154_v28 = vpop.xlane.xlu1 %2690 }
 0x3f6   :  { %3905 = vmatprep.mubr.msk.f32.mxu0 %vm1027_vm5, %v1065_v39  ;;  %v4489_v39 = vunpack.i.h.bf16 %v5685_v34 }
 0x3f7   :  { %v4639_v13 = vpop.eup %4638  ;;  %3906 = vmatmul.mubr.msk.f32.vlgmr.msra.gmra.mrb[28].mxu0 %vm1027_vm5, %v1067_v62 }
 0x3f8   :  { %v1977_v41 = vpop.xlane.xlu0 %1976  ;;  %v1277_v0 = vmul.f32 %v4639_v13, %v5993_v9  ;;  %4329 = vmatpush3.bf16.msra.mxu0 %v5668_v12  ;;  %v6157_v12 = vpack.c.bf16 %v4489_v39, %v4488_v45  ;;  %v4514_v45 = vunpack.i.h.bf16 %v5697_v40 }
 0x3f9   :  { %4331 = vmatprep.subr.bf16.mxu0 %v4330_v35 }
 0x3fa   :  { %3919 = vmatprep.mubr.msk.f32.mxu1 %vm1027_vm5, %v1277_v0 }
 0x3fb   :  { %3920 = vmatmul.mubr.msk.f32.vlgmr.msra.gmra.mrb[26].mxu1 %vm1027_vm5, %v1279_v11  ;;  %v4641_v13 = vpop.eup %4640 }
 0x3fc   :  { %4337 = vmatpush3.bf16.msra.mxu1 %v5671_v19  ;;  %v2214_v32 = vpop.xlane.xlu0 %2213  ;;  %4333 = vmatpush3.bf16.msra.mxu0 %v4330_v35  ;;  %v1514_v39 = vmul.f32 %v4641_v13, %v5998_v29  ;;  %v4519_v13 = vunpack.i.h.bf16 %v5704_v46 }
 0x3fd   :  { %4339 = vmatprep.subr.bf16.mxu1 %v4338_v33  ;;  %4343 = vmatprep.subr.bf16.mxu0 %v6152_v21 }
 0x400   :  { %4341 = vmatpush3.bf16.msra.mxu1 %v4338_v33  ;;  %v6159_v23 = vpop.xlane.xlu0 %2450 }
 0x401   :  { %4351 = vmatprep.subr.bf16.mxu1 %v6157_v12 }
 0x402   :  { %v1063_v34 = vpop.xlane.xlu1 %1062 }
 0x403   :  { %4642 = vrcp.f32 %v1063_v34 }
 0x404   :  { %v6162_v9 = vpop.xlane.xlu0 %2687 }
 0x407   :  { %v1275_v19 = vpop.xlane.xlu1 %1274 }
 0x408   :  { %v1060_v59 = vpop.xlane.xlu0 %1059 }
 0x409   :  { %4644 = vrcp.f32 %v1060_v59 }
 0x40a   :  { %4646 = vrcp.f32 %v1506_v42 }
 0x40b   :  { %4648 = vrcp.f32 %v1740_v30 }
 0x40c   :  { %v1512_v14 = vpop.xlane.xlu1 %1511  ;;  %v1272_v24 = vpop.xlane.xlu0 %1271  ;;  %4650 = vrcp.f32 %v1275_v19 }
 0x40d   :  { %4652 = vrcp.f32 %v1272_v24  ;;  %v4643_v51 = vpop.eup %4642 }
 0x40e   :  { %4654 = vrcp.f32 %v1743_v6  ;;  %v1071_v0 = vmul.f32 %v4643_v51, %v6028_v5 }
 0x40f   :  { %4656 = vrcp.f32 %v1512_v14  ;;  %v4493_v14 = vunpack.i.l.bf16 %v5666_v8 }
 0x410   :  { %v1509_v62 = vpop.xlane.xlu0 %1508 }
 0x411   :  { %4658 = vrcp.f32 %v1509_v62  ;;  %v1749_v3 = vpop.xlane.xlu1 %1748 }
 0x412   :  { %4660 = vrcp.f32 %v1977_v41 }
 0x413   :  { %v4645_v35 = vpop.eup %4644  ;;  %4662 = vrcp.f32 %v6128_v22  ;;  %v4513_v22 = vunpack.i.l.bf16 %v5697_v40  ;;  %v4494_v40 = vunpack.i.h.bf16 %v5666_v8 }
 0x414   :  { %4664 = vrcp.f32 %v1749_v3  ;;  %v1746_v48 = vpop.xlane.xlu0 %1745  ;;  %v1069_v42 = vmul.f32 %v4645_v35, %v6035_v49  ;;  %v4647_v30 = vpop.eup %4646 }
 0x415   :  { %4666 = vrcp.f32 %v1746_v48  ;;  %v4649_v11 = vpop.eup %4648  ;;  %v1516_v5 = vmul.f32 %v4647_v30, %v5957_v37  ;;  %v4554_v30 = vunpack.i.l.bf16 %v6126_v52 }
 0x416   :  { %4668 = vrcp.f32 %v2214_v32  ;;  %3908 = vmatprep.mubr.msk.f32.mxu0 %vm1027_vm5, %v1069_v42  ;;  %v4651_v41 = vpop.eup %4650  ;;  %v1751_v37 = vmul.f32 %v4649_v11, %v6003_v16 }
 0x417   :  { %v6167_v6 = vpop.xlane.xlu1 %1985  ;;  %3909 = vmatmul.mubr.msk.f32.gmra.mrb[30].mxu0 %vm1027_vm5, %v1071_v0  ;;  %v4653_v49 = vpop.eup %4652  ;;  %4670 = vrcp.f32 %v6130_v20  ;;  %v1283_v19 = vmul.f32 %v4651_v41, %v6037_v26  ;;  %v4346_v20 = vpack.c.bf16 %v4514_v45, %v4513_v22 }
 0x418   :  { %3933 = vmatprep.mubr.msk.f32.mxu0 %vm1027_vm5, %v1514_v39  ;;  %v4655_v33 = vpop.eup %4654  ;;  %v1281_v34 = vmul.f32 %v4653_v49, %v6044_v44  ;;  %v4518_v44 = vunpack.i.l.bf16 %v5704_v46  ;;  %4672 = vrcp.f32 %v6141_v31 }
 0x419   :  { %v4657_v29 = vpop.eup %4656  ;;  %v1753_v35 = vmul.f32 %v4655_v33, %v5962_v2  ;;  %4674 = vrcp.f32 %v6159_v23 }
 0x41a   :  { %v6177_v32 = vpop.xlane.xlu0 %2456  ;;  %3922 = vmatprep.mubr.msk.f32.mxu1 %vm1027_vm5, %v1281_v34  ;;  %v1520_v51 = vmul.f32 %v4657_v29, %v6047_v54  ;;  %v4354_v0 = vpack.c.bf16 %v4519_v13, %v4518_v44  ;;  %4676 = vrcp.f32 %v6167_v6 }
 0x41b   :  { %v4659_v59 = vpop.eup %4658  ;;  %v2223_v24 = vpop.xlane.xlu1 %2222  ;;  %3934 = vmatmul.mubr.msk.f32.vlgmr.msra.gmra.mrb[32].mxu0 %vm1027_vm5, %v1516_v5  ;;  %3923 = vmatmul.mubr.msk.f32.gmra.mrb[28].mxu1 %vm1027_vm5, %v1283_v19 }
 0x41c   :  { %v4661_v62 = vpop.eup %4660  ;;  %4345 = vmatpush3.bf16.msra.mxu0 %v6152_v21  ;;  %v1518_v26 = vmul.f32 %v4659_v59, %v6054_v61  ;;  %3947 = vmatprep.mubr.msk.f32.mxu1 %vm1027_vm5, %v1751_v37  ;;  %v4358_v21 = vpack.c.bf16 %v4494_v40, %v4493_v14  ;;  %v4555_v61 = vunpack.i.h.bf16 %v6126_v52 }
 0x41d   :  { %v4663_v8 = vpop.eup %4662  ;;  %4347 = vmatprep.subr.bf16.mxu0 %v4346_v20  ;;  %v1988_v46 = vmul.f32 %v4661_v62, %v6009_v56 }
 0x41e   :  { %v2694_v3 = vpop.xlane.xlu0 %2693  ;;  %v4665_v16 = vpop.eup %4664  ;;  %3936 = vmatprep.mubr.msk.f32.mxu0 %vm1027_vm5, %v1518_v26  ;;  %v1990_v11 = vmul.f32 %v4663_v8, %v5968_v7  ;;  %v4366_v45 = vpack.c.bf16 %v4555_v61, %v4554_v30 }
 0x41f   :  { %v4667_v48 = vpop.eup %4666  ;;  %3937 = vmatmul.mubr.msk.f32.gmra.mrb[34].mxu0 %vm1027_vm5, %v1520_v51  ;;  %3948 = vmatmul.mubr.msk.f32.vlgmr.msra.gmra.mrb[30].mxu1 %vm1027_vm5, %v1753_v35  ;;  %v1757_v39 = vmul.f32 %v4665_v16, %v6057_v47 }
 0x420   :  { %v4669_v42 = vpop.eup %4668  ;;  %4349 = vmatpush3.bf16.msra.mxu0 %v4346_v20  ;;  %v2460_v54 = vpop.xlane.xlu1 %2459  ;;  %v1755_v2 = vmul.f32 %v4667_v48, %v6061_v58  ;;  %4353 = vmatpush3.bf16.msra.mxu1 %v6157_v12 }
 0x421   :  { %3961 = vmatprep.mubr.msk.f32.mxu0 %vm1027_vm5, %v1988_v46  ;;  %4355 = vmatprep.subr.bf16.mxu1 %v4354_v0  ;;  %v4671_v41 = vpop.eup %4670  ;;  %v2225_v52 = vmul.f32 %v4669_v42, %v6015_v25 }
 0x422   :  { %v4563_v56 = vpop.permute.xlu0 %4562  ;;  %4359 = vmatprep.subr.bf16.mxu0 %v4358_v21  ;;  %3950 = vmatprep.mubr.msk.f32.mxu1 %vm1027_vm5, %v1755_v2  ;;  %v2227_v12 = vmul.f32 %v4671_v41, %v5974_v15  ;;  %v4673_v31 = vpop.eup %4672 }
 0x423   :  { %3962 = vmatmul.mubr.msk.f32.vlgmr.msra.gmra.mrb[36].mxu0 %vm1027_vm5, %v1990_v11  ;;  %v4565_v58 = vunpack.i.h.bf16 %v4563_v56  ;;  %v4564_v22 = vunpack.i.l.bf16 %v4563_v56  ;;  %3951 = vmatmul.mubr.msk.f32.gmra.mrb[32].mxu1 %vm1027_vm5, %v1757_v39  ;;  %v4675_v49 = vpop.eup %4674 }
 0x424   :  { %4361 = vmatpush3.bf16.msra.mxu0 %v4358_v21  ;;  %4357 = vmatpush3.bf16.msra.mxu1 %v4354_v0  ;;  %v4677_v5 = vpop.eup %4676 }
 0x425   :  { %3975 = vmatprep.mubr.msk.f32.mxu1 %vm1027_vm5, %v2225_v52  ;;  %v2697_v7 = vpop.xlane.xlu1 %2696  ;;  %4367 = vmatprep.subr.bf16.mxu1 %v4366_v45  ;;  %v4370_v47 = vpack.c.bf16 %v4565_v58, %v4564_v22  ;;  %v1994_v59 = vmul.f32 %v4677_v5, %v6069_v63 }
 0x427   :  { %3976 = vmatmul.mubr.msk.f32.vlgmr.msra.gmra.mrb[34].mxu1 %vm1027_vm5, %v2227_v12  ;;  %v1534_v12 = vpop.permute.xlu0 %1533 }
 0x428   :  { %4369 = vmatpush3.bf16.msra.mxu1 %v4366_v45 }
 0x429   :  { %v1983_v25 = vpop.xlane.xlu1 %1982  ;;  %4371 = vmatprep.subr.bf16.mxu1 %v4370_v47 }
 0x42a   :  { %4678 = vrcp.f32 %v1983_v25 }
 0x42b   :  { %4680 = vrcp.f32 %v6162_v9 }
 0x42c   :  { %4682 = vrcp.f32 %v6177_v32  ;;  %4373 = vmatpush3.bf16.msra.mxu1 %v4370_v47 }
 0x42d   :  { %4684 = vrcp.f32 %v2223_v24  ;;  %v2220_v15 = vpop.xlane.xlu1 %2219 }
 0x42e   :  { %4686 = vrcp.f32 %v2220_v15 }
 0x42f   :  { %4688 = vrcp.f32 %v6154_v28  ;;  %v2462_v28 = vmul.f32 %v4675_v49, %v6020_v60 }
 0x430   :  { %4690 = vrcp.f32 %v2460_v54 }
 0x431   :  { %v4558_v23 = vpop.permute.xlu1 %4557  ;;  %4692 = vrcp.f32 %v2694_v3 }
 0x432   :  { %v4560_v6 = vunpack.i.h.bf16 %v4558_v23  ;;  %v4559_v33 = vunpack.i.l.bf16 %v4558_v23  ;;  %4694 = vrcp.f32 %v2697_v7 }
 0x434   :  { %v4679_v34 = vpop.eup %4678  ;;  %v4362_v29 = vpack.c.bf16 %v4560_v6, %v4559_v33 }
 0x435   :  { %v4681_v19 = vpop.eup %4680  ;;  %v1992_v9 = vmul.f32 %v4679_v34, %v6095_v55  ;;  %v2464_v55 = vmul.f32 %v4673_v31, %v5979_v57 }
 0x436   :  { %v4683_v32 = vpop.eup %4682  ;;  %4363 = vmatprep.subr.bf16.mxu0 %v4362_v29  ;;  %v2699_v13 = vmul.f32 %v4681_v19, %v6024_v53 }
 0x437   :  { %v4685_v40 = vpop.eup %4684  ;;  %3964 = vmatprep.mubr.msk.f32.mxu0 %vm1027_vm5, %v1992_v9  ;;  %4365 = vmatpush3.bf16.msra.mxu0 %v4362_v29  ;;  %v2466_v63 = vmul.f32 %v4683_v32, %v6074_v50 }
 0x438   :  { %v4687_v14 = vpop.eup %4686  ;;  %3965 = vmatmul.mubr.msk.f32.gmra.mrb[38].mxu0 %vm1027_vm5, %v1994_v59  ;;  %v2231_v20 = vmul.f32 %v4685_v40, %v6079_v18 }
 0x439   :  { %3989 = vmatprep.mubr.msk.f32.mxu0 %vm1027_vm5, %v2462_v28  ;;  %v2229_v24 = vmul.f32 %v4687_v14, %v6099_v4  ;;  %v4689_v37 = vpop.eup %4688 }
 0x43a   :  { %v4691_v62 = vpop.eup %4690  ;;  %v2701_v57 = vmul.f32 %v4689_v37, %v5984_v17  ;;  %v1297_v17 = vpop.permute.xlu1 %1296 }
 0x43b   :  { %3978 = vmatprep.mubr.msk.f32.mxu1 %vm1027_vm5, %v2229_v24  ;;  %v4693_v60 = vpop.eup %4692  ;;  %v2468_v18 = vmul.f32 %v4691_v62, %v6087_v43 }
 0x43c   :  { %3979 = vmatmul.mubr.msk.f32.gmra.mrb[36].mxu1 %vm1027_vm5, %v2231_v20  ;;  %3990 = vmatmul.mubr.msk.f32.vlgmr.msra.gmra.mrb[40].mxu0 %vm1027_vm5, %v2464_v55  ;;  %v4695_v4 = vpop.eup %4694  ;;  %v2703_v44 = vmul.f32 %v4693_v60, %v6083_v27 }
 0x43d   :  { %3992 = vmatprep.mubr.msk.f32.mxu0 %vm1027_vm5, %v2466_v63  ;;  %4003 = vmatprep.mubr.msk.f32.mxu1 %vm1027_vm5, %v2699_v13  ;;  %v2705_v53 = vmul.f32 %v4695_v4, %v6091_v36 }
 0x43e   :  { %v1771_v29 = vpop.permute.xlu1 %1770 }
 0x440   :  { %3993 = vmatmul.mubr.msk.f32.gmra.mrb[42].mxu0 %vm1027_vm5, %v2468_v18  ;;  %4004 = vmatmul.mubr.msk.f32.vlgmr.msra.gmra.mrb[38].mxu1 %vm1027_vm5, %v2701_v57 }
 0x441   :  { %4006 = vmatprep.mubr.msk.f32.mxu1 %vm1027_vm5, %v2703_v44 }
 0x444   :  { %4007 = vmatmul.mubr.msk.f32.gmra.mrb[40].mxu1 %vm1027_vm5, %v2705_v53 }
 0x4ca   :  { %v3907_v50 = vpop.f32.mrb[28].mxu0 }
 0x4cb   :  { %v1162_v26 = vadd.f32 %v3907_v50, %v6110_v1  ;;  %v1156_v8 = vpop.f32.mrb[29].mxu0  ;;  %v6279_v50 = vpop.permute.xlu0 %2007 }
 0x4cc   :  { %v1157_v43 = vadd.f32 %v6110_v1, %v1156_v8 }
 0x4cd   :  { %v1181_v3 = vmul.f32 1.442695, %v1162_v26  ;;  %vm1176_vm11 = vcmp.gt.f32.partialorder %v1162_v26, 0.0 }
 0x4ce   :  { %v3921_v51 = vpop.f32.mrb[26].mxu1  ;;  %v1179_v27 = vmul.f32 1.442695, %v1157_v43  ;;  %vm1175_vm12 = vcmp.gt.f32.partialorder %v1157_v43, 0.0 }
 0x4cf   :  { %v1383_v16 = vadd.f32 %v3921_v51, %v1297_v17  ;;  %v1377_v35 = vpop.f32.mrb[27].mxu1  ;;  %4696 = vpow2.f32 %v1181_v3  ;;  %v6283_v51 = vpop.permute.xlu1 %2244 }
 0x4d0   :  { %v1378_v48 = vadd.f32 %v1377_v35, %v1297_v17  ;;  %4698 = vpow2.f32 %v1179_v27 }
 0x4d1   :  { %v1402_v46 = vmul.f32 1.442695, %v1383_v16  ;;  %vm1397_vm13 = vcmp.gt.f32.partialorder %v1383_v16, 0.0 }
 0x4d2   :  { %v1400_v21 = vmul.f32 1.442695, %v1378_v48  ;;  %vm1396_vm14 = vcmp.gt.f32.partialorder %v1378_v48, 0.0 }
 0x4d3   :  { %4700 = vpow2.f32 %v1402_v46 }
 0x4d4   :  { %4702 = vpow2.f32 %v1400_v21 }
 0x4d9   :  { %v4697_v36 = vpop.eup %4696 }
 0x4da   :  { %v4699_v42 = vpop.eup %4698  ;;  %v3406_v61 = vadd.f32 -1.0, %v4697_v36 }
 0x4db   :  { %v3405_v30 = vadd.f32 -1.0, %v4699_v42 }
 0x4dc   :  { %v1192_v0 = vsel %vm1176_vm11, %v1162_v26, %v3406_v61 }
 0x4dd   :  { %v4701_v54 = vpop.eup %4700  ;;  %1197 = vst.msk [vmem:[#allocation2 + $0x8] sm:$0xff] %vm1195_vm10, %v1192_v0  ;;  %v1191_v56 = vsel %vm1175_vm12, %v1157_v43, %v3405_v30 }
 0x4de   :  { %v4703_v2 = vpop.eup %4702  ;;  %v3414_v11 = vadd.f32 -1.0, %v4701_v54  ;;  %1196 = vst.msk [vmem:[#allocation2] sm:$0xff] %vm1195_vm10, %v1191_v56 }
 0x4df   :  { %v3413_v39 = vadd.f32 -1.0, %v4703_v2 }
 0x4e0   :  { %v1413_v41 = vsel %vm1397_vm13, %v1383_v16, %v3414_v11 }
 0x4e1   :  { %1422 = vrot.lane.b32.xlu1 %v1413_v41, %s4810_s5  ;;  %v1412_v52 = vsel %vm1396_vm14, %v1378_v48, %v3413_v39 }
 0x4e2   :  { %1420 = vrot.lane.b32.xlu0 %v1412_v52, %s4810_s5 }
 0x4ea   :  { %v3910_v45 = vpop.f32.mrb[30].mxu0 }
 0x4eb   :  { %v1172_v58 = vadd.f32 %v3910_v45, %v6110_v1  ;;  %v1166_v22 = vpop.f32.mrb[31].mxu0 }
 0x4ec   :  { %v6250_v7 = vadd.f32 %v6110_v1, %v1166_v22 }
 0x4ed   :  { %v1185_v47 = vmul.f32 1.442695, %v1172_v58  ;;  %vm1178_vm15 = vcmp.gt.f32.partialorder %v1172_v58, 0.0 }
 0x4ee   :  { %v1183_v25 = vmul.f32 1.442695, %v6250_v7  ;;  %v3935_v15 = vpop.f32.mrb[32].mxu0  ;;  %v3924_v31 = vpop.f32.mrb[28].mxu1  ;;  %vm1177_vm2 = vcmp.gt.f32.partialorder %v6250_v7, 0.0 }
 0x4ef   :  { %4704 = vpow2.f32 %v1185_v47  ;;  %v6253_v23 = vadd.f32 %v3935_v15, %v1534_v12  ;;  %v1614_v49 = vpop.f32.mrb[33].mxu0  ;;  %v6255_v6 = vadd.f32 %v3924_v31, %v1297_v17  ;;  %v1387_v33 = vpop.f32.mrb[29].mxu1 }
 0x4f0   :  { %4706 = vpow2.f32 %v1183_v25  ;;  %v6257_v5 = vadd.f32 %v1614_v49, %v1534_v12  ;;  %v6260_v1 = vadd.f32 %v1387_v33, %v1297_v17 }
 0x4f1   :  { %v1639_v34 = vmul.f32 1.442695, %v6253_v23  ;;  %v1406_v19 = vmul.f32 1.442695, %v6255_v6  ;;  %vm1399_vm3 = vcmp.gt.f32.partialorder %v6255_v6, 0.0  ;;  %vm1634_vm7 = vcmp.gt.f32.partialorder %v6253_v23, 0.0 }
 0x4f2   :  { %v1637_v9 = vmul.f32 1.442695, %v6257_v5  ;;  %v1404_v32 = vmul.f32 1.442695, %v6260_v1  ;;  %v3938_v59 = vpop.f32.mrb[34].mxu0  ;;  %v3949_v40 = vpop.f32.mrb[30].mxu1 }
 0x4f3   :  { %4708 = vpow2.f32 %v1639_v34  ;;  %v6265_v28 = vadd.f32 %v3938_v59, %v1534_v12  ;;  %v6267_v14 = vadd.f32 %v3949_v40, %v1771_v29  ;;  %v1624_v24 = vpop.f32.mrb[35].mxu0  ;;  %v1851_v37 = vpop.f32.mrb[31].mxu1  ;;  %vm1398_vm4 = vcmp.gt.f32.partialorder %v6260_v1, 0.0 }
 0x4f4   :  { %4710 = vpow2.f32 %v1406_v19  ;;  %v6269_v55 = vadd.f32 %v1624_v24, %v1534_v12  ;;  %v6271_v20 = vadd.f32 %v1851_v37, %v1771_v29  ;;  %vm1633_vm6 = vcmp.gt.f32.partialorder %v6257_v5, 0.0 }
 0x4f5   :  { %4712 = vpow2.f32 %v1404_v32  ;;  %v1876_v63 = vmul.f32 1.442695, %v6267_v14  ;;  %v1643_v13 = vmul.f32 1.442695, %v6265_v28  ;;  %vm1871_vm9 = vcmp.gt.f32.partialorder %v6267_v14, 0.0 }
 0x4f6   :  { %4714 = vpow2.f32 %v1637_v9  ;;  %v3963_v62 = vpop.f32.mrb[36].mxu0  ;;  %v1874_v60 = vmul.f32 1.442695, %v6271_v20  ;;  %v3952_v57 = vpop.f32.mrb[32].mxu1  ;;  %v1641_v44 = vmul.f32 1.442695, %v6269_v55 }
 0x4f7   :  { %v2088_v18 = vpop.f32.mrb[37].mxu0  ;;  %4716 = vpow2.f32 %v1876_v63  ;;  %v6277_v53 = vadd.f32 %v3952_v57, %v1771_v29  ;;  %v1861_v26 = vpop.f32.mrb[33].mxu1  ;;  %v6287_v35 = vadd.f32 %v3963_v62, %v6279_v50  ;;  %vm1870_vm8 = vcmp.gt.f32.partialorder %v6271_v20, 0.0 }
 0x4f8   :  { %v6281_v43 = vadd.f32 %v1861_v26, %v1771_v29  ;;  %4718 = vpow2.f32 %v1874_v60  ;;  %vm1635_vm11 = vcmp.gt.f32.partialorder %v6269_v55, 0.0  ;;  %v2482_v60 = vpop.permute.xlu0 %2481 }
 0x4f9   :  { %v4705_v4 = vpop.eup %4704  ;;  %4720 = vpow2.f32 %v1643_v13  ;;  %v1880_v16 = vmul.f32 1.442695, %v6277_v53  ;;  %v2113_v56 = vmul.f32 1.442695, %v6287_v35  ;;  %vm1873_vm12 = vcmp.gt.f32.partialorder %v6277_v53, 0.0 }
 0x4fa   :  { %v4707_v8 = vpop.eup %4706  ;;  %v3408_v17 = vadd.f32 -1.0, %v4705_v4  ;;  %v3977_v27 = vpop.f32.mrb[34].mxu1  ;;  %4722 = vpow2.f32 %v1641_v44  ;;  %v1878_v46 = vmul.f32 1.442695, %v6281_v43  ;;  %vm1872_vm13 = vcmp.gt.f32.partialorder %v6281_v43, 0.0 }
 0x4fb   :  { %v3407_v3 = vadd.f32 -1.0, %v4707_v8  ;;  %v2325_v21 = vpop.f32.mrb[35].mxu1  ;;  %v6298_v0 = vadd.f32 %v3977_v27, %v6283_v51  ;;  %4724 = vpow2.f32 %v1880_v16  ;;  %vm2108_vm14 = vcmp.gt.f32.partialorder %v6287_v35, 0.0 }
 0x4fc   :  { %v1194_v36 = vsel %vm1178_vm15, %v1172_v58, %v3408_v17  ;;  %v6292_v61 = vadd.f32 %v2325_v21, %v6283_v51  ;;  %4726 = vpow2.f32 %v1878_v46  ;;  %v6306_v58 = vadd.f32 %v2088_v18, %v6279_v50  ;;  %v2719_v21 = vpop.permute.xlu1 %2718 }
 0x4fd   :  { %v4709_v48 = vpop.eup %4708  ;;  %1199 = vst.msk [vmem:[#allocation2 + $0x18] sm:$0xff] %vm1195_vm10, %v1194_v36  ;;  %v1193_v30 = vsel %vm1177_vm2, %v6250_v7, %v3407_v3  ;;  %v2350_v47 = vmul.f32 1.442695, %v6298_v0  ;;  %4728 = vpow2.f32 %v2113_v56  ;;  %vm2345_vm2 = vcmp.gt.f32.partialorder %v6298_v0, 0.0 }
 0x4fe   :  { %v4711_v42 = vpop.eup %4710  ;;  %1198 = vst.msk [vmem:[#allocation2 + $0x10] sm:$0xff] %vm1195_vm10, %v1193_v30  ;;  %v2348_v41 = vmul.f32 1.442695, %v6292_v61  ;;  %v3422_v7 = vadd.f32 -1.0, %v4709_v48  ;;  %v2111_v49 = vmul.f32 1.442695, %v6306_v58 }
 0x4ff   :  { %v4713_v54 = vpop.eup %4712  ;;  %v3416_v2 = vadd.f32 -1.0, %v4711_v42  ;;  %vm1636_vm10 = vcmp.gt.f32.partialorder %v6265_v28, 0.0  ;;  %vm2344_vm15 = vcmp.gt.f32.partialorder %v6292_v61, 0.0 }
 0x500   :  { %v4715_v11 = vpop.eup %4714  ;;  %v3415_v39 = vadd.f32 -1.0, %v4713_v54  ;;  %4730 = vpow2.f32 %v2348_v41 }
 0x501   :  { %v1415_v52 = vsel %vm1399_vm3, %v6255_v6, %v3416_v2  ;;  %v3421_v45 = vadd.f32 -1.0, %v4715_v11  ;;  %v4717_v12 = vpop.eup %4716  ;;  %v1650_v6 = vsel %vm1634_vm7, %v6253_v23, %v3422_v7  ;;  %4732 = vpow2.f32 %v2350_v47 }
 0x502   :  { %1426 = vrot.lane.b32.xlu0 %v1415_v52, %s4810_s5  ;;  %v1414_v22 = vsel %vm1398_vm4, %v6260_v1, %v3415_v39  ;;  %v4719_v25 = vpop.eup %4718  ;;  %v3430_v34 = vadd.f32 -1.0, %v4717_v12  ;;  %4734 = vpow2.f32 %v2111_v49  ;;  %vm2107_vm3 = vcmp.gt.f32.partialorder %v6306_v58, 0.0 }
 0x503   :  { %1424 = vrot.lane.b32.xlu1 %v1414_v22, %s4810_s5  ;;  %v1649_v15 = vsel %vm1633_vm6, %v6257_v5, %v3421_v45  ;;  %v4721_v31 = vpop.eup %4720  ;;  %v3429_v33 = vadd.f32 -1.0, %v4719_v25 }
 0x504   :  { %v4723_v1 = vpop.eup %4722  ;;  %v3424_v29 = vadd.f32 -1.0, %v4721_v31  ;;  %v1887_v23 = vsel %vm1871_vm9, %v6267_v14, %v3430_v34 }
 0x505   :  { %v1886_v5 = vsel %vm1870_vm8, %v6271_v20, %v3429_v33  ;;  %v4725_v19 = vpop.eup %4724  ;;  %v3423_v9 = vadd.f32 -1.0, %v4723_v1 }
 0x506   :  { %1657 = vrot.lane.b32.xlu0 %v1649_v15, %s4811_s15  ;;  %v4727_v32 = vpop.eup %4726  ;;  %v1652_v20 = vsel %vm1636_vm10, %v6265_v28, %v3424_v29  ;;  %v3432_v62 = vadd.f32 -1.0, %v4725_v19 }
 0x507   :  { %1659 = vrot.lane.b32.xlu1 %v1650_v6, %s4811_s15  ;;  %v4729_v14 = vpop.eup %4728  ;;  %v1651_v13 = vsel %vm1635_vm11, %v6269_v55, %v3423_v9  ;;  %v3431_v57 = vadd.f32 -1.0, %v4727_v32  ;;  %v2863_v32 = vld [vmem:[%s6544_s6] sm:$0xff] }
 0x508   :  { %v1889_v27 = vsel %vm1873_vm12, %v6277_v53, %v3432_v62  ;;  %v3438_v16 = vadd.f32 -1.0, %v4729_v14 }
 0x509   :  { %v1888_v46 = vsel %vm1872_vm13, %v6281_v43, %v3431_v57  ;;  %v2865_v57 = vld [vmem:[%s6544_s6 + $0x10] sm:$0xff] }
 0x50a   :  { %1894 = vrot.lane.b32.xlu0 %v1886_v5, %s4812_s16  ;;  %v4731_v18 = vpop.eup %4730  ;;  %v2124_v41 = vsel %vm2108_vm14, %v6287_v35, %v3438_v16 }
 0x50b   :  { %1896 = vrot.lane.b32.xlu1 %v1887_v23, %s4812_s16  ;;  %v3966_v59 = vpop.f32.mrb[38].mxu0  ;;  %v4733_v55 = vpop.eup %4732  ;;  %v3445_v36 = vadd.f32 -1.0, %v4731_v18  ;;  %v2866_v18 = vld [vmem:[%s6544_s6 + $0x18] sm:$0xff] }
 0x50c   :  { %v6327_v40 = vadd.f32 %v3966_v59, %v6279_v50  ;;  %v2098_v24 = vpop.f32.mrb[39].mxu0  ;;  %v3446_v2 = vadd.f32 -1.0, %v4733_v55  ;;  %v2864_v59 = vld [vmem:[%s6544_s6 + $0x8] sm:$0xff] }
 0x50d   :  { %v6331_v37 = vadd.f32 %v2098_v24, %v6279_v50  ;;  %v2360_v45 = vsel %vm2344_vm15, %v6292_v61, %v3445_v36  ;;  %v2868_v55 = vld [vmem:[%s6544_s6 + $0x28] sm:$0xff] }
 0x50e   :  { %v2117_v63 = vmul.f32 1.442695, %v6327_v40  ;;  %1663 = vrot.lane.b32.xlu0 %v1652_v20, %s4811_s15  ;;  %v2361_v61 = vsel %vm2345_vm2, %v6298_v0, %v3446_v2  ;;  %vm2110_vm4 = vcmp.gt.f32.partialorder %v6327_v40, 0.0  ;;  %v4374_v20 = vpack.c.bf16 %v2864_v59, %v2863_v32  ;;  %v2980_v32 = vld [vmem:[%s6545_s7 + $0x60] sm:$0xff]  ;;  %v2981_v59 = vld [vmem:[%s6545_s7 + $0x68] sm:$0xff] }
 0x50f   :  { %v2115_v4 = vmul.f32 1.442695, %v6331_v37  ;;  %1661 = vrot.lane.b32.xlu1 %v1651_v13, %s4811_s15  ;;  %v3980_v44 = vpop.f32.mrb[36].mxu1  ;;  %v3991_v50 = vpop.f32.mrb[40].mxu0  ;;  %vm2109_vm8 = vcmp.gt.f32.partialorder %v6331_v37, 0.0 }
 0x510   :  { %4736 = vpow2.f32 %v2117_v63  ;;  %v6342_v28 = vadd.f32 %v3980_v44, %v6283_v51  ;;  %v2335_v26 = vpop.f32.mrb[37].mxu1  ;;  %v2562_v8 = vpop.f32.mrb[41].mxu0  ;;  %v6358_v11 = vadd.f32 %v3991_v50, %v2482_v60  ;;  %4375 = vmatprep.subr.bf16.mxu0 %v4374_v20 }
 0x511   :  { %v6345_v17 = vadd.f32 %v2335_v26, %v6283_v51  ;;  %v6347_v3 = vadd.f32 %v2562_v8, %v2482_v60  ;;  %4738 = vpow2.f32 %v2115_v4  ;;  %v4735_v51 = vpop.eup %4734  ;;  %4377 = vmatpush3.bf16.msra.mxu0 %v4374_v20  ;;  %v4378_v4 = vpack.c.bf16 %v2866_v18, %v2865_v57  ;;  %v2867_v8 = vld [vmem:[%s6544_s6 + $0x20] sm:$0xff]  ;;  %v2983_v20 = vld [vmem:[%s6545_s7 + $0x78] sm:$0xff] }
 0x512   :  { %v2354_v48 = vmul.f32 1.442695, %v6342_v28  ;;  %1900 = vrot.lane.b32.xlu0 %v1889_v27, %s4812_s16  ;;  %v3437_v7 = vadd.f32 -1.0, %v4735_v51  ;;  %v2587_v47 = vmul.f32 1.442695, %v6358_v11  ;;  %vm2347_vm6 = vcmp.gt.f32.partialorder %v6342_v28, 0.0 }
 0x513   :  { %v2352_v42 = vmul.f32 1.442695, %v6345_v17  ;;  %1898 = vrot.lane.b32.xlu1 %v1888_v46, %s4812_s16  ;;  %v2585_v53 = vmul.f32 1.442695, %v6347_v3  ;;  %v3994_v30 = vpop.f32.mrb[42].mxu0  ;;  %v4005_v54 = vpop.f32.mrb[38].mxu1  ;;  %4379 = vmatprep.subr.bf16.mxu0 %v4378_v4  ;;  %v4382_v27 = vpack.c.bf16 %v2868_v55, %v2867_v8 }
 0x514   :  { %4740 = vpow2.f32 %v2354_v48  ;;  %v6360_v43 = vadd.f32 %v4005_v54, %v2719_v21  ;;  %v2572_v56 = vpop.f32.mrb[43].mxu0  ;;  %v2799_v39 = vpop.f32.mrb[39].mxu1  ;;  %v6370_v12 = vadd.f32 %v3994_v30, %v2482_v60  ;;  %v2123_v6 = vsel %vm2107_vm3, %v6306_v58, %v3437_v7  ;;  %v2870_v51 = vld [vmem:[%s6544_s6 + $0x38] sm:$0xff] }
 0x515   :  { %4742 = vpow2.f32 %v2352_v42  ;;  %v6363_v52 = vadd.f32 %v2799_v39, %v2719_v21  ;;  %v6374_v25 = vadd.f32 %v2572_v56, %v2482_v60  ;;  %vm2346_vm7 = vcmp.gt.f32.partialorder %v6345_v17, 0.0  ;;  %4381 = vmatpush3.bf16.msra.mxu0 %v4378_v4  ;;  %v2869_v42 = vld [vmem:[%s6544_s6 + $0x30] sm:$0xff] }
 0x516   :  { %2133 = vrot.lane.b32.xlu0 %v2124_v41, %s4813_s17  ;;  %v2824_v22 = vmul.f32 1.442695, %v6360_v43  ;;  %4744 = vpow2.f32 %v2585_v53  ;;  %v2591_v34 = vmul.f32 1.442695, %v6370_v12  ;;  %vm2581_vm9 = vcmp.gt.f32.partialorder %v6347_v3, 0.0  ;;  %4383 = vmatprep.subr.bf16.mxu0 %v4382_v27 }
 0x517   :  { %2368 = vrot.lane.b32.xlu1 %v2360_v45, %s4814_s18  ;;  %v2822_v35 = vmul.f32 1.442695, %v6363_v52  ;;  %v4008_v15 = vpop.f32.mrb[40].mxu1  ;;  %v2589_v0 = vmul.f32 1.442695, %v6374_v25  ;;  %vm2582_vm10 = vcmp.gt.f32.partialorder %v6358_v11, 0.0 }
 0x518   :  { %v2809_v49 = vpop.f32.mrb[41].mxu1  ;;  %4746 = vpow2.f32 %v2824_v22  ;;  %v6382_v1 = vadd.f32 %v4008_v15, %v2719_v21  ;;  %vm2818_vm11 = vcmp.gt.f32.partialorder %v6363_v52, 0.0  ;;  %vm2819_vm12 = vcmp.gt.f32.partialorder %v6360_v43, 0.0  ;;  %v2971_v15 = vld [vmem:[%s6545_s7 + $0x18] sm:$0xff] }
 0x519   :  { %4748 = vpow2.f32 %v2822_v35  ;;  %v6385_v29 = vadd.f32 %v2809_v49, %v2719_v21  ;;  %4385 = vmatpush3.bf16.msra.mxu0 %v4382_v27  ;;  %vm2584_vm13 = vcmp.gt.f32.partialorder %v6370_v12, 0.0  ;;  %v6562_v41 = vmov 0.0|0.0   ;;  %v2969_v35 = vld [vmem:[%s6545_s7 + $0x8] sm:$0xff]  ;;  %v2972_v49 = vld [vmem:[%s6545_s7 + $0x20] sm:$0xff] }
 0x51a   :  { %v4737_v31 = vpop.eup %4736  ;;  %2370 = vrot.lane.b32.xlu0 %v2361_v61, %s4814_s18  ;;  %4750 = vpow2.f32 %v2587_v47  ;;  %vm2583_vm14 = vcmp.gt.f32.partialorder %v6374_v25, 0.0  ;;  %vm2821_vm15 = vcmp.gt.f32.partialorder %v6382_v1, 0.0  ;;  %vm1432_vm3 = vcmask 130112  }
 0x51b   :  { %v3440_v33 = vadd.f32 -1.0, %v4737_v31  ;;  %v4739_v5 = vpop.eup %4738  ;;  %4752 = vpow2.f32 %v2591_v34  ;;  %v2826_v62 = vmul.f32 1.442695, %v6385_v29  ;;  %vm2820_vm2 = vcmp.gt.f32.partialorder %v6385_v29, 0.0  ;;  %v2974_v34 = vld [vmem:[%s6545_s7 + $0x30] sm:$0xff] }
 0x51c   :  { %4754 = vpow2.f32 %v2589_v0  ;;  %v3439_v63 = vadd.f32 -1.0, %v4739_v5  ;;  %v2976_v0 = vld [vmem:[%s6545_s7 + $0x40] sm:$0xff] }
 0x51d   :  { %v2126_v19 = vsel %vm2110_vm4, %v6327_v40, %v3440_v33  ;;  %v2828_v40 = vmul.f32 1.442695, %v6382_v1  ;;  %vm1669_vm4 = vcmask 195712  }
 0x51e   :  { %v4741_v23 = vpop.eup %4740  ;;  %2131 = vrot.lane.b32.xlu0 %v2123_v6, %s4813_s17  ;;  %2137 = vrot.lane.b32.xlu1 %v2126_v19, %s4813_s17  ;;  %v2125_v50 = vsel %vm2109_vm8, %v6331_v37, %v3439_v63  ;;  %v2973_v6 = vld [vmem:[%s6545_s7 + $0x28] sm:$0xff]  ;;  %vm2380_vm8 = vcmask 392512  }
 0x51f   :  { %v4743_v58 = vpop.eup %4742  ;;  %v3448_v9 = vadd.f32 -1.0, %v4741_v23  ;;  %4756 = vpow2.f32 %v2828_v40  ;;  %v4398_v33 = vpack.c.bf16 %v2973_v6, %v2972_v49  ;;  %v2978_v23 = vld [vmem:[%s6545_s7 + $0x50] sm:$0xff]  ;;  %v4414_v40 = vpack.c.bf16 %v2981_v59, %v2980_v32 }
 0x520   :  { %v3447_v24 = vadd.f32 -1.0, %v4743_v58  ;;  %v4745_v13 = vpop.eup %4744  ;;  %4758 = vpow2.f32 %v2826_v62  ;;  %v2979_v58 = vld [vmem:[%s6545_s7 + $0x58] sm:$0xff] }
 0x521   :  { %v2363_v14 = vsel %vm2347_vm6, %v6342_v28, %v3448_v9  ;;  %v3453_v28 = vadd.f32 -1.0, %v4745_v13  ;;  %v4410_v9 = vpack.c.bf16 %v2979_v58, %v2978_v23  ;;  %vm1906_vm6 = vcmask 261312  }
 0x522   :  { %2374 = vrot.lane.b32.xlu1 %v2363_v14, %s4814_s18  ;;  %v2362_v60 = vsel %vm2346_vm7, %v6345_v17, %v3447_v24  ;;  %v4747_v44 = vpop.eup %4746  ;;  %v2982_v24 = vld [vmem:[%s6545_s7 + $0x70] sm:$0xff]  ;;  %vm2143_vm7 = vcmask 326912  }
 0x523   :  { %2372 = vrot.lane.b32.xlu0 %v2362_v60, %s4814_s18  ;;  %v4749_v26 = vpop.eup %4748  ;;  %v2597_v37 = vsel %vm2581_vm9, %v6347_v3, %v3453_v28  ;;  %v3462_v36 = vadd.f32 -1.0, %v4747_v44  ;;  %v4386_v3 = vpack.c.bf16 %v2870_v51, %v2869_v42  ;;  %v4418_v62 = vpack.c.bf16 %v2983_v20, %v2982_v24 }
 0x524   :  { %v4751_v17 = vpop.eup %4750  ;;  %v3461_v48 = vadd.f32 -1.0, %v4749_v26  ;;  %vm2617_vm9 = vcmask 458112  }
 0x525   :  { %v3454_v16 = vadd.f32 -1.0, %v4751_v17  ;;  %v4753_v46 = vpop.eup %4752  ;;  %4387 = vmatprep.subr.bf16.mxu0 %v4386_v3 }
 0x526   :  { %2135 = vrot.lane.b32.xlu1 %v2125_v50, %s4813_s17  ;;  %v4755_v53 = vpop.eup %4754  ;;  %v2834_v30 = vsel %vm2818_vm11, %v6363_v52, %v3461_v48  ;;  %v3456_v54 = vadd.f32 -1.0, %v4753_v46  ;;  %4389 = vmatpush3.bf16.msra.mxu0 %v4386_v3 }
 0x527   :  { %v2598_v21 = vsel %vm2582_vm10, %v6358_v11, %v3454_v16  ;;  %v2835_v11 = vsel %vm2819_vm12, %v6360_v43, %v3462_v36  ;;  %v3455_v56 = vadd.f32 -1.0, %v4755_v53  ;;  %4422 = vmatprep.subr.bf16.mxu0 %v6562_v41  ;;  %v2968_v43 = vld [vmem:[%s6545_s7] sm:$0xff]  ;;  %vm2854_vm10 = vcmask 523712  }
 0x528   :  { %2607 = vrot.lane.b32.xlu0 %v2598_v21, %s4815_s29  ;;  %v2600_v45 = vsel %vm2584_vm13, %v6370_v12, %v3456_v54  ;;  %v2970_v12 = vld [vmem:[%s6545_s7 + $0x10] sm:$0xff] }
 0x529   :  { %v4757_v2 = vpop.eup %4756  ;;  %v2599_v22 = vsel %vm2583_vm14, %v6374_v25, %v3455_v56  ;;  %v4390_v25 = vpack.c.bf16 %v2969_v35, %v2968_v43  ;;  %v4394_v31 = vpack.c.bf16 %v2971_v15, %v2970_v12 }
 0x52a   :  { %2605 = vrot.lane.b32.xlu1 %v2597_v37, %s4815_s29  ;;  %v4759_v39 = vpop.eup %4758  ;;  %v3464_v52 = vadd.f32 -1.0, %v4757_v2 }
 0x52b   :  { %v3463_v7 = vadd.f32 -1.0, %v4759_v39  ;;  %4391 = vmatprep.subr.bf16.mxu1 %v4390_v25 }
 0x52c   :  { %2844 = vrot.lane.b32.xlu0 %v2835_v11, %s4816_s12  ;;  %v2837_v47 = vsel %vm2821_vm15, %v6382_v1, %v3464_v52  ;;  %4393 = vmatpush3.bf16.msra.mxu1 %v4390_v25  ;;  %v2975_v1 = vld [vmem:[%s6545_s7 + $0x38] sm:$0xff]  ;;  %v6563_v52 = vmov 0.0   ;;  %v3069_v25 = vld [vmem:[%s6546_s8] sm:$0x1] }
 0x52d   :  { %v2836_v61 = vsel %vm2820_vm2, %v6385_v29, %v3463_v7  ;;  %4395 = vmatprep.subr.bf16.mxu1 %v4394_v31  ;;  %v4402_v5 = vpack.c.bf16 %v2975_v1, %v2974_v34  ;;  %v2977_v29 = vld [vmem:[%s6545_s7 + $0x48] sm:$0xff] }
 0x52e   :  { %2842 = vrot.lane.b32.xlu1 %v2834_v30, %s4816_s12  ;;  %v4406_v19 = vpack.c.bf16 %v2977_v29, %v2976_v0 }
 0x530   :  { %2609 = vrot.lane.b32.xlu0 %v2599_v22, %s4815_s29  ;;  %4397 = vmatpush3.bf16.msra.mxu1 %v4394_v31 }
 0x531   :  { %4399 = vmatprep.subr.bf16.mxu1 %v4398_v33 }
 0x532   :  { %2611 = vrot.lane.b32.xlu1 %v2600_v45, %s4815_s29 }
 0x534   :  { %2846 = vrot.lane.b32.xlu0 %v2836_v61, %s4816_s12  ;;  %4401 = vmatpush3.bf16.msra.mxu1 %v4398_v33  ;;  %v6564_v33 = vsub.s32 0, %v5695_v38 }
 0x535   :  { %4403 = vmatprep.subr.bf16.mxu1 %v4402_v5 }
 0x536   :  { %2848 = vrot.lane.b32.xlu1 %v2837_v47, %s4816_s12 }
 0x538   :  { %4405 = vmatpush3.bf16.msra.mxu1 %v4402_v5 }
 0x539   :  { %4407 = vmatprep.subr.bf16.mxu1 %v4406_v19 }
 0x53c   :  { %4409 = vmatpush3.bf16.msra.mxu1 %v4406_v19 }
 0x53d   :  { %4411 = vmatprep.subr.bf16.mxu1 %v4410_v9 }
 0x540   :  { %4413 = vmatpush3.bf16.msra.mxu1 %v4410_v9 }
 0x541   :  { %4415 = vmatprep.subr.bf16.mxu1 %v4414_v40 }
 0x544   :  { %4417 = vmatpush3.bf16.msra.mxu1 %v4414_v40 }
 0x545   :  { %4419 = vmatprep.subr.bf16.mxu1 %v4418_v62 }
 0x548   :  { %4421 = vmatpush3.bf16.msra.mxu1 %v4418_v62 }
 0x553   :  { %v1423_v14 = vpop.permute.xlu1 %1422 }
 0x554   :  { %1434 = vst.msk [vmem:[#allocation2 + $0x8] sm:$0xff] %vm1432_vm3, %v1423_v14  ;;  %v1421_v63 = vpop.permute.xlu0 %1420  ;;  %v6565_v14 = vld [vmem:[#allocation5_spill] sm:$0xff] }
 0x555   :  { %1433 = vst.msk [vmem:[#allocation2] sm:$0xff] %vm1432_vm3, %v1421_v63 }
 0x574   :  { %v1427_v13 = vpop.permute.xlu0 %1426 }
 0x575   :  { %1436 = vst.msk [vmem:[#allocation2 + $0x18] sm:$0xff] %vm1432_vm3, %v1427_v13  ;;  %v1425_v60 = vpop.permute.xlu1 %1424 }
 0x576   :  { %1435 = vst.msk [vmem:[#allocation2 + $0x10] sm:$0xff] %vm1432_vm3, %v1425_v60  ;;  %v6566_v60 = vld [vmem:[#allocation4_spill] sm:$0xff] }
 0x578   :  { %v1658_v57 = vpop.permute.xlu0 %1657 }
 0x579   :  { %1670 = vst.msk [vmem:[#allocation2] sm:$0xff] %vm1669_vm4, %v1658_v57  ;;  %v1660_v18 = vpop.permute.xlu1 %1659 }
 0x57a   :  { %1671 = vst.msk [vmem:[#allocation2 + $0x8] sm:$0xff] %vm1669_vm4, %v1660_v18 }
 0x57c   :  { %v1895_v4 = vpop.permute.xlu0 %1894 }
 0x57d   :  { %1907 = vst.msk [vmem:[#allocation2] sm:$0xff] %vm1906_vm6, %v1895_v4  ;;  %v1897_v44 = vpop.permute.xlu1 %1896 }
 0x57e   :  { %1908 = vst.msk [vmem:[#allocation2 + $0x8] sm:$0xff] %vm1906_vm6, %v1897_v44 }
 0x580   :  { %v1664_v50 = vpop.permute.xlu0 %1663 }
 0x581   :  { %1673 = vst.msk [vmem:[#allocation2 + $0x18] sm:$0xff] %vm1669_vm4, %v1664_v50  ;;  %v1662_v28 = vpop.permute.xlu1 %1661  ;;  %v6567_v50 = vld [vmem:[#allocation3_spill] sm:$0xff] }
 0x582   :  { %1672 = vst.msk [vmem:[#allocation2 + $0x10] sm:$0xff] %vm1669_vm4, %v1662_v28 }
 0x584   :  { %v1901_v26 = vpop.permute.xlu0 %1900 }
 0x585   :  { %1910 = vst.msk [vmem:[#allocation2 + $0x18] sm:$0xff] %vm1906_vm6, %v1901_v26  ;;  %v1899_v8 = vpop.permute.xlu1 %1898 }
 0x586   :  { %1909 = vst.msk [vmem:[#allocation2 + $0x10] sm:$0xff] %vm1906_vm6, %v1899_v8 }
 0x588   :  { %v2134_v55 = vpop.permute.xlu0 %2133 }
 0x589   :  { %2145 = vst.msk [vmem:[#allocation2 + $0x8] sm:$0xff] %vm2143_vm7, %v2134_v55  ;;  %v2369_v17 = vpop.permute.xlu1 %2368 }
 0x58c   :  { %v2371_v27 = vpop.permute.xlu0 %2370 }
 0x58d   :  { %2382 = vst.msk [vmem:[#allocation2 + $0x8] sm:$0xff] %vm2380_vm8, %v2371_v27 }
 0x590   :  { %v2132_v16 = vpop.permute.xlu0 %2131  ;;  %v2138_v37 = vpop.permute.xlu1 %2137 }
 0x591   :  { %2144 = vst.msk [vmem:[#allocation2] sm:$0xff] %vm2143_vm7, %v2132_v16  ;;  %2147 = vst.msk [vmem:[#allocation2 + $0x18] sm:$0xff] %vm2143_vm7, %v2138_v37 }
 0x592   :  { %2381 = vst.msk [vmem:[#allocation2] sm:$0xff] %vm2380_vm8, %v2369_v17 }
 0x594   :  { %v2375_v48 = vpop.permute.xlu1 %2374 }
 0x595   :  { %2384 = vst.msk [vmem:[#allocation2 + $0x18] sm:$0xff] %vm2380_vm8, %v2375_v48  ;;  %v2373_v46 = vpop.permute.xlu0 %2372 }
 0x598   :  { %v2136_v21 = vpop.permute.xlu1 %2135 }
 0x599   :  { %2146 = vst.msk [vmem:[#allocation2 + $0x10] sm:$0xff] %vm2143_vm7, %v2136_v21 }
 0x59a   :  { %2383 = vst.msk [vmem:[#allocation2 + $0x10] sm:$0xff] %vm2380_vm8, %v2373_v46  ;;  %v2608_v42 = vpop.permute.xlu0 %2607 }
 0x59b   :  { %2619 = vst.msk [vmem:[#allocation2 + $0x8] sm:$0xff] %vm2617_vm9, %v2608_v42 }
 0x59c   :  { %v2606_v36 = vpop.permute.xlu1 %2605 }
 0x59d   :  { %2618 = vst.msk [vmem:[#allocation2] sm:$0xff] %vm2617_vm9, %v2606_v36 }
 0x59e   :  { %v2845_v53 = vpop.permute.xlu0 %2844 }
 0x59f   :  { %2856 = vst.msk [vmem:[#allocation2 + $0x8] sm:$0xff] %vm2854_vm10, %v2845_v53 }
 0x5a0   :  { %v2843_v51 = vpop.permute.xlu1 %2842 }
 0x5a1   :  { %2855 = vst.msk [vmem:[#allocation2] sm:$0xff] %vm2854_vm10, %v2843_v51 }
 0x5a2   :  { %v2610_v30 = vpop.permute.xlu0 %2609 }
 0x5a3   :  { %2620 = vst.msk [vmem:[#allocation2 + $0x10] sm:$0xff] %vm2617_vm9, %v2610_v30 }
 0x5a4   :  { %v2612_v3 = vpop.permute.xlu1 %2611 }
 0x5a5   :  { %2621 = vst.msk [vmem:[#allocation2 + $0x18] sm:$0xff] %vm2617_vm9, %v2612_v3 }
 0x5a6   :  { %v2847_v11 = vpop.permute.xlu0 %2846  ;;  %v2860_v56 = vld [vmem:[#allocation2 + $0x8] sm:$0xff] }
 0x5a7   :  { %2857 = vst.msk [vmem:[#allocation2 + $0x10] sm:$0xff] %vm2854_vm10, %v2847_v11 }
 0x5a8   :  { %v2849_v54 = vpop.permute.xlu1 %2848  ;;  %v2859_v2 = vld [vmem:[#allocation2] sm:$0xff] }
 0x5a9   :  { %2858 = vst.msk [vmem:[#allocation2 + $0x18] sm:$0xff] %vm2854_vm10, %v2849_v54  ;;  %4025 = vmatprep.mubr.msk.f32.mxu0 %vm810_vm0, %v2859_v2 }
 0x5aa   :  { %4026 = vmatmul.mubr.msk.f32.vlgmr.msra.gmra.mrb[44].mxu0 %vm810_vm0, %v2860_v56 }
 0x5ae   :  { %v2861_v45 = vld [vmem:[#allocation2 + $0x10] sm:$0xff] }
 0x5af   :  { %4028 = vmatprep.mubr.msk.f32.mxu0 %vm810_vm0, %v2861_v45 }
 0x5b0   :  { %v2862_v39 = vld [vmem:[#allocation2 + $0x18] sm:$0xff] }
 0x5b1   :  { %4029 = vmatmul.mubr.msk.f32.gmra.mrb[46].mxu0 %vm810_vm0, %v2862_v39 }
 0x5b2   :  { %4077 = vmatprep.mubr.msk.f32.mxu0 %vm4793_vm1, %v6563_v52 }
 0x67d   :  { %v4027_v22 = vpop.f32.mrb[44].mxu0 }
 0x67e   :  { %v2949_v7 = vpop.f32.mrb[45].mxu0 }
 0x67f   :  { %v4423_v43 = vpack.c.bf16 %v4027_v22, %v2949_v7  ;;  %4063 = vmatprep.mubr.f32.mxu1 %v2949_v7 }
 0x680   :  { %4064 = vmatmul.mubr.f32.vlgmr.msra.gmra.mrb[42].mxu1 %v4027_v22 }
 0x681   :  { %4424 = vmatpush3.bf16.xpose.msra.mxu0 %v4423_v43  ;;  %4436 = vmatprep.subr.bf16.mxu1 %v4423_v43 }
 0x682   :  { %4438 = vmatpush3.bf16.msra.mxu1 %v4423_v43  ;;  %4425 = vmatprep.subr.bf16.mxu0 %v6562_v41 }
 0x684   :  { %v4030_v35 = vpop.f32.mrb[46].mxu0 }
 0x685   :  { %v2959_v12 = vpop.f32.mrb[47].mxu0 }
 0x686   :  { %v4426_v47 = vpack.c.bf16 %v4030_v35, %v2959_v12  ;;  %4066 = vmatprep.mubr.f32.mxu1 %v2959_v12 }
 0x687   :  { %4067 = vmatmul.mubr.f32.gmra.mrb[44].mxu1 %v4030_v35 }
 0x688   :  { %4437 = vmatprep.subr.bf16.mxu1 %v4426_v47 }
 0x689   :  { %4427 = vmatpush3.bf16.xpose.msra.mxu0 %v4426_v47  ;;  %4439 = vmatpush3.bf16.msra.mxu1 %v4426_v47 }
 0x68a   :  { %4429 = vmatprep.subr.bf16.mxu0 %v4423_v43 }
 0x690   :  { %4078 = vmatmul.mubr.f32.vlgmr.msra.gmra.mrb[48].mxu0 %v3069_v25 }
 0x691   :  { %4431 = vmatpush3.bf16.msra.mxu0 %v4423_v43 }
 0x692   :  { %4433 = vmatprep.subr.bf16.mxu0 %v4426_v47 }
 0x695   :  { %4435 = vmatpush3.bf16.msra.mxu0 %v4426_v47 }
 0x753   :  { %v4065_v15 = vpop.f32.mrb[42].mxu1 }
 0x754   :  { %v3050_v61 = vpop.f32.mrb[43].mxu1 }
 0x755   :  { %3142 = vperm.xlu0 %4566, %v3050_v61  }
 0x75a   :  { %v4068_v41 = vpop.f32.mrb[44].mxu1 }
 0x75b   :  { %3157 = vperm.xlu0 %4566, %v4068_v41   ;;  %v3060_v31 = vpop.f32.mrb[45].mxu1 }
 0x75c   :  { %3152 = vperm.xlu1 %4567, %v3060_v31   ;;  %v6568_v31 = vlaneseq }
 0x760   :  { %3147 = vperm.xlu1 %4567, %v4065_v15  }
 0x763   :  { %v3136_v49 = vpop.f32.mrb[48].mxu0 }
 0x764   :  { %v4079_v6 = vpop.f32.mrb[49].mxu0  ;;  %v3163_v34 = vrot.slane %v3136_v49, %v6564_v33  ;;  %v3333_v49 = vand.u32 127, %v6568_v31 }
 0x765   :  { %v3469_v6 = vld [vmem:[%s6547_s9] ss:$0 sm:$0xff] }
 0x766   :  { %vm3334_vm13 = vcmp.lt.s32.totalorder %v3333_v49, 7 }
 0x7d4   :  { %v3143_v1 = vpop.permute.xlu0 %3142 }
 0x7d5   :  { %v3164_v5 = vadd.f32 %v3163_v34, %v3143_v1 }
 0x7d7   :  { %vm3168_vm0 = vcmp.gt.f32.partialorder %v3164_v5, 0.0  ;;  %v3172_v0 = vmul.f32 0.2, %v3164_v5 }
 0x7d9   :  { %v3176_v29 = vsel %vm3168_vm0, %v3164_v5, %v3172_v0 }
 0x7da   :  { %v3180_v19 = vadd.f32 %v3176_v29, %v5779_v10  ;;  %v3158_v23 = vpop.permute.xlu0 %3157 }
 0x7db   :  { %v3167_v9 = vadd.f32 %v3163_v34, %v3158_v23  ;;  %v3153_v32 = vpop.permute.xlu1 %3152 }
 0x7dc   :  { %v3184_v58 = vsel %vm1027_vm5, %v3180_v19, -inf  ;;  %v3166_v59 = vadd.f32 %v3163_v34, %v3153_v32 }
 0x7dd   :  { %3185 = vmax.xlane.f32.xlu1 %v3184_v58  ;;  %vm3171_vm1 = vcmp.gt.f32.partialorder %v3167_v9, 0.0  ;;  %v3175_v40 = vmul.f32 0.2, %v3167_v9 }
 0x7de   :  { %vm3170_vm11 = vcmp.gt.f32.partialorder %v3166_v59, 0.0  ;;  %v3174_v24 = vmul.f32 0.2, %v3166_v59 }
 0x7df   :  { %v3148_v38 = vpop.permute.xlu1 %3147  ;;  %v3179_v20 = vsel %vm3171_vm1, %v3167_v9, %v3175_v40 }
 0x7e0   :  { %v3165_v62 = vadd.f32 %v3163_v34, %v3148_v38  ;;  %v3183_v63 = vadd.f32 %v3179_v20, %v6565_v14  ;;  %v3178_v13 = vsel %vm3170_vm11, %v3166_v59, %v3174_v24 }
 0x7e1   :  { %v3182_v57 = vadd.f32 %v3178_v13, %v6566_v60 }
 0x7e2   :  { %vm3169_vm12 = vcmp.gt.f32.partialorder %v3165_v62, 0.0  ;;  %v3173_v10 = vmul.f32 0.2, %v3165_v62  ;;  %v3193_v18 = vsel %vm1027_vm5, %v3183_v63, -inf }
 0x7e3   :  { %3194 = vmax.xlane.f32.xlu1 %v3193_v18  ;;  %v3190_v4 = vsel %vm1027_vm5, %v3182_v57, -inf }
 0x7e4   :  { %3191 = vmax.xlane.f32.xlu0 %v3190_v4  ;;  %v3177_v44 = vsel %vm3169_vm12, %v3165_v62, %v3173_v10 }
 0x7e5   :  { %v3181_v28 = vadd.f32 %v3177_v44, %v6567_v50 }
 0x7e7   :  { %v3187_v26 = vsel %vm1027_vm5, %v3181_v28, -inf }
 0x7e8   :  { %3188 = vmax.xlane.f32.xlu0 %v3187_v26 }
 0x86a   :  { %v3186_v8 = vpop.xlane.xlu1 %3185 }
 0x86b   :  { %v3196_v55 = vsub.f32 %v3180_v19, %v3186_v8 }
 0x86d   :  { %v3200_v17 = vmul.f32 1.442695, %v3196_v55 }
 0x86f   :  { %4760 = vpow2.f32 %v3200_v17 }
 0x870   :  { %v3195_v27 = vpop.xlane.xlu1 %3194 }
 0x871   :  { %v3199_v16 = vsub.f32 %v3183_v63, %v3195_v27  ;;  %v3192_v37 = vpop.xlane.xlu0 %3191 }
 0x872   :  { %v3198_v48 = vsub.f32 %v3182_v57, %v3192_v37 }
 0x873   :  { %v3206_v46 = vmul.f32 1.442695, %v3199_v16 }
 0x874   :  { %v3204_v21 = vmul.f32 1.442695, %v3198_v48 }
 0x875   :  { %v3189_v36 = vpop.xlane.xlu0 %3188 }
 0x876   :  { %4762 = vpow2.f32 %v3204_v21  ;;  %v3197_v42 = vsub.f32 %v3181_v28, %v3189_v36 }
 0x877   :  { %4764 = vpow2.f32 %v3206_v46 }
 0x878   :  { %v3202_v53 = vmul.f32 1.442695, %v3197_v42 }
 0x879   :  { %v4761_v51 = vpop.eup %4760 }
 0x87a   :  { %v3208_v3 = vsel %vm1027_vm5, %v4761_v51, 0.0  ;;  %4766 = vpow2.f32 %v3202_v53 }
 0x87b   :  { %3209 = vadd.xlane.f32.xlu0 %v3208_v3 }
 0x880   :  { %v4763_v30 = vpop.eup %4762 }
 0x881   :  { %v3214_v54 = vsel %vm1027_vm5, %v4763_v30, 0.0  ;;  %v4765_v2 = vpop.eup %4764 }
 0x882   :  { %3215 = vadd.xlane.f32.xlu1 %v3214_v54  ;;  %v3217_v39 = vsel %vm1027_vm5, %v4765_v2, 0.0 }
 0x884   :  { %v4767_v11 = vpop.eup %4766 }
 0x885   :  { %v3211_v56 = vsel %vm1027_vm5, %v4767_v11, 0.0 }
 0x886   :  { %3212 = vadd.xlane.f32.xlu0 %v3211_v56  ;;  %3218 = vadd.xlane.f32.xlu1 %v3217_v39 }
 0x908   :  { %v3210_v45 = vpop.xlane.xlu0 %3209 }
 0x909   :  { %4768 = vrcp.f32 %v3210_v45 }
 0x90f   :  { %v3216_v52 = vpop.xlane.xlu1 %3215 }
 0x910   :  { %4770 = vrcp.f32 %v3216_v52 }
 0x913   :  { %v4769_v22 = vpop.eup %4768  ;;  %v3213_v43 = vpop.xlane.xlu0 %3212 }
 0x914   :  { %v3221_v7 = vmul.f32 %v4769_v22, %v4761_v51  ;;  %v3219_v35 = vpop.xlane.xlu1 %3218  ;;  %4772 = vrcp.f32 %v3213_v43 }
 0x915   :  { %4774 = vrcp.f32 %v3219_v35 }
 0x916   :  { %4088 = vmatprep.mubr.msk.f32.mxu0 %vm1027_vm5, %v3221_v7 }
 0x91a   :  { %v4771_v12 = vpop.eup %4770 }
 0x91b   :  { %v3225_v47 = vmul.f32 %v4771_v12, %v4763_v30 }
 0x91d   :  { %4091 = vmatprep.mubr.msk.f32.mxu1 %vm1027_vm5, %v3225_v47 }
 0x91e   :  { %v4773_v25 = vpop.eup %4772 }
 0x91f   :  { %v4775_v15 = vpop.eup %4774  ;;  %v3223_v61 = vmul.f32 %v4773_v25, %v4767_v11 }
 0x920   :  { %v3227_v41 = vmul.f32 %v4775_v15, %v4765_v2 }
 0x921   :  { %4089 = vmatmul.mubr.msk.f32.vlgmr.msra.gmra.mrb[50].mxu0 %vm1027_vm5, %v3223_v61 }
 0x922   :  { %4092 = vmatmul.mubr.msk.f32.vlgmr.msra.gmra.mrb[46].mxu1 %vm1027_vm5, %v3227_v41 }
 0x9f4   :  { %v4090_v33 = vpop.f32.mrb[50].mxu0 }
 0x9f5   :  { %v3319_v34 = vadd.f32 %v4090_v33, %v3469_v6  ;;  %v4093_v1 = vpop.f32.mrb[46].mxu1  ;;  %v3313_v5 = vpop.f32.mrb[51].mxu0 }
 0x9f6   :  { %v3314_v0 = vadd.f32 %v3469_v6, %v3313_v5  ;;  %v3323_v29 = vpop.f32.mrb[47].mxu1  ;;  %v3329_v19 = vadd.f32 %v4093_v1, %v3469_v6 }
 0x9f7   :  { %v3336_v23 = vsel %vm3334_vm13, %v3319_v34, -1e+30  ;;  %v3324_v58 = vadd.f32 %v3469_v6, %v3323_v29 }
 0x9f8   :  { %3341 = vmax.xlane.f32.xlu1 %v3336_v23  ;;  %v3335_v9 = vsel %vm3334_vm13, %v3314_v0, -1e+30  ;;  %v3338_v32 = vsel %vm3334_vm13, %v3329_v19, -1e+30 }
 0x9f9   :  { %3339 = vmax.xlane.f32.xlu0 %v3335_v9  ;;  %v3337_v59 = vsel %vm3334_vm13, %v3324_v58, -1e+30 }
 0x9fc   :  { %3345 = vmax.xlane.f32.xlu1 %v3338_v32 }
 0x9fd   :  { %3343 = vmax.xlane.f32.xlu0 %v3337_v59 }
 0xa85   :  { %v3342_v40 = vpop.xlane.xlu1 %3341 }
 0xa86   :  { %v3348_v24 = vsub.f32 %v3336_v23, %v3342_v40  ;;  %v3340_v38 = vpop.xlane.xlu0 %3339 }
 0xa87   :  { %v3347_v20 = vsub.f32 %v3335_v9, %v3340_v38 }
 0xa88   :  { %v3353_v62 = vmul.f32 1.442695, %v3348_v24 }
 0xa89   :  { %v3351_v14 = vmul.f32 1.442695, %v3347_v20  ;;  %v3346_v63 = vpop.xlane.xlu1 %3345 }
 0xa8a   :  { %4776 = vpow2.f32 %v3353_v62  ;;  %v3350_v13 = vsub.f32 %v3338_v32, %v3346_v63  ;;  %v3344_v60 = vpop.xlane.xlu0 %3343 }
 0xa8b   :  { %4778 = vpow2.f32 %v3351_v14  ;;  %v3349_v57 = vsub.f32 %v3337_v59, %v3344_v60 }
 0xa8c   :  { %v3357_v10 = vmul.f32 1.442695, %v3350_v13 }
 0xa8d   :  { %v3355_v18 = vmul.f32 1.442695, %v3349_v57 }
 0xa8e   :  { %4780 = vpow2.f32 %v3357_v10 }
 0xa8f   :  { %4782 = vpow2.f32 %v3355_v18 }
 0xa94   :  { %v4777_v4 = vpop.eup %4776 }
 0xa95   :  { %v4779_v44 = vpop.eup %4778  ;;  %3361 = vadd.xlane.f32.xlu1 %v4777_v4 }
 0xa96   :  { %3359 = vadd.xlane.f32.xlu0 %v4779_v44 }
 0xa98   :  { %v4781_v50 = vpop.eup %4780 }
 0xa99   :  { %v4783_v28 = vpop.eup %4782  ;;  %3365 = vadd.xlane.f32.xlu1 %v4781_v50 }
 0xa9a   :  { %3363 = vadd.xlane.f32.xlu0 %v4783_v28 }
 0xb22   :  { %v3362_v26 = vpop.xlane.xlu1 %3361 }
 0xb23   :  { %4784 = vlog2.f32 %v3362_v26  ;;  %v3360_v8 = vpop.xlane.xlu0 %3359 }
 0xb24   :  { %4786 = vlog2.f32 %v3360_v8 }
 0xb26   :  { %v3366_v55 = vpop.xlane.xlu1 %3365 }
 0xb27   :  { %4788 = vlog2.f32 %v3366_v55  ;;  %v3364_v17 = vpop.xlane.xlu0 %3363 }
 0xb28   :  { %4790 = vlog2.f32 %v3364_v17 }
 0xb2d   :  { %v4785_v27 = vpop.eup %4784 }
 0xb2e   :  { %v4787_v16 = vpop.eup %4786  ;;  %v3370_v37 = vmul.f32 0.6931472, %v4785_v27 }
 0xb2f   :  { %v3368_v48 = vmul.f32 0.6931472, %v4787_v16 }
 0xb30   :  { %v3376_v46 = vsub.f32 %v3348_v24, %v3370_v37 }
 0xb31   :  { %v4789_v21 = vpop.eup %4788  ;;  %v3375_v36 = vsub.f32 %v3347_v20, %v3368_v48 }
 0xb32   :  { %v4791_v42 = vpop.eup %4790  ;;  %3380 = vst [vmem:[%s6548_s10 + $0x8] sm:$0xff] %v3376_v46  ;;  %v3374_v51 = vmul.f32 0.6931472, %v4789_v21 }
 0xb33   :  { %3379 = vst [vmem:[%s6548_s10] sm:$0xff] %v3375_v36  ;;  %v3372_v53 = vmul.f32 0.6931472, %v4791_v42 }
 0xb34   :  { %v3378_v3 = vsub.f32 %v3350_v13, %v3374_v51 }
 0xb35   :  { %v3377_v30 = vsub.f32 %v3349_v57, %v3372_v53 }
 0xb36   :  { %3382 = vst [vmem:[%s6548_s10 + $0x18] sm:$0xff] %v3378_v3 }
 0xb37   :  { %3381 = vst [vmem:[%s6548_s10 + $0x10] sm:$0xff] %v3377_v30 }

</bundles_post_ra>
